<compile_context>
chip_gen: v5e
topology: v5e:2x2
jax: 0.10.0
libtpu: 0.0.40
codegen_flags: <defaults>
</compile_context>

<pallas_src>
import functools

import jax
import jax.numpy as jnp
from jax.experimental import pallas as pl
from jax.experimental.pallas import tpu as pltpu

C_HIDDEN = 32      # hidden channels of the synthetic denoiser
KSIZE = 3          # conv kernel size (padding=1, "same" length)
HALO = 3           # receptive-field halo of 3 stacked k=3 / pad=1 convs
MAX_TILE_T = 8192  # max output samples per grid step (tunable per generation)


def _denoiser_kernel(x_ref, w1_ref, b1_ref, w2_ref, b2_ref, w3_ref, b3_ref,
                     out_ref, *, total_t, tile_t):
    """Fused 3-layer 1-D conv denoiser on one haloed time tile.

    x_ref   : (1, 1, 1, TILE_T + 2*HALO) f32  haloed waveform tile, time on lanes
    w1_ref  : (C, 3)     f32  Conv1d(1, C, 3) weights, [out_chan, tap]
    b1_ref  : (C, 1)     f32
    w2_ref  : (3, C, C)  f32  Conv1d(C, C, 3) weights, [tap, out_chan, in_chan]
    b2_ref  : (C, 1)     f32
    w3_ref  : (C, 3)     f32  Conv1d(C, 1, 3) weights, [in_chan, tap]
    b3_ref  : (1, 1)     f32
    out_ref : (1, 1, 1, TILE_T) f32  lane-dense output tile
    """
    TH = x_ref.shape[-1]            # TILE_T + 2*HALO
    n1 = TH - 2                     # width after one k=3 valid conv
    n2 = n1 - 2
    n3 = n2 - 2                     # == TILE_T

    # Global time base of this tile (output lane p of tile i is time i*tile_t+p).
    t_base = pl.program_id(1) * tile_t
    hp = jax.lax.Precision.HIGHEST

    x = x_ref[0, 0]                 # (1, TH), time lane-dense

    # ---- layer 1: Conv1d(1, C, 3, pad=1) + ReLU  (VPU broadcast mul) ----
    w1 = w1_ref[...]                # (C, 3)
    a1 = (w1[:, 0:1] * x[:, 0:n1]
          + w1[:, 1:2] * x[:, 1:n1 + 1]
          + w1[:, 2:3] * x[:, 2:n1 + 2]
          + b1_ref[...])            # (C, n1)
    h1 = jnp.maximum(a1, 0.0)
    # Per-layer zero-padding semantics: h1 at global times outside [0, T) must
    # be exactly zero before feeding layer 2 (ReLU(bias) != 0 otherwise).
    t1 = t_base + jax.lax.broadcasted_iota(jnp.int32, (1, n1), 1) - 2
    h1 = jnp.where(jnp.logical_and(t1 >= 0, t1 < total_t), h1, 0.0)

    # ---- layer 2: Conv1d(C, C, 3, pad=1) + ReLU ----
    # Three accumulating (C,C)x(C,n2) MXU matmuls on shifted h1 slices
    # (no (3C, n) concat buffer materialized).
    a2 = (jnp.dot(w2_ref[0], h1[:, 0:n2],
                  preferred_element_type=jnp.float32, precision=hp)
          + jnp.dot(w2_ref[1], h1[:, 1:n2 + 1],
                    preferred_element_type=jnp.float32, precision=hp)
          + jnp.dot(w2_ref[2], h1[:, 2:n2 + 2],
                    preferred_element_type=jnp.float32, precision=hp)
          + b2_ref[...])            # (C, n2)
    h2 = jnp.maximum(a2, 0.0)
    t2 = t_base + jax.lax.broadcasted_iota(jnp.int32, (1, n2), 1) - 1
    h2 = jnp.where(jnp.logical_and(t2 >= 0, t2 < total_t), h2, 0.0)

    # ---- layer 3: Conv1d(C, 1, 3, pad=1) ----
    # M=1 output row: skip the MXU entirely -> VPU tap-weighted multiplies,
    # then a single sublane (channel) reduce on the XLU.
    w3 = w3_ref[...]                # (C, 3)
    u = (w3[:, 0:1] * h2[:, 0:n3]
         + w3[:, 1:2] * h2[:, 1:n3 + 1]
         + w3[:, 2:3] * h2[:, 2:n3 + 2])          # (C, TILE_T)
    y = jnp.sum(u, axis=0, keepdims=True) + b3_ref[...]   # (1, TILE_T)
    out_ref[0, 0] = y               # dense, lane-aligned store


def _round_up(n, m):
    return ((n + m - 1) // m) * m


def _pick_tile(T, B, max_tile=MAX_TILE_T):
    """Choose a lane-dense (multiple of 128) time tile size."""
    if B == 1:
        # Split a single long waveform into >= 2 time tiles so the "parallel"
        # grid axis can shard across v7x's two TensorCores.
        tile = _round_up(max(pl.cdiv(T, 2), 1), 128)
    else:
        tile = _round_up(T, 128)
    return max(128, min(max_tile, tile))


def _denoiser_pallas_2d(audio2d, params):
    """audio2d: (B, T) float -> (B, T) denoised, one gridded pallas_call."""
    w1, b1, w2, b2, w3, b3 = params
    C = w1.shape[1]
    B, T = audio2d.shape

    tile_t = _pick_tile(T, B)
    n_tiles = pl.cdiv(T, tile_t)
    Tp = n_tiles * tile_t
    TH = tile_t + 2 * HALO

    # Kernel-friendly weight layouts (built once, resident in VMEM).
    w1col = jnp.transpose(w1).astype(jnp.float32)              # (C, 3)
    b1col = jnp.transpose(b1).astype(jnp.float32)              # (C, 1)
    w2taps = jnp.transpose(w2, (0, 2, 1)).astype(jnp.float32)  # (3, C, C) [tap,out,in]
    b2col = jnp.transpose(b2).astype(jnp.float32)              # (C, 1)
    w3col = jnp.transpose(w3[:, :, 0]).astype(jnp.float32)     # (C, 3) [in,tap]
    b3c = b3.astype(jnp.float32)                               # (1, 1)

    # Haloed, lane-dense time tiles xh[b, i, 0, p] = xpad[b, i*tile_t + p],
    # built from static pad/reshape/slice/concat (no XLA gather).  The zero
    # padding at both waveform ends doubles as the layer-1 pad=1 zeros; padding
    # up to Tp keeps every tile full (trailing garbage is trimmed after the
    # call — do NOT remove the [:, :T] trim below).
    xpad = jnp.pad(audio2d.astype(jnp.float32),
                   ((0, 0), (HALO, Tp - T + HALO)))            # (B, Tp + 2*HALO)
    body = xpad[:, :Tp].reshape(B, n_tiles, tile_t)            # lanes [0, tile_t)
    tail = jnp.pad(xpad[:, tile_t:], ((0, 0), (0, tile_t - 2 * HALO)))
    tail = tail.reshape(B, n_tiles, tile_t)[:, :, :2 * HALO]   # lanes [tile_t, TH)
    xh = jnp.concatenate([body, tail], axis=-1).reshape(B, n_tiles, 1, TH)

    kernel = functools.partial(_denoiser_kernel, total_t=T, tile_t=tile_t)
    const2 = lambda b, i: (0, 0)
    const3 = lambda b, i: (0, 0, 0)

    flops = int((6 * C * C + 12 * C) * B * Tp)
    bytes_accessed = int(4 * (xh.size + B * Tp + w1col.size + b1col.size
                              + w2taps.size + b2col.size + w3col.size + 1))

    out = pl.pallas_call(
        kernel,
        out_shape=jax.ShapeDtypeStruct((B, n_tiles, 1, tile_t), jnp.float32),
        grid_spec=pltpu.PrefetchScalarGridSpec(
            num_scalar_prefetch=0,
            grid=(B, n_tiles),
            in_specs=[
                pl.BlockSpec((1, 1, 1, TH), lambda b, i: (b, i, 0, 0)),  # haloed tile
                pl.BlockSpec((C, KSIZE), const2),        # w1 (resident)
                pl.BlockSpec((C, 1), const2),            # b1
                pl.BlockSpec((KSIZE, C, C), const3),     # w2 taps (resident)
                pl.BlockSpec((C, 1), const2),            # b2
                pl.BlockSpec((C, KSIZE), const2),        # w3 (resident)
                pl.BlockSpec((1, 1), const2),            # b3
            ],
            out_specs=pl.BlockSpec((1, 1, 1, tile_t), lambda b, i: (b, i, 0, 0)),
        ),
        compiler_params=pltpu.CompilerParams(
            dimension_semantics=("parallel", "parallel"),
            # <= ~48 MiB: above the 32 MiB scoped default (v5e/v6e headroom for
            # the big double-buffered tiles) and safely below v7x's 64 MiB VMEM.
            vmem_limit_bytes=48 * 1024 * 1024,
        ),
        cost_estimate=pl.CostEstimate(
            flops=flops, transcendentals=0, bytes_accessed=bytes_accessed),
    )(xh, w1col, b1col, w2taps, b2col, w3col, b3c)

    return out.reshape(B, Tp)[:, :T]


def denoiser_reconstruction(audio, params):
    """JAX equivalent of DenoiserReconstruction.forward."""
    if audio.ndim == 1:
        # recording = audio.unsqueeze(0); denoiser(recording).squeeze()
        return _denoiser_pallas_2d(audio[None, :], params)[0]
    # TODO(synk): the PyTorch 2-D branch is buggy (it reuses the whole batch as
    # the recording and calls torch.stack with an invalid `device` kwarg); here
    # the denoiser is applied per row — the evident intent — in a single
    # gridded pallas_call (batch folded into the grid).
    return _denoiser_pallas_2d(audio, params)


def make_params(key, c=C_HIDDEN):
    k1, k2, k3, k4, k5, k6 = jax.random.split(key, 6)
    w1 = jax.random.normal(k1, (KSIZE, c), jnp.float32) * 0.3        # (k, Cout), Cin=1
    b1 = jax.random.normal(k2, (1, c), jnp.float32) * 0.1
    w2 = jax.random.normal(k3, (KSIZE, c, c), jnp.float32) * 0.1     # (k, Cin, Cout)
    b2 = jax.random.normal(k4, (1, c), jnp.float32) * 0.1
    w3 = jax.random.normal(k5, (KSIZE, c, 1), jnp.float32) * 0.1     # (k, Cin, Cout=1)
    b3 = jax.random.normal(k6, (1, 1), jnp.float32) * 0.1
    return (w1, b1, w2, b2, w3, b3)


def _conv1d_ref(x, w, b):
    """x: (T, Cin), w: (k, Cin, Cout), b: (1, Cout); padding=1, stride=1."""
    T = x.shape[0]
    xp = jnp.pad(x, ((1, 1), (0, 0)))
    y = b
    for j in range(KSIZE):
        y = y + jnp.dot(xp[j:j + T], w[j], precision=jax.lax.Precision.HIGHEST)
    return y


def denoiser_reference(audio, params):
    w1, b1, w2, b2, w3, b3 = params
    x = audio.astype(jnp.float32)[:, None]               # (T, 1)
    h1 = jnp.maximum(_conv1d_ref(x, w1[:, None, :], b1), 0.0)
    h2 = jnp.maximum(_conv1d_ref(h1, w2, b2), 0.0)
    y = _conv1d_ref(h2, w3, b3)
    return y[:, 0]


if __name__ == "__main__":
    key = jax.random.PRNGKey(0)
    pkey, xkey, bkey = jax.random.split(key, 3)
    params = make_params(pkey)

    # --- 1-D waveform path (audio.ndim == 1); tile picker yields 2 time tiles ---
    T = 1024
    audio = jax.random.normal(xkey, (T,), jnp.float32) * 0.1
    out = jax.block_until_ready(denoiser_reconstruction(audio, params))
    ref = denoiser_reference(audio, params)
    assert out.shape == (T,), out.shape
    assert jnp.allclose(out, ref, rtol=2e-3, atol=2e-3), (
        float(jnp.max(jnp.abs(out - ref))))

    # --- batched path (single gridded call; T not a multiple of the tile grid) ---
    B, Tb = 2, 640
    batch = jax.random.normal(bkey, (B, Tb), jnp.float32) * 0.1
    outb = jax.block_until_ready(denoiser_reconstruction(batch, params))
    refb = jnp.stack([denoiser_reference(batch[i], params) for i in range(B)])
    assert outb.shape == (B, Tb), outb.shape
    assert jnp.allclose(outb, refb, rtol=2e-3, atol=2e-3), (
        float(jnp.max(jnp.abs(outb - refb))))

    print("KERNEL_OK")
</pallas_src>

<mosaic_0001>
module attributes {stable_mosaic.version = 11 : i64} {
  func.func @_denoiser_kernel(%arg0: i32, %arg1: i32, %arg2: memref<1x1x1x518xf32, #tpu.memory_space<vmem>>, %arg3: memref<32x3xf32, #tpu.memory_space<vmem>>, %arg4: memref<32x1xf32, #tpu.memory_space<vmem>>, %arg5: memref<3x32x32xf32, #tpu.memory_space<vmem>>, %arg6: memref<32x1xf32, #tpu.memory_space<vmem>>, %arg7: memref<32x3xf32, #tpu.memory_space<vmem>>, %arg8: memref<1x1xf32, #tpu.memory_space<vmem>>, %arg9: memref<1x1x1x512xf32, #tpu.memory_space<vmem>>) attributes {dimension_semantics = [#tpu.dimension_semantics<parallel>, #tpu.dimension_semantics<parallel>], iteration_bounds = array<i64: 1, 2>, scalar_prefetch = 0 : i64, scratch_operands = 0 : i64, tpu.core_type = #tpu.core_type<tc>, window_params = [{transform_indices = @transform_0, window_bounds = array<i64: 1, 1, 1, 518>}, {pipeline_mode = #tpu.pipeline_mode<synchronous>, transform_indices = @transform_1, window_bounds = array<i64: 32, 3>}, {pipeline_mode = #tpu.pipeline_mode<synchronous>, transform_indices = @transform_2, window_bounds = array<i64: 32, 1>}, {pipeline_mode = #tpu.pipeline_mode<synchronous>, transform_indices = @transform_3, window_bounds = array<i64: 3, 32, 32>}, {pipeline_mode = #tpu.pipeline_mode<synchronous>, transform_indices = @transform_4, window_bounds = array<i64: 32, 1>}, {pipeline_mode = #tpu.pipeline_mode<synchronous>, transform_indices = @transform_5, window_bounds = array<i64: 32, 3>}, {pipeline_mode = #tpu.pipeline_mode<synchronous>, transform_indices = @transform_6, window_bounds = array<i64: 1, 1>}, {transform_indices = @transform_7, window_bounds = array<i64: 1, 1, 1, 512>}]} {
    %c512_i32 = arith.constant 512 : i32
    %0 = arith.muli %arg1, %c512_i32 : i32
    %c0 = arith.constant 0 : index
    %c0_0 = arith.constant 0 : index
    %c0_1 = arith.constant 0 : index
    %c0_2 = arith.constant 0 : index
    %1 = vector.load %arg2[%c0, %c0_0, %c0_1, %c0_2] : memref<1x1x1x518xf32, #tpu.memory_space<vmem>>, vector<1x1x1x518xf32>
    %2 = vector.shape_cast %1 : vector<1x1x1x518xf32> to vector<1x518xf32>
    %c0_3 = arith.constant 0 : index
    %c0_4 = arith.constant 0 : index
    %3 = vector.load %arg3[%c0_3, %c0_4] : memref<32x3xf32, #tpu.memory_space<vmem>>, vector<32x3xf32>
    %4 = vector.extract_strided_slice %3 {offsets = [0, 0], sizes = [32, 1], strides = [1, 1]} : vector<32x3xf32> to vector<32x1xf32>
    %5 = vector.extract_strided_slice %2 {offsets = [0, 0], sizes = [1, 516], strides = [1, 1]} : vector<1x518xf32> to vector<1x516xf32>
    %6 = vector.broadcast %4 : vector<32x1xf32> to vector<32x516xf32>
    %7 = vector.broadcast %5 : vector<1x516xf32> to vector<32x516xf32>
    %8 = arith.mulf %6, %7 : vector<32x516xf32>
    %9 = vector.extract_strided_slice %3 {offsets = [0, 1], sizes = [32, 1], strides = [1, 1]} : vector<32x3xf32> to vector<32x1xf32>
    %10 = vector.extract_strided_slice %2 {offsets = [0, 1], sizes = [1, 516], strides = [1, 1]} : vector<1x518xf32> to vector<1x516xf32>
    %11 = vector.broadcast %9 : vector<32x1xf32> to vector<32x516xf32>
    %12 = vector.broadcast %10 : vector<1x516xf32> to vector<32x516xf32>
    %13 = arith.mulf %11, %12 : vector<32x516xf32>
    %14 = arith.addf %8, %13 : vector<32x516xf32>
    %15 = vector.extract_strided_slice %3 {offsets = [0, 2], sizes = [32, 1], strides = [1, 1]} : vector<32x3xf32> to vector<32x1xf32>
    %16 = vector.extract_strided_slice %2 {offsets = [0, 2], sizes = [1, 516], strides = [1, 1]} : vector<1x518xf32> to vector<1x516xf32>
    %17 = vector.broadcast %15 : vector<32x1xf32> to vector<32x516xf32>
    %18 = vector.broadcast %16 : vector<1x516xf32> to vector<32x516xf32>
    %19 = arith.mulf %17, %18 : vector<32x516xf32>
    %20 = arith.addf %14, %19 : vector<32x516xf32>
    %c0_5 = arith.constant 0 : index
    %c0_6 = arith.constant 0 : index
    %21 = vector.load %arg4[%c0_5, %c0_6] : memref<32x1xf32, #tpu.memory_space<vmem>>, vector<32x1xf32>
    %22 = vector.broadcast %21 : vector<32x1xf32> to vector<32x516xf32>
    %23 = arith.addf %20, %22 : vector<32x516xf32>
    %cst = arith.constant 0.000000e+00 : f32
    %24 = vector.broadcast %cst : f32 to vector<32x516xf32>
    %25 = arith.maximumf %23, %24 : vector<32x516xf32>
    %26 = tpu.iota {dimensions = array<i32: 1>} : vector<1x516xi32>
    %27 = vector.broadcast %0 : i32 to vector<1x516xi32>
    %28 = arith.addi %27, %26 : vector<1x516xi32>
    %c2_i32 = arith.constant 2 : i32
    %29 = vector.broadcast %c2_i32 : i32 to vector<1x516xi32>
    %30 = arith.subi %28, %29 : vector<1x516xi32>
    %c0_i32 = arith.constant 0 : i32
    %31 = vector.broadcast %c0_i32 : i32 to vector<1x516xi32>
    %32 = arith.cmpi sge, %30, %31 : vector<1x516xi32>
    %c1024_i32 = arith.constant 1024 : i32
    %33 = vector.broadcast %c1024_i32 : i32 to vector<1x516xi32>
    %34 = arith.cmpi slt, %30, %33 : vector<1x516xi32>
    %35 = arith.andi %32, %34 : vector<1x516xi1>
    %cst_7 = arith.constant 0.000000e+00 : f32
    %36 = vector.shape_cast %35 : vector<1x516xi1> to vector<1x516xi1>
    %37 = vector.broadcast %36 : vector<1x516xi1> to vector<32x516xi1>
    %38 = vector.broadcast %cst_7 : f32 to vector<32x516xf32>
    %39 = arith.select %37, %25, %38 : vector<32x516xi1>, vector<32x516xf32>
    %c0_8 = arith.constant 0 : index
    %c0_9 = arith.constant 0 : index
    %c0_10 = arith.constant 0 : index
    %40 = vector.load %arg5[%c0_8, %c0_9, %c0_10] : memref<3x32x32xf32, #tpu.memory_space<vmem>>, vector<1x32x32xf32>
    %41 = vector.shape_cast %40 : vector<1x32x32xf32> to vector<32x32xf32>
    %42 = vector.extract_strided_slice %39 {offsets = [0, 0], sizes = [32, 514], strides = [1, 1]} : vector<32x516xf32> to vector<32x514xf32>
    %cst_11 = arith.constant dense<0.000000e+00> : vector<32x514xf32>
    %43 = tpu.matmul %41, %42, %cst_11 {dimension_numbers = #tpu.dot_dimension_numbers<[1], [0], [0], [1], [0, 0, 1, 1], [], []>, precision = #tpu.contract_precision<fp32>} : vector<32x32xf32>, vector<32x514xf32>, vector<32x514xf32> -> vector<32x514xf32>
    %c1 = arith.constant 1 : index
    %c0_12 = arith.constant 0 : index
    %c0_13 = arith.constant 0 : index
    %44 = vector.load %arg5[%c1, %c0_12, %c0_13] : memref<3x32x32xf32, #tpu.memory_space<vmem>>, vector<1x32x32xf32>
    %45 = vector.shape_cast %44 : vector<1x32x32xf32> to vector<32x32xf32>
    %46 = vector.extract_strided_slice %39 {offsets = [0, 1], sizes = [32, 514], strides = [1, 1]} : vector<32x516xf32> to vector<32x514xf32>
    %cst_14 = arith.constant dense<0.000000e+00> : vector<32x514xf32>
    %47 = tpu.matmul %45, %46, %cst_14 {dimension_numbers = #tpu.dot_dimension_numbers<[1], [0], [0], [1], [0, 0, 1, 1], [], []>, precision = #tpu.contract_precision<fp32>} : vector<32x32xf32>, vector<32x514xf32>, vector<32x514xf32> -> vector<32x514xf32>
    %48 = arith.addf %43, %47 : vector<32x514xf32>
    %c2 = arith.constant 2 : index
    %c0_15 = arith.constant 0 : index
    %c0_16 = arith.constant 0 : index
    %49 = vector.load %arg5[%c2, %c0_15, %c0_16] : memref<3x32x32xf32, #tpu.memory_space<vmem>>, vector<1x32x32xf32>
    %50 = vector.shape_cast %49 : vector<1x32x32xf32> to vector<32x32xf32>
    %51 = vector.extract_strided_slice %39 {offsets = [0, 2], sizes = [32, 514], strides = [1, 1]} : vector<32x516xf32> to vector<32x514xf32>
    %cst_17 = arith.constant dense<0.000000e+00> : vector<32x514xf32>
    %52 = tpu.matmul %50, %51, %cst_17 {dimension_numbers = #tpu.dot_dimension_numbers<[1], [0], [0], [1], [0, 0, 1, 1], [], []>, precision = #tpu.contract_precision<fp32>} : vector<32x32xf32>, vector<32x514xf32>, vector<32x514xf32> -> vector<32x514xf32>
    %53 = arith.addf %48, %52 : vector<32x514xf32>
    %c0_18 = arith.constant 0 : index
    %c0_19 = arith.constant 0 : index
    %54 = vector.load %arg6[%c0_18, %c0_19] : memref<32x1xf32, #tpu.memory_space<vmem>>, vector<32x1xf32>
    %55 = vector.broadcast %54 : vector<32x1xf32> to vector<32x514xf32>
    %56 = arith.addf %53, %55 : vector<32x514xf32>
    %cst_20 = arith.constant 0.000000e+00 : f32
    %57 = vector.broadcast %cst_20 : f32 to vector<32x514xf32>
    %58 = arith.maximumf %56, %57 : vector<32x514xf32>
    %59 = tpu.iota {dimensions = array<i32: 1>} : vector<1x514xi32>
    %60 = vector.broadcast %0 : i32 to vector<1x514xi32>
    %61 = arith.addi %60, %59 : vector<1x514xi32>
    %c1_i32 = arith.constant 1 : i32
    %62 = vector.broadcast %c1_i32 : i32 to vector<1x514xi32>
    %63 = arith.subi %61, %62 : vector<1x514xi32>
    %c0_i32_21 = arith.constant 0 : i32
    %64 = vector.broadcast %c0_i32_21 : i32 to vector<1x514xi32>
    %65 = arith.cmpi sge, %63, %64 : vector<1x514xi32>
    %c1024_i32_22 = arith.constant 1024 : i32
    %66 = vector.broadcast %c1024_i32_22 : i32 to vector<1x514xi32>
    %67 = arith.cmpi slt, %63, %66 : vector<1x514xi32>
    %68 = arith.andi %65, %67 : vector<1x514xi1>
    %cst_23 = arith.constant 0.000000e+00 : f32
    %69 = vector.shape_cast %68 : vector<1x514xi1> to vector<1x514xi1>
    %70 = vector.broadcast %69 : vector<1x514xi1> to vector<32x514xi1>
    %71 = vector.broadcast %cst_23 : f32 to vector<32x514xf32>
    %72 = arith.select %70, %58, %71 : vector<32x514xi1>, vector<32x514xf32>
    %c0_24 = arith.constant 0 : index
    %c0_25 = arith.constant 0 : index
    %73 = vector.load %arg7[%c0_24, %c0_25] : memref<32x3xf32, #tpu.memory_space<vmem>>, vector<32x3xf32>
    %74 = vector.extract_strided_slice %73 {offsets = [0, 0], sizes = [32, 1], strides = [1, 1]} : vector<32x3xf32> to vector<32x1xf32>
    %75 = vector.extract_strided_slice %72 {offsets = [0, 0], sizes = [32, 512], strides = [1, 1]} : vector<32x514xf32> to vector<32x512xf32>
    %76 = vector.broadcast %74 : vector<32x1xf32> to vector<32x512xf32>
    %77 = arith.mulf %76, %75 : vector<32x512xf32>
    %78 = vector.extract_strided_slice %73 {offsets = [0, 1], sizes = [32, 1], strides = [1, 1]} : vector<32x3xf32> to vector<32x1xf32>
    %79 = vector.extract_strided_slice %72 {offsets = [0, 1], sizes = [32, 512], strides = [1, 1]} : vector<32x514xf32> to vector<32x512xf32>
    %80 = vector.broadcast %78 : vector<32x1xf32> to vector<32x512xf32>
    %81 = arith.mulf %80, %79 : vector<32x512xf32>
    %82 = arith.addf %77, %81 : vector<32x512xf32>
    %83 = vector.extract_strided_slice %73 {offsets = [0, 2], sizes = [32, 1], strides = [1, 1]} : vector<32x3xf32> to vector<32x1xf32>
    %84 = vector.extract_strided_slice %72 {offsets = [0, 2], sizes = [32, 512], strides = [1, 1]} : vector<32x514xf32> to vector<32x512xf32>
    %85 = vector.broadcast %83 : vector<32x1xf32> to vector<32x512xf32>
    %86 = arith.mulf %85, %84 : vector<32x512xf32>
    %87 = arith.addf %82, %86 : vector<32x512xf32>
    %cst_26 = arith.constant dense<0.000000e+00> : vector<512xf32>
    %88 = vector.multi_reduction <add>, %87, %cst_26 [0] : vector<32x512xf32> to vector<512xf32>
    %89 = vector.shape_cast %88 : vector<512xf32> to vector<1x512xf32>
    %c0_27 = arith.constant 0 : index
    %c0_28 = arith.constant 0 : index
    %90 = vector.load %arg8[%c0_27, %c0_28] : memref<1x1xf32, #tpu.memory_space<vmem>>, vector<1x1xf32>
    %91 = vector.broadcast %90 : vector<1x1xf32> to vector<1x512xf32>
    %92 = arith.addf %89, %91 : vector<1x512xf32>
    %c0_29 = arith.constant 0 : index
    %c0_30 = arith.constant 0 : index
    %c0_31 = arith.constant 0 : index
    %c0_32 = arith.constant 0 : index
    %93 = vector.load %arg9[%c0_29, %c0_30, %c0_31, %c0_32] : memref<1x1x1x512xf32, #tpu.memory_space<vmem>>, vector<1x1x1x512xf32>
    %94 = vector.shape_cast %93 : vector<1x1x1x512xf32> to vector<1x512xf32>
    %95 = vector.shape_cast %92 : vector<1x512xf32> to vector<1x1x1x512xf32>
    tpu.vector_store %arg9[%c0_29, %c0_30, %c0_31, %c0_32], %95 {strides = array<i32>} : memref<1x1x1x512xf32, #tpu.memory_space<vmem>>, vector<1x1x1x512xf32>,
    return
  }
  func.func @transform_0(%arg0: i32, %arg1: i32) -> (i32, i32, i32, i32) {
    %c0_i32 = arith.constant 0 : i32
    %c0_i32_0 = arith.constant 0 : i32
    %c0_i32_1 = arith.constant 0 : i32
    return %arg0, %arg1, %c0_i32, %c0_i32_0 : i32, i32, i32, i32
  }
  func.func @transform_1(%arg0: i32, %arg1: i32) -> (i32, i32) {
    %c0_i32 = arith.constant 0 : i32
    %c0_i32_0 = arith.constant 0 : i32
    %c0_i32_1 = arith.constant 0 : i32
    return %c0_i32, %c0_i32_0 : i32, i32
  }
  func.func @transform_2(%arg0: i32, %arg1: i32) -> (i32, i32) {
    %c0_i32 = arith.constant 0 : i32
    %c0_i32_0 = arith.constant 0 : i32
    %c0_i32_1 = arith.constant 0 : i32
    return %c0_i32, %c0_i32_0 : i32, i32
  }
  func.func @transform_3(%arg0: i32, %arg1: i32) -> (i32, i32, i32) {
    %c0_i32 = arith.constant 0 : i32
    %c0_i32_0 = arith.constant 0 : i32
    %c0_i32_1 = arith.constant 0 : i32
    %c0_i32_2 = arith.constant 0 : i32
    return %c0_i32, %c0_i32_0, %c0_i32_1 : i32, i32, i32
  }
  func.func @transform_4(%arg0: i32, %arg1: i32) -> (i32, i32) {
    %c0_i32 = arith.constant 0 : i32
    %c0_i32_0 = arith.constant 0 : i32
    %c0_i32_1 = arith.constant 0 : i32
    return %c0_i32, %c0_i32_0 : i32, i32
  }
  func.func @transform_5(%arg0: i32, %arg1: i32) -> (i32, i32) {
    %c0_i32 = arith.constant 0 : i32
    %c0_i32_0 = arith.constant 0 : i32
    %c0_i32_1 = arith.constant 0 : i32
    return %c0_i32, %c0_i32_0 : i32, i32
  }
  func.func @transform_6(%arg0: i32, %arg1: i32) -> (i32, i32) {
    %c0_i32 = arith.constant 0 : i32
    %c0_i32_0 = arith.constant 0 : i32
    %c0_i32_1 = arith.constant 0 : i32
    return %c0_i32, %c0_i32_0 : i32, i32
  }
  func.func @transform_7(%arg0: i32, %arg1: i32) -> (i32, i32, i32, i32) {
    %c0_i32 = arith.constant 0 : i32
    %c0_i32_0 = arith.constant 0 : i32
    %c0_i32_1 = arith.constant 0 : i32
    return %arg0, %arg1, %c0_i32, %c0_i32_0 : i32, i32, i32, i32
  }
}

</mosaic_0001>

<bundles_post_ra>
// kernel: tpu_custom_call.1
= control target key start
LH: loop header
LB: loop body
LE: loop exit
PB: predicated region body
PF: predicated region fallthrough
CT: control target
= control target key end

     0   :  { %s9129_s0 = inlined_call_operand.vmem [shape: f32[1,2,1,518], index: 0, kind: input, shape index: {}]   ;;  %s9130_s1 = inlined_call_operand.vmem [shape: f32[32,3], index: 1, kind: input, shape index: {}]   ;;  %s9131_s2 = inlined_call_operand.vmem [shape: f32[32,1], index: 2, kind: input, shape index: {}]   ;;  %s9132_s3 = inlined_call_operand.hbm [shape: f32[3,32,32], index: 3, kind: input, shape index: {}]   ;;  %s9133_s4 = inlined_call_operand.vmem [shape: f32[32,1], index: 4, kind: input, shape index: {}]   ;;  %s9134_s5 = inlined_call_operand.vmem [shape: f32[32,3], index: 5, kind: input, shape index: {}]   ;;  %s9135_s6 = inlined_call_operand.<no memory space> [shape: f32[1,1], index: 6, kind: input, shape index: {}]   ;;  %s9136_s7 = inlined_call_operand.hbm [shape: f32[1,2,1,512], index: 7, kind: output, shape index: {}]  }
   0x1   :  { %v12_v0 = vstv %s9135_s6 }
   0x2   :  { %13 = vst [vmem:[#allocation2] sm:$0x1] %v12_v0 }
   0x3   :  { %14 = vsyncpa [#allocation4], 0 }
   0x4   :  { %15 = vsyncpa [#allocation5], 0 }
   0x5   :  { %17 = vsyncpa [#allocation5 + $0x1], 0  ;;  %s6123_s26 = smov 0   ;;  %s6125_s27 = smov 0  }
   0x6   :  { %s6127_s28 = smov 0   ;;  %s6129_s29 = smov 0  }
   0x7   :  { %s6131_s30 = smov 0   ;;  %s6133_s8 = smov 0  }
   0x8 LB: > { %s5836_s6 = sadd.s32 4294967295, %s6070_s8   ;;  %s5837_s9 = sadd.s32 4294967294, %s6070_s8   ;;  %s6070_s8 = sphi %s6133_s8, %s23_s8   ;;  %s6066_s30 = sphi %s6131_s30, %s9348_s30   ;;  %s6062_s29 = sphi %s6129_s29, %s9347_s29   ;;  %s6058_s28 = sphi %s6127_s28, %s9346_s28   ;;  %s6054_s27 = sphi %s6125_s27, %s9345_s27   ;;  %s6050_s26 = sphi %s6123_s26, %s9344_s26  }
   0x9   : > { %s32_s10 = sadd.s32 1, %s6066_s30  ;;  %s198_s11 = sadd.s32 1, %s6058_s28 }
   0xa   : > { %p33_p0 = scmp.ge.s32.totalorder %s32_s10, 2  ;;  %p208_p1 = scmp.ne.s32.totalorder %s6058_s28, %s6054_s27 }
   0xb   : > { %p209_p2 = scmp.eq.s32.totalorder %s5836_s6, 1  ;;  %p214_p3 = scmp.ne.s32.totalorder %s6054_s27, %s6050_s26 }
   0xc   : > { %s9350_s10 = smov (%p33_p0, %s32_s10), 0  ;;  %p215_p5 = scmp.eq.s32.totalorder %s5837_s9, 1 }
   0xd   : > { %p6163_p4 = por %p209_p2, %p208_p1  ;;  %s194_s13 = ssub.s32 %s6066_s30, %s9350_s10 }
   0xe   : > { %p5838_p6 = scmp.ge.s32.totalorder %s6070_s8, 1  ;;  %p196_p7 = scmp.eq.s32.totalorder %s194_s13, 0 }
   0xf   : > { %p6170_p8 = por %p215_p5, %p214_p3  ;;  %p222_p9 = scmp.lt.s32.totalorder %s6070_s8, 3 }
  0x10   : > { %s6176_s15 = scalar_select %p196_p7, %s6058_s28, %s198_s11  }
  0x11   : > { %p223_p10 = pnand %p5838_p6, %p222_p9  ;;  %p5882_p11 = scmp.eq.s32.totalorder %s5836_s6, 0 }
  0x12   : > { %s239_s18 = sshll.u32 %s9132_s3, 4  ;;  %s6072_s19 = smov [#allocation3]   ;;  %s240_s18 = int_to_ptr.hbm [resolvable:$true] %s239_s18 }
  0x13   : > { %p5874_p12 = pneg %p223_p10  ;;  %s241_s20 = sshll.u32 %s6072_s19, 4  ;;  %s242_s20 = int_to_ptr.vmem [resolvable:$true] %s241_s20 }
  0x14   : > { %s6073_s21 = smov 128   ;;  %s6074_s22 = smov 8  }
  0x15   : > { %p5875_p13 = pnand %p5882_p11, %p5874_p12  ;;  %277 = sbr.rel (%p223_p10) target bundleno = 1577 (0x629), region = 48 }
  0x17   : > { %5877 = dma.hbm_to_vmem [thread:$0]  (!%p5875_p13), %s240_s18, 1536, %s242_s20, [#allocation4], %s6073_s21, %s6073_s21, %s6074_s22  }
  0x1a   : > { %6041 = dma.done.wait (%p5882_p11), [#allocation4], 1536  }
  0x1b   : > { %6043 = vsyncadd (%p5882_p11), [#allocation4], 4294965760  ;;  %v9139_v1 = vmov 2   ;;  %v324_v2 = vld [vmem:[%s9130_s1 + $0x8] sm:$0xff]  ;;  %v326_v3 = vld [vmem:[%s9130_s1 + $0x18] sm:$0xff]  ;;  %v9138_v6 = vmov 0  }
  0x1c   : > { %5945 = vset.pattern.permute.xlu0 %v9139_v1  ;;  %5941 = vset.pattern.permute.xlu1 %v9139_v1  ;;  %v325_v4 = vld [vmem:[%s9130_s1 + $0x10] sm:$0xff]  ;;  %v323_v5 = vld [vmem:[%s9130_s1] sm:$0xff]  ;;  %v9141_v7 = vmov 1   ;;  %v687_v9 = vld [vmem:[%s9131_s2 + $0x18] sm:$0xff]  ;;  %p315_p0 = scmp.lt.s32.totalorder %s6062_s29, 1  ;;  %s6078_s6 = smov 127  }
  0x1d   : > { %5943 = vset.pattern.permute.xlu2 %v9139_v1  ;;  %536 = vperm.xlu0 %5945, %v324_v2   ;;  %v686_v8 = vld [vmem:[%s9131_s2 + $0x10] sm:$0xff]  ;;  %s6079_s9 = smov 126   ;;  %v685_v49 = vld [vmem:[%s9131_s2 + $0x8] sm:$0xff]  ;;  %v684_v52 = vld [vmem:[%s9131_s2] sm:$0xff]  ;;  %s5844_s18 = sshll.u32 %s6062_s29, 9  ;;  %vm474_vm0 = vcmask 1039360  }
  0x1e   : > { %544 = vperm.xlu1 %5941, %v326_v3   ;;  %540 = vperm.xlu2 %5943, %v325_v4   ;;  %s316_s21 = scalar_select %p315_p0, %s6062_s29, 1  ;;  %vm627_vm1 = vcmask 1031168   ;;  %vm915_vm14 = vcmask 261120  }
  0x1f   : > { %s6008_s24 = scalar_lea.hbm %s9136_s7, 8 }
  0x20   : > { %s5867_s22 = smul.u32 5, %s316_s21 }
  0x22   : > { %s320_s25 = scalar_lea.vmem %s9129_s0, %s5867_s22 }
  0x23   : > { %v6220_v13 = vld [vmem:[%s320_s25] sm:$0x1f]  ;;  %s5856_s25 = sshll.u32 %s6062_s29, 2 }
  0x24   : > { %v6223_v14 = vperm.slane %v6220_v13, 2  ;;  %v6226_v15 = vperm.slane %v6220_v13, 1  ;;  %v6229_v16 = vperm.slane %v6220_v13, 0  ;;  %v6309_v45 = vperm.slane %v6220_v13, 3  ;;  %s5744_s16 = scalar_lea.hbm %s9136_s7, %s5856_s25 }
  0x25   : > { %5949 = vset.pattern.permute.xlu0 %v9138_v6  ;;  %s5748_s19 = sshll.u32 %s5744_s16, 4  ;;  %s5749_s19 = int_to_ptr.hbm [resolvable:$true] %s5748_s19 }
  0x26   : > { %329 = vperm.xlu0 %5949, %v323_v5   ;;  %5942 = vset.pattern.permute.xlu1 %v9141_v7  ;;  %s6002_s20 = sshra.s32 %s5749_s19, 4  ;;  %s6003_s20 = int_to_ptr.hbm [resolvable:$true] %s6002_s20 }
  0x27   : > { %383 = vperm.xlu1 %5942, %v324_v2   ;;  %5944 = vset.pattern.permute.xlu2 %v9141_v7  ;;  %s6004_s21 = scalar_lea.hbm %s6003_s20, 4  ;;  %p6009_p5 = scmp.lt.s32.totalorder %s6003_s20, %s9136_s7 }
  0x28   : > { %379 = vperm.xlu2 %5944, %v323_v5   ;;  %p6005_p1 = scmp.ne.s32.totalorder %s6003_s20, %s6004_s21  ;;  %p6010_p6 = scmp.lt.s32.totalorder %s6008_s24, %s6004_s21 }
  0x2a   : > { %p6006_p2 = pnand %p6005_p1, %p6163_p4  ;;  %p6011_p7 = por %p6010_p6, %p6009_p5 }
  0x2c   : > { %p6007_p3 = pneg %p6006_p2 }
  0x2e   : > { %700 = vperm.xlu0 %5949, %v686_v8   ;;  %p6012_p9 = pnand %p6011_p7, %p6007_p3 }
  0x2f   : > { %5946 = vset.pattern.permute.xlu1 %v9139_v1 }
  0x30   : > { %532 = vperm.xlu1 %5946, %v323_v5   ;;  %5947 = vset.pattern.permute.xlu2 %v9138_v6 }
  0x31   : > { %344 = vperm.xlu2 %5947, %v326_v3  }
  0x36   : > { %5950 = vset.pattern.permute.xlu0 %v9141_v7 }
  0x37   : > { %391 = vperm.xlu0 %5950, %v326_v3  }
  0x38   : > { %5948 = vset.pattern.permute.xlu1 %v9138_v6 }
  0x39   : > { %339 = vperm.xlu1 %5948, %v325_v4   ;;  %334 = vperm.xlu2 %5947, %v324_v2   ;;  %v9137_v2 = vlaneseq }
  0x3b   : > { %v6360_v8 = vand.u32 127, %v9137_v2 }
  0x3f   : > { %387 = vperm.xlu0 %5950, %v325_v4  }
  0x41   : > { %705 = vperm.xlu1 %5948, %v687_v9   ;;  %v750_v9 = vadd.s32 128, %v6360_v8 }
  0x78   : > { %v6272_v33 = vpop.permute.xlu2 %540 }
  0x79   : > { %v559_v34 = vmul.f32 %v6272_v33, %v6223_v14  ;;  %v557_v35 = vmul.f32 %v6272_v33, %v6229_v16  ;;  %v558_v36 = vmul.f32 %v6272_v33, %v6226_v15  ;;  %v560_v56 = vmul.f32 %v6272_v33, %v6309_v45 }
  0x82   : > { %v6286_v37 = vpop.permute.xlu2 %379 }
  0x83   : > { %v394_v38 = vmul.f32 %v6286_v37, %v6229_v16  ;;  %v395_v39 = vmul.f32 %v6286_v37, %v6226_v15  ;;  %v396_v43 = vmul.f32 %v6286_v37, %v6223_v14  ;;  %v397_v59 = vmul.f32 %v6286_v37, %v6309_v45 }
  0x8b   : > { %v6334_v54 = vpop.permute.xlu2 %344 }
  0x8f   : > { %v6209_v10 = vpop.permute.xlu0 %536 }
  0x90   : > { %v6250_v25 = vpop.permute.xlu1 %544  ;;  %v552_v40 = vmul.f32 %v6209_v10, %v6229_v16  ;;  %v553_v44 = vmul.f32 %v6209_v10, %v6226_v15  ;;  %v554_v48 = vmul.f32 %v6209_v10, %v6223_v14  ;;  %v555_v53 = vmul.f32 %v6209_v10, %v6309_v45 }
  0x91   : > { %v563_v26 = vmul.f32 %v6250_v25, %v6226_v15  ;;  %v562_v27 = vmul.f32 %v6250_v25, %v6229_v16  ;;  %v564_v28 = vmul.f32 %v6250_v25, %v6223_v14  ;;  %v565_v55 = vmul.f32 %v6250_v25, %v6309_v45 }
  0x93   : > { %v6345_v58 = vpop.permute.xlu2 %334 }
  0x98   : > { %v6212_v11 = vpop.permute.xlu0 %329 }
  0x99   : > { %v6264_v29 = vpop.permute.xlu1 %383 }
  0x9a   : > { %v401_v30 = vmul.f32 %v6264_v29, %v6223_v14  ;;  %v399_v31 = vmul.f32 %v6264_v29, %v6229_v16  ;;  %v400_v32 = vmul.f32 %v6264_v29, %v6226_v15  ;;  %v402_v57 = vmul.f32 %v6264_v29, %v6309_v45 }
  0xa0   : > { %v6215_v12 = vpop.permute.xlu0 %700 }
  0xa2   : > { %v6297_v41 = vpop.permute.xlu1 %532 }
  0xa3   : > { %v549_v42 = vmul.f32 %v6297_v41, %v6223_v14  ;;  %v547_v46 = vmul.f32 %v6297_v41, %v6229_v16  ;;  %v548_v51 = vmul.f32 %v6297_v41, %v6226_v15 }
  0xa9   : > { %v6231_v17 = vpop.permute.xlu0 %391 }
  0xaa   : > { %v411_v18 = vmul.f32 %v6231_v17, %v6223_v14  ;;  %v410_v19 = vmul.f32 %v6231_v17, %v6226_v15  ;;  %v409_v20 = vmul.f32 %v6231_v17, %v6229_v16  ;;  %v412_v47 = vmul.f32 %v6231_v17, %v6309_v45 }
  0xab   : > { %v6351_v61 = vpop.permute.xlu1 %339 }
  0xac   : > { %468 = vrot.lane.b32.xlu0 %v411_v18, %s6078_s6  ;;  %466 = vrot.lane.b32.xlu2 %v410_v19, %s6078_s6  ;;  %v6364_v18 = vstv %s5844_s18 }
  0xad   : > { %464 = vrot.lane.b32.xlu1 %v409_v20, %s6078_s6 }
  0xb1   : > { %v6242_v21 = vpop.permute.xlu0 %387 }
  0xb2   : > { %v405_v22 = vmul.f32 %v6242_v21, %v6226_v15  ;;  %v406_v23 = vmul.f32 %v6242_v21, %v6223_v14  ;;  %v404_v24 = vmul.f32 %v6242_v21, %v6229_v16  ;;  %v407_v50 = vmul.f32 %v6242_v21, %v6309_v45 }
  0xb3   : > { %v6353_v0 = vpop.permute.xlu1 %705 }
  0xb4   : > { %456 = vrot.lane.b32.xlu0 %v405_v22, %s6078_s6  ;;  %454 = vrot.lane.b32.xlu2 %v404_v24, %s6078_s6  ;;  %v6375_v24 = vadd.s32 %v6364_v18, %v750_v9 }
  0xb5   : > { %458 = vrot.lane.b32.xlu1 %v406_v23, %s6078_s6  ;;  %v6372_v23 = vadd.s32 %v6364_v18, %v6360_v8 }
  0xb6   : > { %9190 = vst [vmem:[#allocation10_spill] sm:$0xff] %v6375_v24 }
  0xb7   : > { %9189 = vst [vmem:[#allocation9_spill] sm:$0xff] %v6372_v23 }
  0xbc   : > { %619 = vrot.lane.b32.xlu0 %v563_v26, %s6079_s9  ;;  %617 = vrot.lane.b32.xlu2 %v562_v27, %s6079_s9  ;;  %v373_v26 = vmul.f32 %v6229_v16, %v6334_v54  ;;  %v374_v27 = vmul.f32 %v6226_v15, %v6334_v54 }
  0xbd   : > { %621 = vrot.lane.b32.xlu1 %v564_v28, %s6079_s9 }
  0xc4   : > { %448 = vrot.lane.b32.xlu2 %v401_v30, %s6078_s6  ;;  %444 = vrot.lane.b32.xlu0 %v399_v31, %s6078_s6  ;;  %v5845_v31 = vadd.s32 4294967294, %v6372_v23 }
  0xc5   : > { %446 = vrot.lane.b32.xlu1 %v400_v32, %s6078_s6  ;;  %v5846_v32 = vadd.s32 4294967294, %v6375_v24 }
  0xc6   : > { %vm765_vm2 = vcmp.ge.s32.totalorder %v5845_v31, 0  ;;  %vm770_vm3 = vcmp.lt.s32.totalorder %v5845_v31, 1024 }
  0xc7   : > { %vm766_vm4 = vcmp.ge.s32.totalorder %v5846_v32, 0  ;;  %vm771_vm5 = vcmp.lt.s32.totalorder %v5846_v32, 1024  ;;  %vm6395_vm6 = vmand %vm765_vm2, %vm770_vm3 }
  0xc8   : > { %vm6399_vm7 = vmand %vm766_vm4, %vm771_vm5 }
  0xcc   : > { %611 = vrot.lane.b32.xlu2 %v559_v34, %s6079_s9  ;;  %607 = vrot.lane.b32.xlu0 %v557_v35, %s6079_s9 }
  0xcd   : > { %609 = vrot.lane.b32.xlu1 %v558_v36, %s6079_s9 }
  0xd4   : > { %597 = vrot.lane.b32.xlu0 %v552_v40, %s6079_s9  ;;  %434 = vrot.lane.b32.xlu2 %v394_v38, %s6078_s6 }
  0xd5   : > { %436 = vrot.lane.b32.xlu1 %v395_v39, %s6078_s6 }
  0xdc   : > { %591 = vrot.lane.b32.xlu0 %v549_v42, %s6079_s9  ;;  %438 = vrot.lane.b32.xlu2 %v396_v43, %s6078_s6 }
  0xdd   : > { %599 = vrot.lane.b32.xlu1 %v553_v44, %s6079_s9 }
  0xe4   : > { %470 = vrot.lane.b32.xlu0 %v412_v47, %s6078_s6  ;;  %601 = vrot.lane.b32.xlu2 %v554_v48, %s6079_s9 }
  0xe5   : > { %587 = vrot.lane.b32.xlu1 %v547_v46, %s6079_s9 }
  0xec   : > { %460 = vrot.lane.b32.xlu0 %v407_v50, %s6078_s6  ;;  %589 = vrot.lane.b32.xlu2 %v548_v51, %s6079_s9 }
  0xed   : > { %695 = vperm.xlu1 %5948, %v685_v49  }
  0xf4   : > { %603 = vrot.lane.b32.xlu0 %v555_v53, %s6079_s9  ;;  %690 = vperm.xlu2 %5947, %v684_v52  }
  0xf5   : > { %623 = vrot.lane.b32.xlu1 %v565_v55, %s6079_s9 }
  0xfc   : > { %613 = vrot.lane.b32.xlu2 %v560_v56, %s6079_s9 }
  0xfd   : > { %450 = vrot.lane.b32.xlu1 %v402_v57, %s6078_s6 }
 0x104   : > { %440 = vrot.lane.b32.xlu2 %v397_v59, %s6078_s6 }
 0x106   : > { %v467_v60 = vpop.permute.xlu2 %466 }
 0x10e   : > { %v455_v62 = vpop.permute.xlu2 %454 }
 0x116   : > { %v618_v63 = vpop.permute.xlu2 %617 }
 0x11e   : > { %v6355_v3 = vpop.permute.xlu0 %468  ;;  %v6357_v4 = vpop.permute.xlu2 %448 }
 0x11f   : > { %v465_v5 = vpop.permute.xlu1 %464  ;;  %v488_v30 = vsel %vm474_vm0, %v467_v60, %v6355_v3 }
 0x120   : > { %v487_v28 = vsel %vm474_vm0, %v465_v5, %v467_v60  ;;  %v527_v38 = vadd.f32 %v488_v30, %v374_v27  ;;  %v369_v5 = vmul.f32 %v6226_v15, %v6351_v61 }
 0x121   : > { %v526_v34 = vadd.f32 %v487_v28, %v373_v26 }
 0x126   : > { %v457_v19 = vpop.permute.xlu0 %456  ;;  %v6366_v20 = vpop.permute.xlu2 %611 }
 0x127   : > { %v6368_v22 = vpop.permute.xlu1 %458  ;;  %v483_v59 = vsel %vm474_vm0, %v455_v62, %v457_v19 }
 0x128   : > { %v484_v60 = vsel %vm474_vm0, %v457_v19, %v6368_v22 }
 0x129   : > { %v522_v28 = vadd.f32 %v484_v60, %v369_v5 }
 0x12e   : > { %v620_v35 = vpop.permute.xlu0 %619  ;;  %v6386_v36 = vpop.permute.xlu2 %434 }
 0x12f   : > { %v640_v39 = vsel %vm627_vm1, %v618_v63, %v620_v35  ;;  %v6389_v40 = vpop.permute.xlu1 %621  ;;  %v368_v63 = vmul.f32 %v6229_v16, %v6351_v61 }
 0x130   : > { %v679_v42 = vadd.f32 %v640_v39, %v526_v34  ;;  %v641_v43 = vsel %vm627_vm1, %v620_v35, %v6389_v40 }
 0x131   : > { %v680_v44 = vadd.f32 %v641_v43, %v527_v38  ;;  %v521_v27 = vadd.f32 %v483_v59, %v368_v63 }
 0x132   : > { %v723_v46 = vadd.f32 %v6353_v0, %v679_v42 }
 0x133   : > { %v724_v47 = vadd.f32 %v6353_v0, %v680_v44 }
 0x134   : > { %v743_v49 = vmax.f32 %v723_v46, 0.0 }
 0x135   : > { %v744_v51 = vmax.f32 %v724_v47, 0.0 }
 0x136   : > { %v445_v52 = vpop.permute.xlu0 %444  ;;  %v6403_v53 = vpop.permute.xlu2 %438  ;;  %v6407_v55 = vsel %vm6395_vm6, %v743_v49, 0.0 }
 0x137   : > { %v447_v56 = vpop.permute.xlu1 %446  ;;  %v6411_v57 = vsel %vm6399_vm7, %v744_v51, 0.0  ;;  %869 = vrot.lane.b32.xlu1 %v6407_v55, %s6078_s6  ;;  %v359_v51 = vmul.f32 %v6226_v15, %v6212_v11 }
 0x138   : > { %871 = vrot.lane.b32.xlu2 %v6411_v57, %s6078_s6 }
 0x13e   : > { %v608_v9 = vpop.permute.xlu0 %607  ;;  %v6424_v26 = vpop.permute.xlu2 %601 }
 0x13f   : > { %v610_v30 = vpop.permute.xlu1 %609 }
 0x140   : > { %v637_v31 = vsel %vm627_vm1, %v610_v30, %v6366_v20  ;;  %v636_v62 = vsel %vm627_vm1, %v608_v9, %v610_v30 }
 0x141   : > { %v675_v32 = vadd.f32 %v637_v31, %v522_v28  ;;  %v674_v34 = vadd.f32 %v636_v62, %v521_v27 }
 0x143   : > { %v719_v19 = vadd.f32 %v6215_v12, %v675_v32  ;;  %v718_v35 = vadd.f32 %v6215_v12, %v674_v34 }
 0x145   : > { %v739_v38 = vmax.f32 %v719_v19, 0.0  ;;  %v738_v39 = vmax.f32 %v718_v35, 0.0  ;;  %v480_v19 = vsel %vm474_vm0, %v447_v56, %v6357_v4  ;;  %v479_v35 = vsel %vm474_vm0, %v445_v52, %v447_v56 }
 0x146   : > { %v598_v42 = vpop.permute.xlu0 %597  ;;  %v590_v43 = vpop.permute.xlu2 %589 }
 0x147   : > { %v437_v44 = vpop.permute.xlu1 %436  ;;  %v6433_v46 = vsel %vm6399_vm7, %v739_v38, 0.0  ;;  %v6437_v47 = vsel %vm6395_vm6, %v738_v39, 0.0  ;;  %v364_v38 = vmul.f32 %v6226_v15, %v6345_v58  ;;  %v363_v39 = vmul.f32 %v6229_v16, %v6345_v58 }
 0x148   : > { %861 = vrot.lane.b32.xlu0 %v6433_v46, %s6078_s6  ;;  %859 = vrot.lane.b32.xlu2 %v6437_v47, %s6078_s6  ;;  %v476_v49 = vsel %vm474_vm0, %v437_v44, %v6403_v53 }
 0x149   : > { %v512_v59 = vadd.f32 %v476_v49, %v359_v51  ;;  %v475_v49 = vsel %vm474_vm0, %v6386_v36, %v437_v44  ;;  %v358_v51 = vmul.f32 %v6229_v16, %v6212_v11  ;;  %v517_v52 = vadd.f32 %v480_v19, %v364_v38 }
 0x14a   : > { %v516_v56 = vadd.f32 %v479_v35, %v363_v39  ;;  %v370_v16 = vmul.f32 %v6223_v14, %v6351_v61 }
 0x14e   : > { %v6447_v60 = vpop.permute.xlu0 %591  ;;  %v6449_v63 = vpop.permute.xlu2 %690 }
 0x14f   : > { %v600_v5 = vpop.permute.xlu1 %599  ;;  %v629_v9 = vsel %vm627_vm1, %v590_v43, %v6447_v60 }
 0x150   : > { %v665_v27 = vadd.f32 %v629_v9, %v512_v59  ;;  %v632_v59 = vsel %vm627_vm1, %v598_v42, %v600_v5  ;;  %v633_v9 = vsel %vm627_vm1, %v600_v5, %v6424_v26  ;;  %v360_v5 = vmul.f32 %v6223_v14, %v6212_v11 }
 0x151   : > { %v669_v36 = vadd.f32 %v632_v59, %v516_v56  ;;  %v670_v44 = vadd.f32 %v633_v9, %v517_v52 }
 0x152   : > { %v709_v28 = vadd.f32 %v6449_v63, %v665_v27  ;;  %v6479_v27 = vperm.slane %v6220_v13, 4 }
 0x154   : > { %v729_v30 = vmax.f32 %v709_v28, 0.0  ;;  %v511_v28 = vadd.f32 %v475_v49, %v358_v51 }
 0x156   : > { %v6454_v31 = vpop.permute.xlu0 %470  ;;  %v6456_v62 = vpop.permute.xlu2 %613  ;;  %v6460_v32 = vsel %vm6399_vm7, %v729_v30, 0.0  ;;  %v408_v30 = vmul.f32 %v6242_v21, %v6479_v27 }
 0x157   : > { %v588_v34 = vpop.permute.xlu1 %587  ;;  %841 = vrot.lane.b32.xlu2 %v6460_v32, %s6078_s6  ;;  %v638_v59 = vsel %vm627_vm1, %v6366_v20, %v6456_v62  ;;  %v375_v20 = vmul.f32 %v6223_v14, %v6334_v54 }
 0x158   : > { %v628_v15 = vsel %vm627_vm1, %v588_v34, %v590_v43  ;;  %v751_v34 = vadd.s32 256, %v6360_v8 }
 0x159   : > { %v664_v19 = vadd.f32 %v628_v15, %v511_v28  ;;  %v489_v15 = vsel %vm474_vm0, %v6355_v3, %v6454_v31  ;;  %v561_v3 = vmul.f32 %v6272_v33, %v6479_v27 }
 0x15b   : > { %v708_v56 = vadd.f32 %v6449_v63, %v664_v19 }
 0x15e   : > { %v6486_v42 = vpop.permute.xlu0 %460  ;;  %v6490_v13 = vpop.permute.xlu2 %440 }
 0x15f   : > { %v6492_v35 = vpop.permute.xlu1 %695  ;;  %v485_v43 = vsel %vm474_vm0, %v6368_v22, %v6486_v42  ;;  %v477_v21 = vsel %vm474_vm0, %v6403_v53, %v6490_v13  ;;  %462 = vrot.lane.b32.xlu2 %v408_v30, %s6078_s6  ;;  %v6510_v53 = vadd.s32 %v6364_v18, %v751_v34 }
 0x160   : > { %v523_v38 = vadd.f32 %v485_v43, %v370_v16  ;;  %v6502_v39 = vadd.f32 %v477_v21, %v360_v5  ;;  %v714_v49 = vadd.f32 %v6492_v35, %v670_v44  ;;  %v713_v51 = vadd.f32 %v6492_v35, %v669_v36 }
 0x161   : > { %9195 = vst [vmem:[#allocation11_spill] sm:$0xff] %v6510_v53  ;;  %v528_v36 = vadd.f32 %v489_v15, %v375_v20  ;;  %v5847_v44 = vadd.s32 4294967294, %v6510_v53  ;;  %v728_v16 = vmax.f32 %v708_v56, 0.0  ;;  %v550_v21 = vmul.f32 %v6297_v41, %v6309_v45 }
 0x162   : > { %v676_v22 = vadd.f32 %v638_v59, %v523_v38  ;;  %v734_v9 = vmax.f32 %v714_v49, 0.0  ;;  %v733_v52 = vmax.f32 %v713_v51, 0.0  ;;  %v365_v49 = vmul.f32 %v6223_v14, %v6345_v58 }
 0x163   : > { %vm767_vm8 = vcmp.ge.s32.totalorder %v5847_v44, 0  ;;  %vm772_vm9 = vcmp.lt.s32.totalorder %v5847_v44, 1024  ;;  %v6544_v33 = vsel %vm6395_vm6, %v728_v16, 0.0  ;;  %v566_v14 = vmul.f32 %v6250_v25, %v6479_v27 }
 0x164   : > { %v6518_v28 = vsel %vm6399_vm7, %v734_v9, 0.0  ;;  %v6522_v30 = vsel %vm6395_vm6, %v733_v52, 0.0  ;;  %vm6549_vm10 = vmand %vm767_vm8, %vm772_vm9  ;;  %v413_v15 = vmul.f32 %v6231_v17, %v6479_v27  ;;  %v398_v25 = vmul.f32 %v6286_v37, %v6479_v27 }
 0x165   : > { %851 = vrot.lane.b32.xlu1 %v6518_v28, %s6078_s6  ;;  %849 = vrot.lane.b32.xlu0 %v6522_v30, %s6078_s6  ;;  %v403_v17 = vmul.f32 %v6264_v29, %v6479_v27  ;;  %v720_v44 = vadd.f32 %v6215_v12, %v676_v22 }
 0x166   : > { %v6553_v38 = vpop.permute.xlu0 %603 }
 0x167   : > { %v6532_v50 = vpop.permute.xlu1 %623  ;;  %615 = vrot.lane.b32.xlu2 %v561_v3, %s6079_s9  ;;  %v634_v52 = vsel %vm627_vm1, %v6424_v26, %v6553_v38  ;;  %v551_v26 = vmul.f32 %v6297_v41, %v6479_v27  ;;  %v740_v37 = vmax.f32 %v720_v44, 0.0 }
 0x168   : > { %v642_v5 = vsel %vm627_vm1, %v6389_v40, %v6532_v50 }
 0x169   : > { %v681_v19 = vadd.f32 %v642_v5, %v528_v36  ;;  %v556_v36 = vmul.f32 %v6209_v10, %v6479_v27  ;;  %v6599_v29 = vsel %vm6549_vm10, %v740_v37, 0.0 }
 0x16a   : > { %9199 = vst [vmem:[#allocation13_spill] sm:$0xff] %v6599_v29 }
 0x16b   : > { %v725_v43 = vadd.f32 %v6353_v0, %v681_v19 }
 0x16d   : > { %v745_v34 = vmax.f32 %v725_v43, 0.0  ;;  %593 = vrot.lane.b32.xlu0 %v550_v21, %s6079_s9  ;;  %839 = vrot.lane.b32.xlu1 %v6544_v33, %s6078_s6 }
 0x16f   : > { %v6557_v51 = vpop.permute.xlu1 %450  ;;  %v6561_v48 = vsel %vm6549_vm10, %v745_v34, 0.0 }
 0x170   : > { %v481_v59 = vsel %vm474_vm0, %v6357_v4, %v6557_v51  ;;  %873 = vrot.lane.b32.xlu2 %v6561_v48, %s6078_s6 }
 0x171   : > { %v518_v9 = vadd.f32 %v481_v59, %v365_v49  ;;  %v752_v59 = vadd.s32 384, %v6360_v8 }
 0x173   : > { %v671_v56 = vadd.f32 %v634_v52, %v518_v9  ;;  %v372_v9 = vmul.f32 %v6479_v27, %v6351_v61 }
 0x175   : > { %625 = vrot.lane.b32.xlu0 %v566_v14, %s6079_s9  ;;  %472 = vrot.lane.b32.xlu1 %v413_v15, %s6078_s6  ;;  %v715_v4 = vadd.f32 %v6492_v35, %v671_v56 }
 0x177   : > { %v735_v20 = vmax.f32 %v715_v4, 0.0  ;;  %v6630_v4 = vadd.s32 %v6364_v18, %v752_v59 }
 0x179   : > { %v6580_v3 = vsel %vm6549_vm10, %v735_v20, 0.0  ;;  %9200 = vst [vmem:[#allocation14_spill] sm:$0xff] %v6630_v4 }
 0x17a   : > { %9198 = vst [vmem:[#allocation12_spill] sm:$0xff] %v6580_v3  ;;  %853 = vrot.lane.b32.xlu2 %v6580_v3, %s6078_s6 }
 0x17d   : > { %442 = vrot.lane.b32.xlu0 %v398_v25, %s6078_s6  ;;  %452 = vrot.lane.b32.xlu1 %v403_v17, %s6078_s6 }
 0x185   : > { %595 = vrot.lane.b32.xlu0 %v551_v26, %s6079_s9  ;;  %605 = vrot.lane.b32.xlu1 %v556_v36, %s6079_s9  ;;  %v371_v26 = vmul.f32 %v6309_v45, %v6351_v61  ;;  %v5848_v36 = vadd.s32 4294967294, %v6630_v4  ;;  %v753_v4 = vadd.s32 512, %v6360_v8 }
 0x187   : > { %vm768_vm11 = vcmp.ge.s32.totalorder %v5848_v36, 0  ;;  %vm773_vm12 = vcmp.lt.s32.totalorder %v5848_v36, 1024 }
 0x188   : > { %vm6654_vm13 = vmand %vm768_vm11, %vm773_vm12 }
 0x18d   : > { %863 = vrot.lane.b32.xlu1 %v6599_v29, %s6078_s6 }
 0x192   : > { %v6603_v16 = vpop.permute.xlu2 %871 }
 0x1a2   : > { %v860_v41 = vpop.permute.xlu2 %859 }
 0x1a9   : > { %v870_v5 = vpop.permute.xlu1 %869 }
 0x1aa   : > { %v891_v10 = vsel %vm474_vm0, %v870_v5, %v6603_v16 }
 0x1ab   : > { %v6607_v22 = vand.u32 4294901760, %v891_v10 }
 0x1ad   : > { %v6610_v19 = vsub.f32 %v891_v10, %v6607_v22  ;;  %941 = vmatpush.msra.mxu0 %v6607_v22  ;;  %5859 = vmatpush.msra.mxu2 %v6607_v22 }
 0x1af   : > { %v9144_v43 = vand.u32 4294901760, %v6610_v19 }
 0x1b1   : > { %v6615_v21 = vpop.permute.xlu2 %841  ;;  %v996_v34 = vsub.f32 %v6610_v19, %v9144_v43 }
 0x1b3   : > { %v997_v49 = vand.u32 4294901760, %v996_v34 }
 0x1b5   : > { %998 = vmatpush.msra.mxu1 %v997_v49  ;;  %5863 = vmatpush.msra.mxu3 %v997_v49 }
 0x1b9   : > { %v463_v52 = vpop.permute.xlu2 %462 }
 0x1ba   : > { %v6623_v56 = vpop.permute.xlu0 %861  ;;  %v6625_v14 = vadd.f32 %v463_v52, %v372_v9  ;;  %v486_v17 = vsel %vm474_vm0, %v6486_v42, %v463_v52  ;;  %v815_v9 = vld [vmem:[#allocation3 + $0x20] sm:$0xff]  ;;  %v817_v52 = vld [vmem:[#allocation3 + $0x30] sm:$0xff] }
 0x1bb   : > { %v887_v15 = vsel %vm474_vm0, %v860_v41, %v6623_v56  ;;  %v524_v37 = vadd.f32 %v486_v17, %v371_v26  ;;  %v923_v17 = vsel %vm915_vm14, %v817_v52, 0 }
 0x1bc   : > { %v6632_v20 = vand.u32 4294901760, %v887_v15  ;;  %v6668_v36 = vand.u32 4294901760, %v923_v17 }
 0x1be   : > { %v6635_v25 = vsub.f32 %v887_v15, %v6632_v20  ;;  %943 = vmatpush.msra.mxu0 %v6632_v20  ;;  %5860 = vmatpush.msra.mxu2 %v6632_v20  ;;  %v917_v15 = vsel %vm915_vm14, %v815_v9, 0 }
 0x1bf   : > { %v6666_v26 = vand.u32 4294901760, %v917_v15 }
 0x1c0   : > { %v9143_v44 = vand.u32 4294901760, %v6635_v25 }
 0x1c1   : > { %v6645_v41 = vpop.permute.xlu2 %615 }
 0x1c2   : > { %v639_v5 = vsel %vm627_vm1, %v6456_v62, %v6645_v41  ;;  %v1002_v42 = vsub.f32 %v6635_v25, %v9143_v44 }
 0x1c3   : > { %v677_v10 = vadd.f32 %v639_v5, %v524_v37  ;;  %v6671_v37 = vsub.f32 %v917_v15, %v6666_v26  ;;  %v6674_v5 = vsub.f32 %v923_v17, %v6668_v36 }
 0x1c4   : > { %v1003_v34 = vand.u32 4294901760, %v1002_v42 }
 0x1c5   : > { %v721_v61 = vadd.f32 %v6215_v12, %v677_v10  ;;  %v6686_v9 = vand.u32 4294901760, %v6674_v5 }
 0x1c6   : > { %1004 = vmatpush.msra.mxu1 %v1003_v34  ;;  %5864 = vmatpush.msra.mxu3 %v1003_v34 }
 0x1c7   : > { %v741_v59 = vmax.f32 %v721_v61, 0.0  ;;  %v967_v2 = vsub.f32 %v6674_v5, %v6686_v9 }
 0x1c9   : > { %v6660_v62 = vsel %vm6654_vm13, %v741_v59, 0.0  ;;  %v6683_v59 = vand.u32 4294901760, %v6671_v37  ;;  %v6713_v29 = vand.u32 4294901760, %v967_v2  ;;  %v9205_v2 = vand.u32 4294901760, %v6610_v19 }
 0x1ca   : > { %9203 = vst [vmem:[#allocation15_spill] sm:$0xff] %v6660_v62  ;;  %865 = vrot.lane.b32.xlu2 %v6660_v62, %s6078_s6  ;;  %v6691_v15 = vpop.permute.xlu2 %873 }
 0x1d7   : > { %v6676_v42 = vpop.permute.xlu1 %851  ;;  %v850_v10 = vpop.permute.xlu0 %849 }
 0x1d8   : > { %v883_v34 = vsel %vm474_vm0, %v850_v10, %v6676_v42  ;;  %v951_v10 = vsub.f32 %v6671_v37, %v6683_v59 }
 0x1d9   : > { %v6680_v61 = vand.u32 4294901760, %v883_v34 }
 0x1da   : > { %v6711_v62 = vand.u32 4294901760, %v951_v10 }
 0x1db   : > { %v1006_v52 = vsub.f32 %v883_v34, %v6680_v61  ;;  %945 = vmatpush.msra.mxu0 %v6680_v61  ;;  %5861 = vmatpush.msra.mxu2 %v6680_v61  ;;  %v892_v34 = vsel %vm474_vm0, %v6603_v16, %v6691_v15 }
 0x1dc   : > { %v6715_v3 = vand.u32 4294901760, %v892_v34 }
 0x1dd   : > { %v1007_v17 = vand.u32 4294901760, %v1006_v52 }
 0x1df   : > { %v6697_v6 = vpop.permute.xlu0 %593  ;;  %v840_v1 = vpop.permute.xlu1 %839  ;;  %v1008_v7 = vsub.f32 %v1006_v52, %v1007_v17 }
 0x1e0   : > { %v630_v44 = vsel %vm627_vm1, %v6447_v60, %v6697_v6  ;;  %v879_v43 = vsel %vm474_vm0, %v840_v1, %v6615_v21  ;;  %v6722_v1 = vadd.s32 %v6364_v18, %v753_v4  ;;  %v9206_v18 = vand.u32 4294901760, %v6635_v25 }
 0x1e1   : > { %v666_v53 = vadd.f32 %v630_v44, %v6502_v39  ;;  %v6709_v24 = vand.u32 4294901760, %v879_v43  ;;  %v1009_v23 = vand.u32 4294901760, %v1008_v7  ;;  %v377_v39 = vmul.f32 %v6479_v27, %v6334_v54 }
 0x1e2   : > { %9204 = vst [vmem:[#allocation16_spill] sm:$0xff] %v6722_v1 }
 0x1e3   : > { %v710_v16 = vadd.f32 %v6449_v63, %v666_v53  ;;  %v1012_v60 = vsub.f32 %v879_v43, %v6709_v24  ;;  %947 = vmatpush.msra.mxu0 %v6709_v24  ;;  %5862 = vmatpush.msra.mxu2 %v6709_v24  ;;  %v6732_v53 = vsub.f32 %v892_v34, %v6715_v3 }
 0x1e4   : > { %1010 = vmatpush.msra.mxu1 %v1009_v23  ;;  %5865 = vmatpush.msra.mxu3 %v1009_v23 }
 0x1e5   : > { %v730_v7 = vmax.f32 %v710_v16, 0.0  ;;  %1048 = vmatpush.msrb.mxu2 %v6610_v19  ;;  %1139 = vmatpush.msrb.mxu0 %v9205_v2  ;;  %v1013_v8 = vand.u32 4294901760, %v1012_v60  ;;  %v376_v19 = vmul.f32 %v6309_v45, %v6334_v54 }
 0x1e6   : > { %953 = vmatmul.f32.vlgmr.msra.gmra.mxu0 %v6711_v62  ;;  %969 = vmatmul.f32.vlgmr.msra.gmra.mxu2 %v6713_v29 }
 0x1e7   : > { %1051 = vmatpush.msrb.mxu2 %v6635_v25  ;;  %1143 = vmatpush.msrb.mxu0 %v9206_v18  ;;  %v626_v23 = vpop.permute.xlu0 %625  ;;  %v473_v43 = vpop.permute.xlu1 %472  ;;  %v6741_v4 = vsel %vm6549_vm10, %v730_v7, 0.0  ;;  %v1014_v44 = vsub.f32 %v1012_v60, %v1013_v8  ;;  %v5849_v25 = vadd.s32 4294967294, %v6722_v1  ;;  %v1273_v7 = vand.u32 4294901760, %v6732_v53 }
 0x1e8   : > { %v490_v10 = vsel %vm474_vm0, %v6454_v31, %v473_v43  ;;  %v530_v34 = vadd.f32 %v473_v43, %v377_v39  ;;  %843 = vrot.lane.b32.xlu0 %v6741_v4, %s6078_s6  ;;  %v643_v54 = vsel %vm627_vm1, %v6532_v50, %v626_v23 }
 0x1e9   : > { %v529_v16 = vadd.f32 %v490_v10, %v376_v19  ;;  %1054 = vmatpush.msrb.mxu2 %v1006_v52  ;;  %1147 = vmatpush.msrb.mxu0 %v1007_v17  ;;  %v1015_v2 = vand.u32 4294901760, %v1014_v44  ;;  %vm769_vm15 = vcmp.ge.s32.totalorder %v5849_v25, 0  ;;  %vm774_vm2 = vcmp.lt.s32.totalorder %v5849_v25, 1024  ;;  %v6795_v25 = vpop.permute.xlu2 %853 }
 0x1ea   : > { %v683_v40 = vadd.f32 %v626_v23, %v530_v34  ;;  %v1274_v17 = vsub.f32 %v6732_v53, %v1273_v7  ;;  %vm6760_vm3 = vmand %vm769_vm15, %vm774_vm2  ;;  %v366_v10 = vmul.f32 %v6309_v45, %v6345_v58  ;;  %v818_v34 = vld [vmem:[#allocation3 + $0x38] sm:$0xff] }
 0x1eb   : > { %v682_v18 = vadd.f32 %v643_v54, %v529_v16  ;;  %1057 = vmatpush.msrb.mxu2 %v1012_v60  ;;  %1151 = vmatpush.msrb.mxu0 %v1013_v8  ;;  %v926_v16 = vsel %vm915_vm14, %v818_v34, 0 }
 0x1ec   : > { %v727_v31 = vadd.f32 %v6353_v0, %v683_v40  ;;  %1016 = vmatpush.msra.mxu1 %v1015_v2  ;;  %5866 = vmatpush.msra.mxu3 %v1015_v2  ;;  %v1275_v19 = vand.u32 4294901760, %v1274_v17  ;;  %v6803_v40 = vand.u32 4294901760, %v926_v16 }
 0x1ed   : > { %1219 = vmatpush.msra.mxu2 %v6715_v3  ;;  %1326 = vmatpush.msra.mxu0 %v6732_v53  ;;  %v726_v52 = vadd.f32 %v6353_v0, %v682_v18 }
 0x1ee   : > { %1092 = vmatpush.msrb.mxu3 %v6607_v22  ;;  %1182 = vmatpush.msrb.mxu1 %v6607_v22  ;;  %v747_v50 = vmax.f32 %v727_v31, 0.0  ;;  %v6810_v17 = vsub.f32 %v926_v16, %v6803_v40  ;;  %v816_v16 = vld [vmem:[#allocation3 + $0x28] sm:$0xff] }
 0x1ef   : > { %v443_v60 = vpop.permute.xlu0 %442  ;;  %v453_v8 = vpop.permute.xlu1 %452  ;;  %v746_v23 = vmax.f32 %v726_v52, 0.0  ;;  %1018 = vmatmul.f32.vlgmr.msra.gmra.mxu1 %v6666_v26  ;;  %1026 = vmatmul.f32.vlgmr.msra.gmra.mxu3 %v6668_v36 }
 0x1f0   : > { %1094 = vmatpush.msrb.mxu3 %v6632_v20  ;;  %1184 = vmatpush.msrb.mxu1 %v6632_v20  ;;  %v6770_v0 = vsel %vm6760_vm3, %v747_v50, 0.0  ;;  %v362_v20 = vmul.f32 %v6479_v27, %v6212_v11  ;;  %v478_v43 = vsel %vm474_vm0, %v6490_v13, %v443_v60  ;;  %v482_v44 = vsel %vm474_vm0, %v6557_v51, %v453_v8 }
 0x1f1   : > { %877 = vrot.lane.b32.xlu2 %v6770_v0, %s6078_s6  ;;  %v6776_v22 = vsel %vm6654_vm13, %v746_v23, 0.0  ;;  %v367_v51 = vmul.f32 %v6479_v27, %v6345_v58  ;;  %v519_v2 = vadd.f32 %v482_v44, %v366_v10 }
 0x1f2   : > { %1096 = vmatpush.msrb.mxu3 %v6680_v61  ;;  %1186 = vmatpush.msrb.mxu1 %v6680_v61  ;;  %v361_v61 = vmul.f32 %v6309_v45, %v6212_v11  ;;  %v515_v13 = vadd.f32 %v443_v60, %v362_v20 }
 0x1f3   : > { %875 = vrot.lane.b32.xlu1 %v6776_v22, %s6078_s6  ;;  %v520_v58 = vadd.f32 %v453_v8, %v367_v51  ;;  %v6821_v8 = vand.u32 4294901760, %v6810_v17 }
 0x1f4   : > { %1098 = vmatpush.msrb.mxu3 %v6709_v24  ;;  %1188 = vmatpush.msrb.mxu1 %v6709_v24  ;;  %v884_v24 = vsel %vm474_vm0, %v6676_v42, %v6795_v25  ;;  %v514_v11 = vadd.f32 %v478_v43, %v361_v61  ;;  %v678_v42 = vadd.f32 %v6645_v41, %v6625_v14 }
 0x1f5   : > { %v6815_v60 = vand.u32 4294901760, %v884_v24  ;;  %v975_v61 = vsub.f32 %v6810_v17, %v6821_v8 }
 0x1f6   : > { %1276 = vmatpush.msra.mxu3 %v1275_v19  ;;  %1370 = vmatpush.msra.mxu1 %v6715_v3  ;;  %v722_v14 = vadd.f32 %v6215_v12, %v678_v42 }
 0x1f7   : > { %v596_v54 = vpop.permute.xlu0 %595  ;;  %v606_v45 = vpop.permute.xlu1 %605  ;;  %1030 = vmatmul.f32.gmra.mxu3 %v6803_v40  ;;  %v6827_v41 = vsub.f32 %v884_v24, %v6815_v60  ;;  %v6846_v51 = vand.u32 4294901760, %v975_v61  ;;  %v920_v24 = vsel %vm915_vm14, %v816_v16, 0  ;;  %v5226_v61 = vld [vmem:[%s9133_s4 + $0x18] sm:$0xff]  ;;  %v5338_v16 = vld [vmem:[%s9134_s5 + $0x8] sm:$0xff] }
 0x1f8   : > { %v631_v18 = vsel %vm627_vm1, %v6697_v6, %v596_v54  ;;  %v668_v31 = vadd.f32 %v596_v54, %v515_v13  ;;  %v635_v52 = vsel %vm627_vm1, %v6553_v38, %v606_v45  ;;  %v673_v19 = vadd.f32 %v606_v45, %v520_v58 }
 0x1f9   : > { %v667_v27 = vadd.f32 %v631_v18, %v514_v11  ;;  %v672_v50 = vadd.f32 %v635_v52, %v519_v2  ;;  %977 = vmatmul.f32.gmra.mxu2 %v6846_v51  ;;  %v6859_v49 = vand.u32 4294901760, %v920_v24  ;;  %v742_v2 = vmax.f32 %v722_v14, 0.0  ;;  %v5339_v14 = vld [vmem:[%s9134_s5 + $0x10] sm:$0xff] }
 0x1fa   : > { %v712_v23 = vadd.f32 %v6449_v63, %v668_v31  ;;  %v717_v10 = vadd.f32 %v6492_v35, %v673_v19  ;;  %v1285_v45 = vand.u32 4294901760, %v6827_v41 }
 0x1fb   : > { %v711_v6 = vadd.f32 %v6449_v63, %v667_v27  ;;  %v716_v38 = vadd.f32 %v6492_v35, %v672_v50  ;;  %v6869_v18 = vsub.f32 %v920_v24, %v6859_v49  ;;  %1022 = vmatmul.f32.gmra.mxu1 %v6859_v49  ;;  %v6881_v58 = vsel %vm6760_vm3, %v742_v2, 0.0 }
 0x1fc   : > { %v732_v20 = vmax.f32 %v712_v23, 0.0  ;;  %v737_v54 = vmax.f32 %v717_v10, 0.0  ;;  %v1286_v42 = vsub.f32 %v6827_v41, %v1285_v45  ;;  %v5225_v10 = vld [vmem:[%s9133_s4 + $0x10] sm:$0xff]  ;;  %v9213_v24 = vmov 2  }
 0x1fd   : > { %v731_v43 = vmax.f32 %v711_v6, 0.0  ;;  %v736_v44 = vmax.f32 %v716_v38, 0.0  ;;  %v6876_v52 = vand.u32 4294901760, %v6869_v18  ;;  %v9209_v38 = vld [vmem:[#allocation12_spill] sm:$0xff]  ;;  %v9214_v2 = vmov 0  }
 0x1fe   : > { %v6831_v63 = vsel %vm6760_vm3, %v732_v20, 0.0  ;;  %v6888_v27 = vsel %vm6760_vm3, %v737_v54, 0.0  ;;  %v1287_v19 = vand.u32 4294901760, %v1286_v42  ;;  %v9210_v20 = vld [vmem:[#allocation13_spill] sm:$0xff] }
 0x1ff   : > { %847 = vrot.lane.b32.xlu2 %v6831_v63, %s6078_s6  ;;  %v6836_v34 = vpop.permute.xlu1 %863  ;;  %v6840_v13 = vsel %vm6654_vm13, %v731_v43, 0.0  ;;  %v6844_v12 = vsel %vm6654_vm13, %v736_v44, 0.0  ;;  %1102 = vmatmul.f32.vlgmr.msrb.gmra.mxu3 %v6683_v59  ;;  %v959_v23 = vsub.f32 %v6869_v18, %v6876_v52  ;;  %v9211_v43 = vld [vmem:[#allocation15_spill] sm:$0xff] }
 0x200   : > { %v888_v35 = vsel %vm474_vm0, %v6623_v56, %v6836_v34  ;;  %845 = vrot.lane.b32.xlu1 %v6840_v13, %s6078_s6  ;;  %855 = vrot.lane.b32.xlu0 %v6844_v12, %s6078_s6  ;;  %v5223_v44 = vld [vmem:[%s9133_s4] sm:$0xff] }
 0x201   : > { %v6856_v11 = vand.u32 4294901760, %v888_v35  ;;  %1060 = vmatmul.f32.vlgmr.msrb.gmra.mxu2 %v6671_v37  ;;  %v6903_v6 = vand.u32 4294901760, %v959_v23 }
 0x203   : > { %v6863_v56 = vsub.f32 %v888_v35, %v6856_v11  ;;  %1221 = vmatpush.msra.mxu2 %v6856_v11  ;;  %1372 = vmatpush.msra.mxu1 %v6856_v11  ;;  %v9212_v35 = vmov 1  }
 0x204   : > { %961 = vmatmul.f32.gmra.mxu0 %v6903_v6  ;;  %1190 = vmatmul.f32.vlgmr.msrb.gmra.mxu1 %v6666_v26 }
 0x205   : > { %1223 = vmatpush.msra.mxu2 %v6815_v60  ;;  %1329 = vmatpush.msra.mxu0 %v6863_v56  ;;  %v1279_v31 = vand.u32 4294901760, %v6863_v56 }
 0x206   : > { %1374 = vmatpush.msra.mxu1 %v6815_v60 }
 0x207   : > { %3745 = vrot.lane.b32.xlu2 %v6437_v47, %s6079_s9  ;;  %1332 = vmatpush.msra.mxu0 %v6827_v41  ;;  %v1280_v50 = vsub.f32 %v6863_v56, %v1279_v31 }
 0x208   : > { %857 = vrot.lane.b32.xlu1 %v6888_v27, %s6078_s6  ;;  %867 = vrot.lane.b32.xlu0 %v6881_v58, %s6078_s6 }
 0x209   : > { %v1281_v39 = vand.u32 4294901760, %v1280_v50  ;;  %1108 = vmatmul.f32.gmra.mxu3 %v6876_v52  ;;  %1065 = vmatmul.f32.gmra.mxu2 %v6869_v18 }
 0x20b   : > { %1282 = vmatpush.msra.mxu3 %v1281_v39 }
 0x20c   : > { %1153 = vmatmul.f32.vlgmr.msrb.gmra.mxu0 %v6666_v26  ;;  %1194 = vmatmul.f32.gmra.mxu1 %v6859_v49 }
 0x20d   : > { %1288 = vmatpush.msra.mxu3 %v1287_v19 }
 0x20f   : > { %3737 = vrot.lane.b32.xlu2 %v6518_v28, %s6079_s9 }
 0x210   : > { %3757 = vrot.lane.b32.xlu1 %v6411_v57, %s6079_s9  ;;  %3755 = vrot.lane.b32.xlu0 %v6407_v55, %s6079_s9 }
 0x211   : > { %1114 = vmatmul.f32.gmra.mxu3 %v6686_v9  ;;  %1070 = vmatmul.f32.gmra.mxu2 %v6674_v5 }
 0x214   : > { %1157 = vmatmul.f32.gmra.mxu0 %v6859_v49  ;;  %1198 = vmatmul.f32.gmra.mxu1 %v6668_v36 }
 0x217   : > { %3759 = vrot.lane.b32.xlu2 %v6561_v48, %s6079_s9 }
 0x218   : > { %3735 = vrot.lane.b32.xlu1 %v6522_v30, %s6079_s9  ;;  %3747 = vrot.lane.b32.xlu0 %v6433_v46, %s6079_s9 }
 0x219   : > { %1120 = vmatmul.f32.gmra.mxu3 %v6821_v8  ;;  %1075 = vmatmul.f32.gmra.mxu2 %v6810_v17 }
 0x21c   : > { %1161 = vmatmul.f32.gmra.mxu0 %v6668_v36  ;;  %1202 = vmatmul.f32.gmra.mxu1 %v6803_v40 }
 0x21f   : > { %3729 = vrot.lane.b32.xlu2 %v6741_v4, %s6079_s9 }
 0x220   : > { %3727 = vrot.lane.b32.xlu1 %v6460_v32, %s6079_s9  ;;  %3725 = vrot.lane.b32.xlu0 %v6544_v33, %s6079_s9 }
 0x224   : > { %1165 = vmatmul.f32.gmra.mxu0 %v6803_v40  ;;  %v6978_v50 = vpop.permute.xlu2 %865 }
 0x225   : > { %v889_v39 = vsel %vm474_vm0, %v6836_v34, %v6978_v50 }
 0x227   : > { %3741 = vrot.lane.b32.xlu2 %v6844_v12, %s6079_s9 }
 0x228   : > { %3739 = vrot.lane.b32.xlu1 %v9209_v38, %s6079_s9  ;;  %3749 = vrot.lane.b32.xlu0 %v9210_v20, %s6079_s9 }
 0x22f   : > { %3753 = vrot.lane.b32.xlu2 %v6881_v58, %s6079_s9 }
 0x230   : > { %3751 = vrot.lane.b32.xlu1 %v9211_v43, %s6079_s9  ;;  %3761 = vrot.lane.b32.xlu0 %v6776_v22, %s6079_s9 }
 0x237   : > { %5229 = vperm.xlu2 %5947, %v5223_v44  }
 0x238   : > { %3763 = vrot.lane.b32.xlu1 %v6770_v0, %s6079_s9  ;;  %3731 = vrot.lane.b32.xlu0 %v6840_v13, %s6079_s9 }
 0x23f   : > { %5244 = vperm.xlu2 %5947, %v5226_v61   ;;  %v6989_v61 = vand.u32 4294901760, %v889_v39 }
 0x240   : > { %3733 = vrot.lane.b32.xlu1 %v6831_v63, %s6079_s9  ;;  %3743 = vrot.lane.b32.xlu0 %v6888_v27, %s6079_s9 }
 0x247   : > { %5353 = vperm.xlu2 %5947, %v5339_v14  }
 0x248   : > { %5239 = vperm.xlu1 %5948, %v5225_v10   ;;  %5386 = vperm.xlu0 %5950, %v5339_v14   ;;  %v6997_v14 = vsub.f32 %v889_v39, %v6989_v61 }
 0x24a   : > { %v1557_v56 = vand.u32 4294901760, %v6997_v14 }
 0x24f   : > { %5952 = vset.pattern.permute.xlu2 %v9212_v35 }
 0x250   : > { %5348 = vperm.xlu1 %5948, %v5338_v16   ;;  %5954 = vset.pattern.permute.xlu0 %v9213_v24 }
 0x251   : > { %5526 = vperm.xlu0 %5954, %v5338_v16   ;;  %5382 = vperm.xlu2 %5952, %v5338_v16  }
 0x258   : > { %5951 = vset.pattern.permute.xlu1 %v9212_v35 }
 0x259   : > { %5955 = vset.pattern.permute.xlu0 %v9214_v2  ;;  %5953 = vset.pattern.permute.xlu2 %v9213_v24  ;;  %v7275_v24 = vand.u32 4294901760, %v6522_v30 }
 0x25a   : > { %v844_v54 = vpop.permute.xlu0 %843 }
 0x25b   : > { %v880_v42 = vsel %vm474_vm0, %v6615_v21, %v844_v54 }
 0x25c   : > { %v1224_v23 = vand.u32 4294901760, %v880_v42 }
 0x25e   : > { %v1290_v19 = vsub.f32 %v880_v42, %v1224_v23  ;;  %1225 = vmatpush.msra.mxu2 %v1224_v23  ;;  %1376 = vmatpush.msra.mxu1 %v1224_v23 }
 0x25f   : > { %1231 = vmatmul.f32.vlgmr.msra.gmra.mxu2 %v6711_v62  ;;  %1380 = vmatmul.f32.vlgmr.msra.gmra.mxu1 %v6683_v59 }
 0x260   : > { %1417 = vmatpush.msrb.mxu2 %v1273_v7  ;;  %1335 = vmatpush.msra.mxu0 %v1290_v19  ;;  %v1291_v44 = vand.u32 4294901760, %v1290_v19 }
 0x261   : > { %1338 = vmatmul.f32.vlgmr.msra.gmra.mxu0 %v6671_v37 }
 0x262   : > { %1421 = vmatpush.msrb.mxu2 %v1279_v31  ;;  %v1292_v21 = vsub.f32 %v1290_v19, %v1291_v44 }
 0x264   : > { %1425 = vmatpush.msrb.mxu2 %v1285_v45  ;;  %v1293_v34 = vand.u32 4294901760, %v1292_v21 }
 0x265   : > { %v876_v10 = vpop.permute.xlu1 %875 }
 0x266   : > { %v893_v53 = vsel %vm474_vm0, %v6691_v15, %v876_v10  ;;  %1429 = vmatpush.msrb.mxu2 %v1291_v44  ;;  %1294 = vmatpush.msra.mxu3 %v1293_v34 }
 0x267   : > { %v7001_v7 = vand.u32 4294901760, %v893_v53  ;;  %1239 = vmatmul.f32.gmra.mxu2 %v6903_v6  ;;  %1296 = vmatmul.f32.vlgmr.msra.gmra.mxu3 %v6666_v26 }
 0x268   : > { %1460 = vmatpush.msrb.mxu3 %v6715_v3  ;;  %1386 = vmatmul.f32.gmra.mxu1 %v6876_v52  ;;  %v1558_v3 = vsub.f32 %v6997_v14, %v1557_v56 }
 0x269   : > { %v1550_v41 = vsub.f32 %v893_v53, %v7001_v7  ;;  %1497 = vmatpush.msrb.mxu0 %v7001_v7 }
 0x26a   : > { %1343 = vmatmul.f32.gmra.mxu0 %v6869_v18  ;;  %1462 = vmatpush.msrb.mxu3 %v6856_v11  ;;  %v7020_v11 = vpop.permute.xlu2 %877 }
 0x26b   : > { %v1551_v15 = vand.u32 4294901760, %v1550_v41  ;;  %1499 = vmatpush.msrb.mxu0 %v6989_v61  ;;  %1604 = vmatpush.msra.mxu2 %v1550_v41  ;;  %v894_v19 = vsel %vm474_vm0, %v876_v10, %v7020_v11 }
 0x26c   : > { %1464 = vmatpush.msrb.mxu3 %v6815_v60  ;;  %v1559_v60 = vand.u32 4294901760, %v1558_v3  ;;  %v7033_v34 = vand.u32 4294901760, %v894_v19 }
 0x26d   : > { %v1552_v45 = vsub.f32 %v1550_v41, %v1551_v15  ;;  %1607 = vmatpush.msra.mxu2 %v6997_v14 }
 0x26e   : > { %1466 = vmatpush.msrb.mxu3 %v1224_v23 }
 0x26f   : > { %1247 = vmatmul.f32.gmra.mxu2 %v6713_v29  ;;  %v1553_v31 = vand.u32 4294901760, %v1552_v45  ;;  %1300 = vmatmul.f32.gmra.mxu3 %v6859_v49 }
 0x270   : > { %1648 = vmatpush.msra.mxu3 %v7001_v7  ;;  %1392 = vmatmul.f32.gmra.mxu1 %v6686_v9 }
 0x271   : > { %1554 = vmatpush.msrb.mxu1 %v1553_v31 }
 0x272   : > { %1650 = vmatpush.msra.mxu3 %v6989_v61  ;;  %1348 = vmatmul.f32.gmra.mxu0 %v6674_v5  ;;  %v856_v16 = vpop.permute.xlu0 %855  ;;  %v846_v35 = vpop.permute.xlu1 %845 }
 0x273   : > { %v885_v2 = vsel %vm474_vm0, %v6795_v25, %v856_v16  ;;  %1560 = vmatpush.msrb.mxu1 %v1559_v60  ;;  %v881_v42 = vsel %vm474_vm0, %v844_v54, %v846_v35  ;;  %v7037_v14 = vpop.permute.xlu2 %847 }
 0x274   : > { %v1500_v23 = vand.u32 4294901760, %v885_v2  ;;  %v7027_v39 = vand.u32 4294901760, %v881_v42  ;;  %v882_v10 = vsel %vm474_vm0, %v846_v35, %v7037_v14  ;;  %v7054_v35 = vsub.f32 %v894_v19, %v7033_v34 }
 0x276   : > { %v1562_v44 = vsub.f32 %v885_v2, %v1500_v23  ;;  %v1568_v21 = vsub.f32 %v881_v42, %v7027_v39  ;;  %1501 = vmatpush.msrb.mxu0 %v1500_v23  ;;  %1652 = vmatpush.msra.mxu3 %v1500_v23 }
 0x277   : > { %1255 = vmatmul.f32.gmra.mxu2 %v6846_v51  ;;  %1304 = vmatmul.f32.gmra.mxu3 %v6668_v36 }
 0x278   : > { %1503 = vmatpush.msrb.mxu0 %v7027_v39  ;;  %v1563_v25 = vand.u32 4294901760, %v1562_v44  ;;  %v1569_v54 = vand.u32 4294901760, %v1568_v21  ;;  %1610 = vmatpush.msra.mxu2 %v1562_v44 }
 0x279   : > { %1654 = vmatpush.msra.mxu3 %v7027_v39  ;;  %1398 = vmatmul.f32.gmra.mxu1 %v6821_v8 }
 0x27a   : > { %1353 = vmatmul.f32.gmra.mxu0 %v6810_v17  ;;  %v7044_v53 = vpop.permute.xlu0 %867  ;;  %v7046_v41 = vpop.permute.xlu1 %857  ;;  %v1564_v45 = vsub.f32 %v1562_v44, %v1563_v25  ;;  %1613 = vmatpush.msra.mxu2 %v1568_v21  ;;  %v1570_v60 = vsub.f32 %v1568_v21, %v1569_v54  ;;  %v7060_v44 = vand.u32 4294901760, %v882_v10 }
 0x27b   : > { %1695 = vmatpush.msra.mxu0 %v1551_v15  ;;  %v890_v3 = vsel %vm474_vm0, %v6978_v50, %v7044_v53  ;;  %v886_v31 = vsel %vm474_vm0, %v856_v16, %v7046_v41  ;;  %v1829_v16 = vand.u32 4294901760, %v7054_v35 }
 0x27c   : > { %v7056_v2 = vand.u32 4294901760, %v890_v3  ;;  %v7058_v42 = vand.u32 4294901760, %v886_v31  ;;  %v1565_v1 = vand.u32 4294901760, %v1564_v45  ;;  %v1571_v50 = vand.u32 4294901760, %v1570_v60 }
 0x27d   : > { %1699 = vmatpush.msra.mxu0 %v1557_v56  ;;  %v1830_v21 = vsub.f32 %v7054_v35, %v1829_v16  ;;  %v7112_v60 = vand.u32 4294901760, %v7044_v53 }
 0x27e   : > { %1566 = vmatpush.msrb.mxu1 %v1565_v1  ;;  %v7063_v15 = vsub.f32 %v890_v3, %v7056_v2  ;;  %v7070_v19 = vsub.f32 %v886_v31, %v7058_v42  ;;  %v7073_v1 = vsub.f32 %v882_v10, %v7060_v44 }
 0x27f   : > { %1703 = vmatpush.msra.mxu0 %v1563_v25  ;;  %1431 = vmatmul.f32.vlgmr.msrb.gmra.mxu2 %v6666_v26  ;;  %v1831_v10 = vand.u32 4294901760, %v1830_v21 }
 0x280   : > { %1308 = vmatmul.f32.gmra.mxu3 %v6803_v40  ;;  %1775 = vmatpush.msrb.mxu2 %v7033_v34  ;;  %v1835_v56 = vand.u32 4294901760, %v7063_v15  ;;  %v1841_v25 = vand.u32 4294901760, %v7070_v19 }
 0x281   : > { %1707 = vmatpush.msra.mxu0 %v1569_v54  ;;  %1572 = vmatpush.msrb.mxu1 %v1571_v50  ;;  %v7119_v50 = vand.u32 4294901760, %v7046_v41 }
 0x282   : > { %1509 = vmatmul.f32.vlgmr.msrb.gmra.mxu0 %v6711_v62  ;;  %1574 = vmatmul.f32.vlgmr.msrb.gmra.mxu1 %v6666_v26  ;;  %v1836_v54 = vsub.f32 %v7063_v15, %v1835_v56  ;;  %v1842_v45 = vsub.f32 %v7070_v19, %v1841_v25 }
 0x283   : > { %1738 = vmatpush.msra.mxu1 %v7001_v7  ;;  %1777 = vmatpush.msrb.mxu2 %v7056_v2  ;;  %v1847_v7 = vand.u32 4294901760, %v7073_v1 }
 0x284   : > { %1882 = vmatpush.msrb.mxu0 %v7054_v35  ;;  %v7162_v35 = vpop.f32.mrf.mxu0 }
 0x285   : > { %1740 = vmatpush.msra.mxu1 %v6989_v61  ;;  %1779 = vmatpush.msrb.mxu2 %v7058_v42  ;;  %v1837_v61 = vand.u32 4294901760, %v1836_v54  ;;  %v1848_v3 = vsub.f32 %v7073_v1, %v1847_v7 }
 0x286   : > { %1885 = vmatpush.msrb.mxu0 %v7063_v15 }
 0x287   : > { %1742 = vmatpush.msra.mxu1 %v1500_v23  ;;  %1781 = vmatpush.msrb.mxu2 %v7060_v44  ;;  %v1843_v23 = vand.u32 4294901760, %v1842_v45  ;;  %v1849_v31 = vand.u32 4294901760, %v1848_v3 }
 0x288   : > { %1888 = vmatpush.msrb.mxu0 %v7070_v19  ;;  %1435 = vmatmul.f32.gmra.mxu2 %v6859_v49  ;;  %v7123_v19 = vand.u32 4294901760, %v7037_v14 }
 0x289   : > { %1468 = vmatmul.f32.vlgmr.msrb.gmra.mxu3 %v6666_v26  ;;  %1744 = vmatpush.msra.mxu1 %v7027_v39  ;;  %v7107_v39 = vand.u32 4294901760, %v7020_v11 }
 0x28a   : > { %1832 = vmatpush.msrb.mxu3 %v1831_v10  ;;  %1891 = vmatpush.msrb.mxu0 %v7073_v1  ;;  %v7127_v1 = vsub.f32 %v7044_v53, %v7112_v60  ;;  %v7139_v54 = vsub.f32 %v7037_v14, %v7123_v19 }
 0x28b   : > { %1926 = vmatpush.msrb.mxu1 %v7033_v34  ;;  %1517 = vmatmul.f32.gmra.mxu0 %v6903_v6  ;;  %v7116_v15 = vsub.f32 %v7020_v11, %v7107_v39  ;;  %v7133_v11 = vsub.f32 %v7046_v41, %v7119_v50 }
 0x28c   : > { %1578 = vmatmul.f32.gmra.mxu1 %v6859_v49  ;;  %1838 = vmatpush.msrb.mxu3 %v1837_v61  ;;  %v2113_v10 = vand.u32 4294901760, %v7127_v1  ;;  %v2125_v41 = vand.u32 4294901760, %v7139_v54  ;;  %v7154_v61 = vpop.f32.mrf.mxu1 }
 0x28d   : > { %1928 = vmatpush.msrb.mxu1 %v7056_v2  ;;  %v2107_v21 = vand.u32 4294901760, %v7116_v15  ;;  %v2119_v45 = vand.u32 4294901760, %v7133_v11 }
 0x28e   : > { %1844 = vmatpush.msrb.mxu3 %v1843_v23  ;;  %v2114_v14 = vsub.f32 %v7127_v1, %v2113_v10 }
 0x28f   : > { %1930 = vmatpush.msrb.mxu1 %v7058_v42  ;;  %v2108_v53 = vsub.f32 %v7116_v15, %v2107_v21  ;;  %v2120_v23 = vsub.f32 %v7133_v11, %v2119_v45 }
 0x290   : > { %1850 = vmatpush.msrb.mxu3 %v1849_v31  ;;  %1439 = vmatmul.f32.gmra.mxu2 %v6668_v36  ;;  %v2126_v31 = vsub.f32 %v7139_v54, %v2125_v41 }
 0x291   : > { %1932 = vmatpush.msrb.mxu1 %v7060_v44  ;;  %1472 = vmatmul.f32.gmra.mxu3 %v6859_v49  ;;  %v2109_v3 = vand.u32 4294901760, %v2108_v53  ;;  %v7168_v53 = vpop.f32.mrf.mxu2 }
 0x292   : > { %9215 = vst [vmem:[#allocation12_spill] sm:$0xff] %v7168_v53 }
 0x293   : > { %1525 = vmatmul.f32.gmra.mxu0 %v6713_v29 }
 0x294   : > { %1582 = vmatmul.f32.gmra.mxu1 %v6668_v36 }
 0x298   : > { %1443 = vmatmul.f32.gmra.mxu2 %v6803_v40 }
 0x299   : > { %1476 = vmatmul.f32.gmra.mxu3 %v6668_v36 }
 0x29b   : > { %1533 = vmatmul.f32.gmra.mxu0 %v6846_v51 }
 0x29c   : > { %1586 = vmatmul.f32.gmra.mxu1 %v6803_v40 }
 0x2a0   : > { %1616 = vmatmul.f32.vlgmr.msra.gmra.mxu2 %v6671_v37 }
 0x2a1   : > { %1480 = vmatmul.f32.gmra.mxu3 %v6803_v40  ;;  %1973 = vmatpush.msra.mxu2 %v1829_v16  ;;  %v2115_v16 = vand.u32 4294901760, %v2114_v14  ;;  %v7181_v14 = vpop.f32.mrf.mxu0 }
 0x2a3   : > { %1709 = vmatmul.f32.vlgmr.msra.gmra.mxu0 %v6666_v26  ;;  %1977 = vmatpush.msra.mxu2 %v1835_v56  ;;  %v2121_v56 = vand.u32 4294901760, %v2120_v23 }
 0x2a4   : > { %1746 = vmatmul.f32.vlgmr.msra.gmra.mxu1 %v6666_v26  ;;  %2053 = vmatpush.msra.mxu0 %v7107_v39 }
 0x2a5   : > { %2110 = vmatpush.msra.mxu1 %v2109_v3  ;;  %1981 = vmatpush.msra.mxu2 %v1841_v25  ;;  %v2127_v25 = vand.u32 4294901760, %v2126_v31  ;;  %v7183_v3 = vpop.f32.mrf.mxu3 }
 0x2a6   : > { %2055 = vmatpush.msra.mxu0 %v7112_v60  ;;  %9216 = vst [vmem:[#allocation13_spill] sm:$0xff] %v7183_v3 }
 0x2a7   : > { %2116 = vmatpush.msra.mxu1 %v2115_v16  ;;  %1985 = vmatpush.msra.mxu2 %v1847_v7  ;;  %v7178_v7 = vpop.f32.mrf.mxu1 }
 0x2a8   : > { %2057 = vmatpush.msra.mxu0 %v7119_v50  ;;  %1621 = vmatmul.f32.gmra.mxu2 %v6869_v18 }
 0x2a9   : > { %2122 = vmatpush.msra.mxu1 %v2121_v56  ;;  %1658 = vmatmul.f32.vlgmr.msra.gmra.mxu3 %v6683_v59  ;;  %v7194_v23 = vpop.f32.mrf.mxu0 }
 0x2aa   : > { %2016 = vmatpush.msra.mxu3 %v7033_v34  ;;  %2059 = vmatpush.msra.mxu0 %v7123_v19  ;;  %v7188_v34 = vpop.f32.mrf.mxu2  ;;  %9219 = vst [vmem:[#allocation18_spill] sm:$0xff] %v7194_v23  ;;  %v7333_v23 = vand.u32 4294901760, %v6411_v57 }
 0x2ab   : > { %2128 = vmatpush.msra.mxu1 %v2127_v25  ;;  %1713 = vmatmul.f32.gmra.mxu0 %v6859_v49  ;;  %9217 = vst [vmem:[#allocation15_spill] sm:$0xff] %v7188_v34 }
 0x2ac   : > { %1750 = vmatmul.f32.gmra.mxu1 %v6859_v49  ;;  %2018 = vmatpush.msra.mxu3 %v7056_v2 }
 0x2ae   : > { %2020 = vmatpush.msra.mxu3 %v7058_v42  ;;  %v7198_v42 = vpop.f32.mrf.mxu3 }
 0x2af   : > { %v7192_v2 = vpop.f32.mrf.mxu1  ;;  %9220 = vst [vmem:[#allocation19_spill] sm:$0xff] %v7198_v42 }
 0x2b0   : > { %2022 = vmatpush.msra.mxu3 %v7060_v44  ;;  %1626 = vmatmul.f32.gmra.mxu2 %v6674_v5  ;;  %9218 = vst [vmem:[#allocation17_spill] sm:$0xff] %v7192_v2 }
 0x2b1   : > { %1664 = vmatmul.f32.gmra.mxu3 %v6876_v52  ;;  %v7209_v31 = vpop.f32.mrf.mxu0 }
 0x2b2   : > { %v7201_v44 = vpop.f32.mrf.mxu2  ;;  %9222 = vst [vmem:[#allocation21_spill] sm:$0xff] %v7209_v31 }
 0x2b3   : > { %1717 = vmatmul.f32.gmra.mxu0 %v6668_v36 }
 0x2b4   : > { %1754 = vmatmul.f32.gmra.mxu1 %v6668_v36 }
 0x2b6   : > { %v7213_v56 = vpop.f32.mrf.mxu3 }
 0x2b7   : > { %v7204_v16 = vpop.f32.mrf.mxu1 }
 0x2b8   : > { %1631 = vmatmul.f32.gmra.mxu2 %v6810_v17  ;;  %9221 = vst [vmem:[#allocation20_spill] sm:$0xff] %v7204_v16 }
 0x2b9   : > { %1670 = vmatmul.f32.gmra.mxu3 %v6686_v9 }
 0x2ba   : > { %v7220_v25 = vpop.f32.mrf.mxu2 }
 0x2bb   : > { %1721 = vmatmul.f32.gmra.mxu0 %v6803_v40  ;;  %9223 = vst [vmem:[#allocation22_spill] sm:$0xff] %v7220_v25 }
 0x2bc   : > { %1758 = vmatmul.f32.gmra.mxu1 %v6803_v40 }
 0x2c0   : > { %1787 = vmatmul.f32.vlgmr.msrb.gmra.mxu2 %v6711_v62 }
 0x2c1   : > { %1676 = vmatmul.f32.gmra.mxu3 %v6821_v8  ;;  %2160 = vmatpush.msrb.mxu2 %v7116_v15  ;;  %v7231_v15 = vpop.f32.mrf.mxu1 }
 0x2c2   : > { %9224 = vst [vmem:[#allocation23_spill] sm:$0xff] %v7231_v15  ;;  %v7282_v15 = vand.u32 4294901760, %v6544_v33 }
 0x2c3   : > { %1894 = vmatmul.f32.vlgmr.msrb.gmra.mxu0 %v6671_v37  ;;  %2163 = vmatpush.msrb.mxu2 %v7127_v1  ;;  %v7238_v1 = vpop.f32.mrf.mxu0 }
 0x2c4   : > { %1936 = vmatmul.f32.vlgmr.msrb.gmra.mxu1 %v6683_v59  ;;  %2251 = vmatpush.msrb.mxu0 %v2107_v21  ;;  %9225 = vst [vmem:[#allocation24_spill] sm:$0xff] %v7238_v1  ;;  %v7242_v21 = vpop.f32.mrf.mxu3 }
 0x2c5   : > { %2294 = vmatpush.msrb.mxu1 %v7107_v39  ;;  %2166 = vmatpush.msrb.mxu2 %v7133_v11  ;;  %9226 = vst [vmem:[#allocation25_spill] sm:$0xff] %v7242_v21  ;;  %v7245_v11 = vpop.f32.mrf.mxu2 }
 0x2c6   : > { %2255 = vmatpush.msrb.mxu0 %v2113_v10  ;;  %9227 = vst [vmem:[#allocation26_spill] sm:$0xff] %v7245_v11  ;;  %v7266_v10 = vand.u32 4294901760, %v6437_v47 }
 0x2c7   : > { %2296 = vmatpush.msrb.mxu1 %v7112_v60  ;;  %2169 = vmatpush.msrb.mxu2 %v7139_v54 }
 0x2c8   : > { %2259 = vmatpush.msrb.mxu0 %v2119_v45  ;;  %1795 = vmatmul.f32.gmra.mxu2 %v6903_v6 }
 0x2c9   : > { %2298 = vmatpush.msrb.mxu1 %v7119_v50  ;;  %1852 = vmatmul.f32.vlgmr.msrb.gmra.mxu3 %v6666_v26 }
 0x2ca   : > { %2204 = vmatpush.msrb.mxu3 %v7107_v39  ;;  %2263 = vmatpush.msrb.mxu0 %v2125_v41  ;;  %v7251_v39 = vpop.f32.mrf.mxu1 }
 0x2cb   : > { %2300 = vmatpush.msrb.mxu1 %v7123_v19  ;;  %1899 = vmatmul.f32.gmra.mxu0 %v6869_v18  ;;  %9228 = vst [vmem:[#allocation27_spill] sm:$0xff] %v7251_v39  ;;  %v7254_v54 = vpop.f32.mrf.mxu0 }
 0x2cc   : > { %1942 = vmatmul.f32.gmra.mxu1 %v6876_v52  ;;  %2206 = vmatpush.msrb.mxu3 %v7112_v60  ;;  %9229 = vst [vmem:[#allocation28_spill] sm:$0xff] %v7254_v54  ;;  %v7256_v60 = vpop.f32.mrf.mxu3  ;;  %v7279_v54 = vsub.f32 %v6437_v47, %v7266_v10  ;;  %v7296_v47 = vsub.f32 %v6544_v33, %v7282_v15 }
 0x2cd   : > { %9230 = vst [vmem:[#allocation29_spill] sm:$0xff] %v7256_v60 }
 0x2ce   : > { %2208 = vmatpush.msrb.mxu3 %v7119_v50  ;;  %v7260_v50 = vand.u32 4294901760, %v6407_v55  ;;  %v9158_v16 = vand.u32 4294901760, %v7279_v54  ;;  %v9234_v21 = vand.u32 4294901760, %v7296_v47 }
 0x2d0   : > { %2210 = vmatpush.msrb.mxu3 %v7123_v19  ;;  %1803 = vmatmul.f32.gmra.mxu2 %v6713_v29  ;;  %v7263_v19 = vpop.f32.mrf.mxu2  ;;  %v7272_v41 = vsub.f32 %v6407_v55, %v7260_v50  ;;  %v2416_v2 = vsub.f32 %v7296_v47, %v9234_v21 }
 0x2d1   : > { %1856 = vmatmul.f32.gmra.mxu3 %v6859_v49  ;;  %9231 = vst [vmem:[#allocation30_spill] sm:$0xff] %v7263_v19  ;;  %v7287_v19 = vsub.f32 %v6522_v30, %v7275_v24 }
 0x2d2   : > { %v9157_v55 = vand.u32 4294901760, %v7272_v41  ;;  %v2417_v53 = vand.u32 4294901760, %v2416_v2 }
 0x2d3   : > { %1904 = vmatmul.f32.gmra.mxu0 %v6674_v5  ;;  %v9233_v34 = vand.u32 4294901760, %v7287_v19 }
 0x2d4   : > { %1948 = vmatmul.f32.gmra.mxu1 %v6686_v9  ;;  %v7292_v1 = vpop.f32.mrf.mxu3  ;;  %v2398_v30 = vsub.f32 %v7272_v41, %v9157_v55 }
 0x2d5   : > { %9232 = vst [vmem:[#allocation31_spill] sm:$0xff] %v7292_v1  ;;  %v2410_v11 = vsub.f32 %v7287_v19, %v9233_v34 }
 0x2d6   : > { %v2399_v1 = vand.u32 4294901760, %v2398_v30 }
 0x2d7   : > { %v2411_v34 = vand.u32 4294901760, %v2410_v11 }
 0x2d8   : > { %1811 = vmatmul.f32.gmra.mxu2 %v6846_v51 }
 0x2d9   : > { %1860 = vmatmul.f32.gmra.mxu3 %v6668_v36 }
 0x2db   : > { %1909 = vmatmul.f32.gmra.mxu0 %v6810_v17 }
 0x2dc   : > { %1954 = vmatmul.f32.gmra.mxu1 %v6821_v8  ;;  %v1381_v45 = vpop.f32.mrf.mxu1 }
 0x2de   : > { %v1339_v39 = vpop.f32.mrf.mxu0 }
 0x2e0   : > { %1987 = vmatmul.f32.vlgmr.msra.gmra.mxu2 %v6666_v26 }
 0x2e1   : > { %1864 = vmatmul.f32.gmra.mxu3 %v6803_v40  ;;  %2343 = vmatpush.msra.mxu2 %v7260_v50 }
 0x2e2   : > { %v1232_v60 = vpop.f32.mrf.mxu2 }
 0x2e3   : > { %2065 = vmatmul.f32.vlgmr.msra.gmra.mxu0 %v6711_v62  ;;  %2345 = vmatpush.msra.mxu2 %v7266_v10  ;;  %v2404_v62 = vsub.f32 %v7279_v54, %v9158_v16 }
 0x2e4   : > { %2130 = vmatmul.f32.vlgmr.msra.gmra.mxu1 %v6666_v26  ;;  %2450 = vmatpush.msra.mxu0 %v7272_v41 }
 0x2e5   : > { %2494 = vmatpush.msra.mxu1 %v7260_v50  ;;  %2347 = vmatpush.msra.mxu2 %v7275_v24  ;;  %v1387_v33 = vpop.f32.mrf.mxu1  ;;  %v2405_v16 = vand.u32 4294901760, %v2404_v62 }
 0x2e6   : > { %2453 = vmatpush.msra.mxu0 %v7279_v54 }
 0x2e7   : > { %2496 = vmatpush.msra.mxu1 %v7266_v10  ;;  %2349 = vmatpush.msra.mxu2 %v7282_v15  ;;  %v1344_v55 = vpop.f32.mrf.mxu0 }
 0x2e8   : > { %2456 = vmatpush.msra.mxu0 %v7287_v19  ;;  %1991 = vmatmul.f32.gmra.mxu2 %v6859_v49 }
 0x2e9   : > { %2498 = vmatpush.msra.mxu1 %v7275_v24  ;;  %2024 = vmatmul.f32.vlgmr.msra.gmra.mxu3 %v6666_v26 }
 0x2ea   : > { %2400 = vmatpush.msra.mxu3 %v2399_v1  ;;  %2459 = vmatpush.msra.mxu0 %v7296_v47  ;;  %v1240_v42 = vpop.f32.mrf.mxu2  ;;  %v1297_v31 = vpop.f32.mrf.mxu3 }
 0x2eb   : > { %2500 = vmatpush.msra.mxu1 %v7282_v15  ;;  %2073 = vmatmul.f32.gmra.mxu0 %v6903_v6  ;;  %v1298_v30 = vadd.f32 %v1297_v31, %v1232_v60  ;;  %v7338_v31 = vand.u32 4294901760, %v6433_v46 }
 0x2ec   : > { %2134 = vmatmul.f32.gmra.mxu1 %v6859_v49  ;;  %2406 = vmatpush.msra.mxu3 %v2405_v16 }
 0x2ed   : > { %v1340_v3 = vadd.f32 %v1339_v39, %v1298_v30  ;;  %v1393_v1 = vpop.f32.mrf.mxu1  ;;  %v7350_v60 = vsub.f32 %v6433_v46, %v7338_v31 }
 0x2ee   : > { %2412 = vmatpush.msra.mxu3 %v2411_v34 }
 0x2ef   : > { %v1349_v62 = vpop.f32.mrf.mxu0  ;;  %v1382_v25 = vadd.f32 %v1381_v45, %v1340_v3  ;;  %v7345_v3 = vand.u32 4294901760, %v6518_v28  ;;  %v9160_v34 = vand.u32 4294901760, %v7350_v60 }
 0x2f0   : > { %2418 = vmatpush.msra.mxu3 %v2417_v53  ;;  %1995 = vmatmul.f32.gmra.mxu2 %v6668_v36  ;;  %v7342_v53 = vsub.f32 %v6411_v57, %v7333_v23 }
 0x2f1   : > { %2028 = vmatmul.f32.gmra.mxu3 %v6859_v49  ;;  %v7358_v57 = vsub.f32 %v6518_v28, %v7345_v3 }
 0x2f2   : > { %v1248_v21 = vpop.f32.mrf.mxu2  ;;  %v1301_v6 = vpop.f32.mrf.mxu3  ;;  %v9159_v30 = vand.u32 4294901760, %v7342_v53 }
 0x2f3   : > { %2081 = vmatmul.f32.gmra.mxu0 %v6713_v29  ;;  %v1302_v16 = vadd.f32 %v1301_v6, %v1240_v42  ;;  %v7353_v42 = vand.u32 4294901760, %v6460_v32 }
 0x2f4   : > { %2138 = vmatmul.f32.gmra.mxu1 %v6668_v36  ;;  %v2676_v28 = vsub.f32 %v7342_v53, %v9159_v30  ;;  %v9236_v30 = vand.u32 4294901760, %v7279_v54 }
 0x2f5   : > { %v1345_v2 = vadd.f32 %v1344_v55, %v1302_v16  ;;  %v7365_v46 = vsub.f32 %v6460_v32, %v7353_v42  ;;  %v9235_v32 = vand.u32 4294901760, %v7272_v41 }
 0x2f6   : > { %v1399_v39 = vpop.f32.mrf.mxu1 }
 0x2f7   : > { %v1354_v11 = vpop.f32.mrf.mxu0  ;;  %v1388_v29 = vadd.f32 %v1387_v33, %v1345_v2  ;;  %v9239_v54 = vand.u32 4294901760, %v7365_v46 }
 0x2f8   : > { %1999 = vmatmul.f32.gmra.mxu2 %v6803_v40 }
 0x2f9   : > { %2032 = vmatmul.f32.gmra.mxu3 %v6668_v36 }
 0x2fa   : > { %v1256_v45 = vpop.f32.mrf.mxu2  ;;  %v1305_v55 = vpop.f32.mrf.mxu3 }
 0x2fb   : > { %2089 = vmatmul.f32.gmra.mxu0 %v6846_v51  ;;  %v1306_v33 = vadd.f32 %v1305_v55, %v1248_v21  ;;  %v2677_v51 = vand.u32 4294901760, %v2676_v28 }
 0x2fc   : > { %2142 = vmatmul.f32.gmra.mxu1 %v6803_v40 }
 0x2fd   : > { %v1350_v6 = vadd.f32 %v1349_v62, %v1306_v33  ;;  %v2682_v62 = vsub.f32 %v7350_v60, %v9160_v34  ;;  %v9238_v34 = vand.u32 4294901760, %v7287_v19 }
 0x2ff   : > { %v7368_v16 = vpop.f32.mrf.mxu0  ;;  %v7370_v2 = vpop.f32.mrf.mxu1  ;;  %v1394_v21 = vadd.f32 %v1393_v1, %v1350_v6  ;;  %v9237_v6 = vand.u32 4294901760, %v7358_v57  ;;  %v2683_v55 = vand.u32 4294901760, %v2682_v62 }
 0x300   : > { %2172 = vmatmul.f32.vlgmr.msrb.gmra.mxu2 %v6671_v37 }
 0x301   : > { %2036 = vmatmul.f32.gmra.mxu3 %v6803_v40  ;;  %2541 = vmatpush.msrb.mxu2 %v9235_v32  ;;  %v2688_v41 = vsub.f32 %v7358_v57, %v9237_v6 }
 0x302   : > { %v1432_v33 = vpop.f32.mrf.mxu2 }
 0x303   : > { %2265 = vmatmul.f32.vlgmr.msrb.gmra.mxu0 %v6666_v26  ;;  %2545 = vmatpush.msrb.mxu2 %v9236_v30  ;;  %v1309_v37 = vpop.f32.mrf.mxu3  ;;  %v1433_v1 = vadd.f32 %v1432_v33, %v1382_v25  ;;  %v2694_v30 = vsub.f32 %v7365_v46, %v9239_v54  ;;  %v810_v25 = vld [vmem:[#allocation3] sm:$0xff]  ;;  %v9240_v33 = vand.u32 4294901760, %v7296_v47 }
 0x304   : > { %2302 = vmatmul.f32.vlgmr.msrb.gmra.mxu1 %v6666_v26  ;;  %2621 = vmatpush.msrb.mxu0 %v7333_v23  ;;  %v1310_v32 = vadd.f32 %v1309_v37, %v1256_v45  ;;  %v2689_v26 = vand.u32 4294901760, %v2688_v41  ;;  %v812_v41 = vld [vmem:[#allocation3 + $0x10] sm:$0xff] }
 0x305   : > { %2678 = vmatpush.msrb.mxu1 %v2677_v51  ;;  %2549 = vmatpush.msrb.mxu2 %v9238_v34  ;;  %v2695_v34 = vand.u32 4294901760, %v2694_v30  ;;  %v2319_v51 = vsel %vm915_vm14, %v810_v25, 0 }
 0x306   : > { %v1355_v28 = vadd.f32 %v1354_v11, %v1310_v32  ;;  %2623 = vmatpush.msrb.mxu0 %v7338_v31 }
 0x307   : > { %2684 = vmatpush.msrb.mxu1 %v2683_v55  ;;  %2553 = vmatpush.msrb.mxu2 %v9240_v33  ;;  %v811_v55 = vld [vmem:[#allocation3 + $0x8] sm:$0xff] }
 0x308   : > { %2625 = vmatpush.msrb.mxu0 %v7345_v3  ;;  %v7401_v45 = vpop.f32.mrf.mxu0  ;;  %2177 = vmatmul.f32.gmra.mxu2 %v6869_v18  ;;  %v1400_v19 = vadd.f32 %v1399_v39, %v1355_v28 }
 0x309   : > { %2690 = vmatpush.msrb.mxu1 %v2689_v26  ;;  %2214 = vmatmul.f32.vlgmr.msrb.gmra.mxu3 %v6683_v59  ;;  %v7405_v11 = vpop.f32.mrf.mxu1  ;;  %v7413_v59 = vand.u32 4294901760, %v2319_v51 }
 0x30a   : > { %2584 = vmatpush.msrb.mxu3 %v7260_v50  ;;  %2627 = vmatpush.msrb.mxu0 %v7353_v42 }
 0x30b   : > { %2696 = vmatpush.msrb.mxu1 %v2695_v34  ;;  %2269 = vmatmul.f32.gmra.mxu0 %v6859_v49  ;;  %v1436_v47 = vpop.f32.mrf.mxu2  ;;  %v7423_v37 = vsub.f32 %v2319_v51, %v7413_v59 }
 0x30c   : > { %2306 = vmatmul.f32.gmra.mxu1 %v6859_v49  ;;  %2586 = vmatpush.msrb.mxu3 %v7266_v10  ;;  %v1437_v18 = vadd.f32 %v1436_v47, %v1388_v29  ;;  %v1469_v39 = vpop.f32.mrf.mxu3  ;;  %v2322_v10 = vsel %vm915_vm14, %v811_v55, 0  ;;  %v9242_v55 = vand.u32 4294901760, %v7342_v53 }
 0x30d   : > { %v7415_v62 = vadd.f32 %v1469_v39, %v1433_v1  ;;  %v7432_v1 = vand.u32 4294901760, %v7423_v37 }
 0x30e   : > { %2588 = vmatpush.msrb.mxu3 %v7275_v24 }
 0x30f   : > { %v2353_v32 = vsub.f32 %v7423_v37, %v7432_v1 }
 0x310   : > { %2590 = vmatpush.msrb.mxu3 %v7282_v15  ;;  %v7419_v50 = vpop.f32.mrf.mxu0  ;;  %2182 = vmatmul.f32.gmra.mxu2 %v6674_v5  ;;  %v7434_v5 = vand.u32 4294901760, %v2322_v10 }
 0x311   : > { %2220 = vmatmul.f32.gmra.mxu3 %v6876_v52  ;;  %v7426_v49 = vpop.f32.mrf.mxu1 }
 0x312   : > { %v7444_v54 = vsub.f32 %v2322_v10, %v7434_v5 }
 0x313   : > { %2273 = vmatmul.f32.gmra.mxu0 %v6668_v36  ;;  %v1440_v29 = vpop.f32.mrf.mxu2 }
 0x314   : > { %2310 = vmatmul.f32.gmra.mxu1 %v6668_v36  ;;  %v1441_v24 = vadd.f32 %v1440_v29, %v1394_v21  ;;  %v1473_v15 = vpop.f32.mrf.mxu3  ;;  %v2325_v21 = vsel %vm915_vm14, %v812_v41, 0  ;;  %v7455_v33 = vand.u32 4294901760, %v7444_v54  ;;  %v9244_v41 = vand.u32 4294901760, %v7350_v60 }
 0x315   : > { %v7436_v6 = vadd.f32 %v1473_v15, %v1437_v18  ;;  %v7457_v26 = vand.u32 4294901760, %v2325_v21 }
 0x316   : > { %v2361_v47 = vsub.f32 %v7444_v54, %v7455_v33 }
 0x318   : > { %v7438_v52 = vpop.f32.mrf.mxu0  ;;  %2187 = vmatmul.f32.gmra.mxu2 %v6810_v17  ;;  %v7452_v17 = vand.u32 4294901760, %v2353_v32  ;;  %v7475_v29 = vand.u32 4294901760, %v2361_v47 }
 0x319   : > { %2226 = vmatmul.f32.gmra.mxu3 %v6686_v9  ;;  %v7447_v36 = vpop.f32.mrf.mxu1  ;;  %v813_v9 = vld [vmem:[#allocation3 + $0x18] sm:$0xff] }
 0x31a   : > { %v2328_v18 = vsel %vm915_vm14, %v813_v9, 0 }
 0x31b   : > { %2277 = vmatmul.f32.gmra.mxu0 %v6803_v40  ;;  %v1444_v30 = vpop.f32.mrf.mxu2 }
 0x31c   : > { %2314 = vmatmul.f32.gmra.mxu1 %v6803_v40  ;;  %v1445_v28 = vadd.f32 %v1444_v30, %v1400_v19  ;;  %v1477_v25 = vpop.f32.mrf.mxu3  ;;  %v7465_v40 = vsub.f32 %v2325_v21, %v7457_v26 }
 0x31d   : > { %v7459_v34 = vadd.f32 %v1477_v25, %v1441_v24  ;;  %v7480_v24 = vand.u32 4294901760, %v2328_v18 }
 0x31f   : > { %9241 = vst [vmem:[#allocation32_spill] sm:$0xff] %v7459_v34  ;;  %v7496_v30 = vsub.f32 %v2328_v18, %v7480_v24 }
 0x320   : > { %v1710_v51 = vpop.f32.mrf.mxu0  ;;  %2355 = vmatmul.f32.vlgmr.msra.gmra.mxu2 %v7452_v17 }
 0x321   : > { %2232 = vmatmul.f32.gmra.mxu3 %v6821_v8  ;;  %2728 = vmatpush.msra.mxu2 %v7342_v53  ;;  %v1747_v19 = vpop.f32.mrf.mxu1  ;;  %v7478_v8 = vand.u32 4294901760, %v7465_v40  ;;  %v9245_v53 = vand.u32 4294901760, %v7358_v57  ;;  %v7512_v47 = vand.u32 4294901760, %v7496_v30 }
 0x323   : > { %2462 = vmatmul.f32.vlgmr.msra.gmra.mxu0 %v7423_v37  ;;  %2731 = vmatpush.msra.mxu2 %v7350_v60  ;;  %v1617_v39 = vpop.f32.mrf.mxu2  ;;  %v2369_v21 = vsub.f32 %v7465_v40, %v7478_v8  ;;  %v1576_v60 = vadd.f32 %v7370_v2, %v7368_v16 }
 0x324   : > { %2504 = vmatmul.f32.vlgmr.msra.gmra.mxu1 %v7432_v1  ;;  %2819 = vmatpush.msra.mxu0 %v9242_v55  ;;  %v1481_v10 = vpop.f32.mrf.mxu3 }
 0x325   : > { %2862 = vmatpush.msra.mxu1 %v7333_v23  ;;  %v7483_v15 = vadd.f32 %v1481_v10, %v1445_v28  ;;  %2734 = vmatpush.msra.mxu2 %v7358_v57  ;;  %v9246_v57 = vand.u32 4294901760, %v7365_v46  ;;  %v1618_v25 = vadd.f32 %v1617_v39, %v1576_v60  ;;  %v7509_v2 = vand.u32 4294901760, %v2369_v21 }
 0x326   : > { %2823 = vmatpush.msra.mxu0 %v9244_v41  ;;  %v2377_v39 = vsub.f32 %v7496_v30, %v7512_v47 }
 0x327   : > { %9243 = vst [vmem:[#allocation33_spill] sm:$0xff] %v7483_v15  ;;  %2864 = vmatpush.msra.mxu1 %v7338_v31  ;;  %2737 = vmatpush.msra.mxu2 %v7365_v46 }
 0x328   : > { %2827 = vmatpush.msra.mxu0 %v9245_v53  ;;  %v1714_v32 = vpop.f32.mrf.mxu0  ;;  %2363 = vmatmul.f32.gmra.mxu2 %v7475_v29 }
 0x329   : > { %2866 = vmatpush.msra.mxu1 %v7345_v3  ;;  %2420 = vmatmul.f32.vlgmr.msra.gmra.mxu3 %v7413_v59  ;;  %v1751_v28 = vpop.f32.mrf.mxu1 }
 0x32a   : > { %2772 = vmatpush.msra.mxu3 %v7333_v23  ;;  %2831 = vmatpush.msra.mxu0 %v9246_v57 }
 0x32b   : > { %2868 = vmatpush.msra.mxu1 %v7353_v42  ;;  %2467 = vmatmul.f32.gmra.mxu0 %v7444_v54  ;;  %v1622_v9 = vpop.f32.mrf.mxu2 }
 0x32c   : > { %2510 = vmatmul.f32.gmra.mxu1 %v7455_v33  ;;  %2774 = vmatpush.msra.mxu3 %v7338_v31  ;;  %v1659_v16 = vpop.f32.mrf.mxu3  ;;  %v1580_v31 = vadd.f32 %v7405_v11, %v7401_v45  ;;  %v7530_v45 = vand.u32 4294901760, %v6561_v48  ;;  %v1584_v11 = vadd.f32 %v7426_v49, %v7419_v50  ;;  %v7547_v50 = vand.u32 4294901760, %v9209_v38 }
 0x32d   : > { %v1660_v23 = vadd.f32 %v1659_v16, %v1618_v25  ;;  %v7538_v25 = vand.u32 4294901760, %v9210_v20 }
 0x32e   : > { %2776 = vmatpush.msra.mxu3 %v7345_v3  ;;  %v1623_v41 = vadd.f32 %v1622_v9, %v1580_v31 }
 0x32f   : > { %v1711_v46 = vadd.f32 %v1710_v51, %v1660_v23  ;;  %v7526_v51 = vand.u32 4294901760, %v2377_v39  ;;  %v7544_v23 = vsub.f32 %v6561_v48, %v7530_v45 }
 0x330   : > { %2778 = vmatpush.msra.mxu3 %v7353_v42  ;;  %v1718_v18 = vpop.f32.mrf.mxu0  ;;  %2371 = vmatmul.f32.gmra.mxu2 %v7509_v2 }
 0x331   : > { %2424 = vmatmul.f32.gmra.mxu3 %v7434_v5  ;;  %v1755_v55 = vpop.f32.mrf.mxu1  ;;  %v7522_v10 = vadd.f32 %v1747_v19, %v1711_v46  ;;  %v7554_v46 = vand.u32 4294901760, %v6741_v4  ;;  %v9164_v48 = vand.u32 4294901760, %v7544_v23 }
 0x333   : > { %9247 = vst [vmem:[#allocation34_spill] sm:$0xff] %v7522_v10  ;;  %2472 = vmatmul.f32.gmra.mxu0 %v7465_v40  ;;  %v1627_v3 = vpop.f32.mrf.mxu2  ;;  %v9251_v10 = vand.u32 4294901760, %v7544_v23 }
 0x334   : > { %2516 = vmatmul.f32.gmra.mxu1 %v7478_v8  ;;  %v1665_v42 = vpop.f32.mrf.mxu3  ;;  %v1628_v9 = vadd.f32 %v1627_v3, %v1584_v11  ;;  %v1588_v3 = vadd.f32 %v7447_v36, %v7438_v52  ;;  %v2954_v36 = vsub.f32 %v7544_v23, %v9164_v48  ;;  %v7609_v48 = vand.u32 4294901760, %v6776_v22 }
 0x335   : > { %v1666_v53 = vadd.f32 %v1665_v42, %v1623_v41  ;;  %v7559_v41 = vsub.f32 %v9209_v38, %v7547_v50 }
 0x337   : > { %v1715_v21 = vadd.f32 %v1714_v32, %v1666_v53 }
 0x338   : > { %v1722_v60 = vpop.f32.mrf.mxu0  ;;  %2379 = vmatmul.f32.gmra.mxu2 %v7526_v51 }
 0x339   : > { %2428 = vmatmul.f32.gmra.mxu3 %v7457_v26  ;;  %v1759_v19 = vpop.f32.mrf.mxu1  ;;  %v7535_v57 = vadd.f32 %v1751_v28, %v1715_v21  ;;  %v7551_v28 = vsub.f32 %v9210_v20, %v7538_v25 }
 0x33b   : > { %9248 = vst [vmem:[#allocation35_spill] sm:$0xff] %v7535_v57  ;;  %2477 = vmatmul.f32.gmra.mxu0 %v7496_v30  ;;  %v1632_v32 = vpop.f32.mrf.mxu2  ;;  %v9163_v53 = vand.u32 4294901760, %v7551_v28 }
 0x33c   : > { %2522 = vmatmul.f32.gmra.mxu1 %v7512_v47  ;;  %v1671_v16 = vpop.f32.mrf.mxu3  ;;  %v1633_v38 = vadd.f32 %v1632_v32, %v1588_v3 }
 0x33d   : > { %v1672_v49 = vadd.f32 %v1671_v16, %v1628_v9  ;;  %v2960_v11 = vsub.f32 %v7551_v28, %v9163_v53 }
 0x33f   : > { %v1719_v39 = vadd.f32 %v1718_v18, %v1672_v49  ;;  %v7570_v18 = vsub.f32 %v6741_v4, %v7554_v46  ;;  %v9161_v4 = vand.u32 4294901760, %v7559_v41  ;;  %v2955_v49 = vand.u32 4294901760, %v2954_v36 }
 0x340   : > { %v1895_v31 = vpop.f32.mrf.mxu0  ;;  %2555 = vmatmul.f32.vlgmr.msrb.gmra.mxu2 %v7413_v59 }
 0x341   : > { %2432 = vmatmul.f32.gmra.mxu3 %v7480_v24  ;;  %2899 = vmatpush.msrb.mxu2 %v7530_v45  ;;  %v1937_v20 = vpop.f32.mrf.mxu1  ;;  %v7566_v42 = vadd.f32 %v1755_v55, %v1719_v39  ;;  %v9162_v9 = vand.u32 4294901760, %v7570_v18  ;;  %v2966_v39 = vsub.f32 %v7559_v41, %v9161_v4 }
 0x343   : > { %9249 = vst [vmem:[#allocation36_spill] sm:$0xff] %v7566_v42  ;;  %2633 = vmatmul.f32.vlgmr.msrb.gmra.mxu0 %v7452_v17  ;;  %2901 = vmatpush.msrb.mxu2 %v7538_v25  ;;  %v1788_v21 = vpop.f32.mrf.mxu2  ;;  %v2967_v4 = vand.u32 4294901760, %v2966_v39  ;;  %v7618_v39 = vsub.f32 %v6776_v22, %v7609_v48 }
 0x344   : > { %2698 = vmatmul.f32.vlgmr.msrb.gmra.mxu1 %v7413_v59  ;;  %3006 = vmatpush.msrb.mxu0 %v7544_v23  ;;  %v1677_v52 = vpop.f32.mrf.mxu3 }
 0x345   : > { %3050 = vmatpush.msrb.mxu1 %v7530_v45  ;;  %v1678_v55 = vadd.f32 %v1677_v52, %v1633_v38  ;;  %2903 = vmatpush.msrb.mxu2 %v7547_v50  ;;  %v2961_v38 = vand.u32 4294901760, %v2960_v11  ;;  %v2972_v52 = vsub.f32 %v7570_v18, %v9162_v9 }
 0x346   : > { %3009 = vmatpush.msrb.mxu0 %v7551_v28 }
 0x347   : > { %v1723_v32 = vadd.f32 %v1722_v60, %v1678_v55  ;;  %3052 = vmatpush.msrb.mxu1 %v7538_v25  ;;  %2905 = vmatpush.msrb.mxu2 %v7554_v46 }
 0x348   : > { %3012 = vmatpush.msrb.mxu0 %v7559_v41  ;;  %v1900_v16 = vpop.f32.mrf.mxu0  ;;  %2559 = vmatmul.f32.gmra.mxu2 %v7434_v5 }
 0x349   : > { %3054 = vmatpush.msrb.mxu1 %v7547_v50  ;;  %2592 = vmatmul.f32.vlgmr.msrb.gmra.mxu3 %v7413_v59  ;;  %v1943_v3 = vpop.f32.mrf.mxu1  ;;  %v7597_v60 = vadd.f32 %v1759_v19, %v1723_v32  ;;  %v2973_v32 = vand.u32 4294901760, %v2972_v52  ;;  %v7621_v52 = vand.u32 4294901760, %v6844_v12 }
 0x34a   : > { %2956 = vmatpush.msrb.mxu3 %v2955_v49  ;;  %3015 = vmatpush.msrb.mxu0 %v7570_v18 }
 0x34b   : > { %9250 = vst [vmem:[#allocation37_spill] sm:$0xff] %v7597_v60  ;;  %3056 = vmatpush.msrb.mxu1 %v7554_v46  ;;  %2641 = vmatmul.f32.gmra.mxu0 %v7475_v29  ;;  %v1796_v36 = vpop.f32.mrf.mxu2  ;;  %v7634_v22 = vsub.f32 %v6844_v12, %v7621_v52 }
 0x34c   : > { %2702 = vmatmul.f32.gmra.mxu1 %v7434_v5  ;;  %2962 = vmatpush.msrb.mxu3 %v2961_v38  ;;  %v1853_v55 = vpop.f32.mrf.mxu3 }
 0x34d   : > { %v1854_v19 = vadd.f32 %v1853_v55, %v1788_v21  ;;  %v9253_v15 = vand.u32 4294901760, %v7634_v22 }
 0x34e   : > { %2968 = vmatpush.msrb.mxu3 %v2967_v4  ;;  %v7614_v4 = vand.u32 4294901760, %v9211_v43 }
 0x34f   : > { %v1896_v49 = vadd.f32 %v1895_v31, %v1854_v19 }
 0x350   : > { %2974 = vmatpush.msrb.mxu3 %v2973_v32  ;;  %v1905_v11 = vpop.f32.mrf.mxu0  ;;  %2563 = vmatmul.f32.gmra.mxu2 %v7457_v26  ;;  %v7626_v19 = vsub.f32 %v9211_v43, %v7614_v4  ;;  %v7629_v32 = vand.u32 4294901760, %v6840_v13 }
 0x351   : > { %2596 = vmatmul.f32.gmra.mxu3 %v7434_v5  ;;  %v1949_v9 = vpop.f32.mrf.mxu1  ;;  %v1938_v53 = vadd.f32 %v1937_v20, %v1896_v49 }
 0x352   : > { %v9166_v42 = vand.u32 4294901760, %v7626_v19 }
 0x353   : > { %2649 = vmatmul.f32.gmra.mxu0 %v7509_v2  ;;  %v1804_v38 = vpop.f32.mrf.mxu2 }
 0x354   : > { %2706 = vmatmul.f32.gmra.mxu1 %v7457_v26  ;;  %v1857_v21 = vpop.f32.mrf.mxu3 }
 0x355   : > { %v1858_v31 = vadd.f32 %v1857_v21, %v1796_v36  ;;  %v9165_v21 = vand.u32 4294901760, %v7618_v39 }
 0x357   : > { %v1901_v20 = vadd.f32 %v1900_v16, %v1858_v31  ;;  %v7641_v31 = vsub.f32 %v6840_v13, %v7629_v32  ;;  %v3232_v12 = vsub.f32 %v7618_v39, %v9165_v21 }
 0x358   : > { %v1910_v55 = vpop.f32.mrf.mxu0  ;;  %2567 = vmatmul.f32.gmra.mxu2 %v7480_v24 }
 0x359   : > { %2600 = vmatmul.f32.gmra.mxu3 %v7457_v26  ;;  %v1955_v36 = vpop.f32.mrf.mxu1  ;;  %v1944_v49 = vadd.f32 %v1943_v3, %v1901_v20  ;;  %v3233_v21 = vand.u32 4294901760, %v3232_v12 }
 0x35b   : > { %2657 = vmatmul.f32.gmra.mxu0 %v7526_v51  ;;  %v1812_v16 = vpop.f32.mrf.mxu2 }
 0x35c   : > { %2710 = vmatmul.f32.gmra.mxu1 %v7480_v24  ;;  %v1861_v43 = vpop.f32.mrf.mxu3 }
 0x35d   : > { %v1862_v60 = vadd.f32 %v1861_v43, %v1804_v38  ;;  %v9252_v43 = vand.u32 4294901760, %v7551_v28  ;;  %v9255_v28 = vand.u32 4294901760, %v7641_v31 }
 0x35f   : > { %v1906_v3 = vadd.f32 %v1905_v11, %v1862_v60  ;;  %v3238_v60 = vsub.f32 %v7626_v19, %v9166_v42  ;;  %v3250_v12 = vsub.f32 %v7641_v31, %v9255_v28 }
 0x360   : > { %v7648_v57 = vpop.f32.mrf.mxu0  ;;  %2740 = vmatmul.f32.vlgmr.msra.gmra.mxu2 %v7423_v37 }
 0x361   : > { %2604 = vmatmul.f32.gmra.mxu3 %v7480_v24  ;;  %3097 = vmatpush.msra.mxu2 %v9251_v10  ;;  %v7654_v13 = vpop.f32.mrf.mxu1  ;;  %v1950_v38 = vadd.f32 %v1949_v9, %v1906_v3  ;;  %v3244_v10 = vsub.f32 %v7634_v22, %v9253_v15  ;;  %v9254_v9 = vand.u32 4294901760, %v7559_v41  ;;  %v3239_v3 = vand.u32 4294901760, %v3238_v60 }
 0x362   : > { %v9256_v15 = vand.u32 4294901760, %v7570_v18  ;;  %v3251_v41 = vand.u32 4294901760, %v3250_v12  ;;  %v9257_v12 = vand.u32 4294901760, %v7618_v39 }
 0x363   : > { %2833 = vmatmul.f32.vlgmr.msra.gmra.mxu0 %v7413_v59  ;;  %3101 = vmatpush.msra.mxu2 %v9252_v43  ;;  %v1988_v20 = vpop.f32.mrf.mxu2  ;;  %v3245_v34 = vand.u32 4294901760, %v3244_v10 }
 0x364   : > { %2870 = vmatmul.f32.vlgmr.msra.gmra.mxu1 %v7413_v59  ;;  %3177 = vmatpush.msra.mxu0 %v7609_v48  ;;  %v1865_v23 = vpop.f32.mrf.mxu3  ;;  %v1989_v42 = vadd.f32 %v1988_v20, %v1938_v53 }
 0x365   : > { %3234 = vmatpush.msra.mxu1 %v3233_v21  ;;  %v1866_v11 = vadd.f32 %v1865_v23, %v1812_v16  ;;  %3105 = vmatpush.msra.mxu2 %v9254_v9 }
 0x366   : > { %3179 = vmatpush.msra.mxu0 %v7614_v4 }
 0x367   : > { %v1911_v43 = vadd.f32 %v1910_v55, %v1866_v11  ;;  %3240 = vmatpush.msra.mxu1 %v3239_v3  ;;  %3109 = vmatpush.msra.mxu2 %v9256_v15 }
 0x368   : > { %3181 = vmatpush.msra.mxu0 %v7621_v52  ;;  %v7677_v53 = vpop.f32.mrf.mxu0  ;;  %2745 = vmatmul.f32.gmra.mxu2 %v7444_v54 }
 0x369   : > { %3246 = vmatpush.msra.mxu1 %v3245_v34  ;;  %2782 = vmatmul.f32.vlgmr.msra.gmra.mxu3 %v7432_v1  ;;  %v7681_v16 = vpop.f32.mrf.mxu1  ;;  %v1956_v21 = vadd.f32 %v1955_v36, %v1911_v43 }
 0x36a   : > { %3140 = vmatpush.msra.mxu3 %v7530_v45  ;;  %3183 = vmatpush.msra.mxu0 %v7629_v32 }
 0x36b   : > { %3252 = vmatpush.msra.mxu1 %v3251_v41  ;;  %2837 = vmatmul.f32.gmra.mxu0 %v7434_v5  ;;  %v1992_v18 = vpop.f32.mrf.mxu2  ;;  %v9258_v41 = vand.u32 4294901760, %v7626_v19 }
 0x36c   : > { %2874 = vmatmul.f32.gmra.mxu1 %v7434_v5  ;;  %3142 = vmatpush.msra.mxu3 %v7538_v25  ;;  %v1993_v55 = vadd.f32 %v1992_v18, %v1944_v49  ;;  %v2025_v34 = vpop.f32.mrf.mxu3 }
 0x36d   : > { %v7688_v20 = vadd.f32 %v2025_v34, %v1989_v42 }
 0x36e   : > { %3144 = vmatpush.msra.mxu3 %v7547_v50 }
 0x370   : > { %3146 = vmatpush.msra.mxu3 %v7554_v46  ;;  %v7692_v36 = vpop.f32.mrf.mxu0  ;;  %2750 = vmatmul.f32.gmra.mxu2 %v7465_v40 }
 0x371   : > { %2788 = vmatmul.f32.gmra.mxu3 %v7455_v33  ;;  %v7696_v45 = vpop.f32.mrf.mxu1 }
 0x373   : > { %2841 = vmatmul.f32.gmra.mxu0 %v7457_v26  ;;  %v1996_v60 = vpop.f32.mrf.mxu2 }
 0x374   : > { %2878 = vmatmul.f32.gmra.mxu1 %v7457_v26  ;;  %v1997_v25 = vadd.f32 %v1996_v60, %v1950_v38  ;;  %v2029_v42 = vpop.f32.mrf.mxu3 }
 0x375   : > { %v7700_v49 = vadd.f32 %v2029_v42, %v1993_v55 }
 0x378   : > { %v7702_v50 = vpop.f32.mrf.mxu0  ;;  %2755 = vmatmul.f32.gmra.mxu2 %v7496_v30 }
 0x379   : > { %2794 = vmatmul.f32.gmra.mxu3 %v7478_v8  ;;  %v7706_v46 = vpop.f32.mrf.mxu1 }
 0x37b   : > { %2845 = vmatmul.f32.gmra.mxu0 %v7480_v24  ;;  %v2000_v11 = vpop.f32.mrf.mxu2 }
 0x37c   : > { %2882 = vmatmul.f32.gmra.mxu1 %v7480_v24  ;;  %v2001_v10 = vadd.f32 %v2000_v11, %v1956_v21  ;;  %v2033_v23 = vpop.f32.mrf.mxu3  ;;  %v9259_v21 = vand.u32 4294901760, %v7634_v22 }
 0x37d   : > { %v7710_v9 = vadd.f32 %v2033_v23, %v1997_v25 }
 0x380   : > { %v2266_v38 = vpop.f32.mrf.mxu0  ;;  %2911 = vmatmul.f32.vlgmr.msrb.gmra.mxu2 %v7452_v17 }
 0x381   : > { %2800 = vmatmul.f32.gmra.mxu3 %v7512_v47  ;;  %3284 = vmatpush.msrb.mxu2 %v7618_v39  ;;  %v2303_v3 = vpop.f32.mrf.mxu1  ;;  %v2132_v39 = vadd.f32 %v7654_v13, %v7648_v57 }
 0x383   : > { %3018 = vmatmul.f32.vlgmr.msrb.gmra.mxu0 %v7423_v37  ;;  %3287 = vmatpush.msrb.mxu2 %v7626_v19  ;;  %v2173_v28 = vpop.f32.mrf.mxu2  ;;  %v9260_v19 = vand.u32 4294901760, %v7641_v31 }
 0x384   : > { %3060 = vmatmul.f32.vlgmr.msrb.gmra.mxu1 %v7432_v1  ;;  %3375 = vmatpush.msrb.mxu0 %v9257_v12  ;;  %v2037_v43 = vpop.f32.mrf.mxu3  ;;  %v2174_v34 = vadd.f32 %v2173_v28, %v2132_v39  ;;  %v7766_v12 = vand.u32 4294901760, %v6881_v58 }
 0x385   : > { %3418 = vmatpush.msrb.mxu1 %v7609_v48  ;;  %v7721_v15 = vadd.f32 %v2037_v43, %v2001_v10  ;;  %3290 = vmatpush.msrb.mxu2 %v7634_v22 }
 0x386   : > { %3379 = vmatpush.msrb.mxu0 %v9258_v41  ;;  %v7782_v39 = vsub.f32 %v6881_v58, %v7766_v12 }
 0x387   : > { %3420 = vmatpush.msrb.mxu1 %v7614_v4  ;;  %3293 = vmatpush.msrb.mxu2 %v7641_v31  ;;  %v2136_v31 = vadd.f32 %v7681_v16, %v7677_v53  ;;  %v1020_v53 = vadd.f32 %v7154_v61, %v7162_v35  ;;  %v2140_v16 = vadd.f32 %v7696_v45, %v7692_v36  ;;  %v7775_v35 = vand.u32 4294901760, %v6888_v27 }
 0x388   : > { %3383 = vmatpush.msrb.mxu0 %v9259_v21  ;;  %v2270_v18 = vpop.f32.mrf.mxu0  ;;  %2919 = vmatmul.f32.gmra.mxu2 %v7475_v29 }
 0x389   : > { %3422 = vmatpush.msrb.mxu1 %v7621_v52  ;;  %2976 = vmatmul.f32.vlgmr.msrb.gmra.mxu3 %v7413_v59  ;;  %v2307_v55 = vpop.f32.mrf.mxu1  ;;  %v1062_v36 = vadd.f32 %v7201_v44, %v1020_v53  ;;  %v7796_v44 = vsub.f32 %v6888_v27, %v7775_v35  ;;  %v9169_v27 = vand.u32 4294901760, %v7782_v39  ;;  %v3746_v53 = vpop.permute.xlu2 %3745 }
 0x38a   : > { %3328 = vmatpush.msrb.mxu3 %v7609_v48  ;;  %3387 = vmatpush.msrb.mxu0 %v9260_v19  ;;  %v7787_v19 = vpop.permute.xlu1 %3757 }
 0x38b   : > { %3424 = vmatpush.msrb.mxu1 %v7629_v32  ;;  %3023 = vmatmul.f32.gmra.mxu0 %v7444_v54  ;;  %v2178_v22 = vpop.f32.mrf.mxu2 }
 0x38c   : > { %3066 = vmatmul.f32.gmra.mxu1 %v7455_v33  ;;  %3330 = vmatpush.msrb.mxu3 %v7614_v4  ;;  %v2215_v57 = vpop.f32.mrf.mxu3  ;;  %v2179_v11 = vadd.f32 %v2178_v22, %v2136_v31  ;;  %v9264_v31 = vld [vmem:[#allocation18_spill] sm:$0xff] }
 0x38d   : > { %v2216_v13 = vadd.f32 %v2215_v57, %v2174_v34  ;;  %v1104_v57 = vadd.f32 %v7213_v56, %v1062_v36 }
 0x38e   : > { %3332 = vmatpush.msrb.mxu3 %v7621_v52 }
 0x38f   : > { %v2267_v60 = vadd.f32 %v2266_v38, %v2216_v13  ;;  %v7754_v38 = vand.u32 4294901760, %v6770_v0  ;;  %v2144_v13 = vadd.f32 %v7706_v46, %v7702_v50 }
 0x390   : > { %3334 = vmatpush.msrb.mxu3 %v7629_v32  ;;  %v2274_v48 = vpop.f32.mrf.mxu0  ;;  %2927 = vmatmul.f32.gmra.mxu2 %v7509_v2 }
 0x391   : > { %2980 = vmatmul.f32.gmra.mxu3 %v7434_v5  ;;  %v2311_v25 = vpop.f32.mrf.mxu1  ;;  %v7748_v42 = vadd.f32 %v2303_v3, %v2267_v60  ;;  %v7772_v61 = vsub.f32 %v6770_v0, %v7754_v38  ;;  %v1024_v0 = vadd.f32 %v7178_v7, %v7181_v14 }
 0x393   : > { %9261 = vst [vmem:[#allocation38_spill] sm:$0xff] %v7748_v42  ;;  %3028 = vmatmul.f32.gmra.mxu0 %v7465_v40  ;;  %v2183_v4 = vpop.f32.mrf.mxu2  ;;  %v9170_v58 = vand.u32 4294901760, %v7772_v61 }
 0x394   : > { %3072 = vmatmul.f32.gmra.mxu1 %v7478_v8  ;;  %v2221_v52 = vpop.f32.mrf.mxu3  ;;  %v2184_v43 = vadd.f32 %v2183_v4, %v2140_v16 }
 0x395   : > { %v2222_v10 = vadd.f32 %v2221_v52, %v2179_v11  ;;  %v3510_v46 = vsub.f32 %v7772_v61, %v9170_v58  ;;  %v9265_v11 = vld [vmem:[#allocation22_spill] sm:$0xff] }
 0x396   : > { %v1067_v4 = vadd.f32 %v9265_v11, %v1024_v0 }
 0x397   : > { %v2271_v32 = vadd.f32 %v2270_v18, %v2222_v10  ;;  %v7778_v18 = vpop.permute.xlu0 %3755  ;;  %v3516_v10 = vsub.f32 %v7782_v39, %v9169_v27 }
 0x398   : > { %v2278_v23 = vpop.f32.mrf.mxu0  ;;  %2935 = vmatmul.f32.gmra.mxu2 %v7526_v51 }
 0x399   : > { %2984 = vmatmul.f32.gmra.mxu3 %v7457_v26  ;;  %v7761_v3 = vpop.f32.mrf.mxu1  ;;  %v7763_v28 = vadd.f32 %v2307_v55, %v2271_v32  ;;  %v7785_v55 = vand.u32 4294901760, %v6831_v63 }
 0x39b   : > { %9262 = vst [vmem:[#allocation39_spill] sm:$0xff] %v7763_v28  ;;  %3033 = vmatmul.f32.gmra.mxu0 %v7496_v30  ;;  %v2188_v41 = vpop.f32.mrf.mxu2  ;;  %v7810_v60 = vsub.f32 %v6831_v63, %v7785_v55  ;;  %v9168_v63 = vand.u32 4294901760, %v7796_v44  ;;  %v9282_v28 = vld [vmem:[#allocation27_spill] sm:$0xff] }
 0x39c   : > { %3078 = vmatmul.f32.gmra.mxu1 %v7512_v47  ;;  %v2227_v21 = vpop.f32.mrf.mxu3 }
 0x39d   : > { %v2228_v45 = vadd.f32 %v2227_v21, %v2184_v43  ;;  %v9167_v32 = vand.u32 4294901760, %v7810_v60  ;;  %v9267_v21 = vld [vmem:[#allocation13_spill] sm:$0xff]  ;;  %v3522_v0 = vsub.f32 %v7796_v44, %v9168_v63 }
 0x39f   : > { %v2275_v34 = vadd.f32 %v2274_v48, %v2228_v45  ;;  %v2189_v48 = vadd.f32 %v2188_v41, %v2144_v13  ;;  %v7832_v43 = vpop.permute.xlu0 %3747  ;;  %v9266_v41 = vld [vmem:[#allocation12_spill] sm:$0xff] }
 0x3a0   : > { %v7791_v22 = vpop.f32.mrf.mxu0  ;;  %3111 = vmatmul.f32.vlgmr.msra.gmra.mxu2 %v7413_v59  ;;  %v1028_v36 = vadd.f32 %v9267_v21, %v9266_v41 }
 0x3a1   : > { %2988 = vmatmul.f32.gmra.mxu3 %v7480_v24  ;;  %3455 = vmatpush.msra.mxu2 %v7754_v38  ;;  %v7804_v7 = vpop.f32.mrf.mxu1  ;;  %v7806_v14 = vadd.f32 %v2311_v25, %v2275_v34  ;;  %v1155_v25 = vadd.f32 %v9264_v31, %v1104_v57  ;;  %v3511_v34 = vand.u32 4294901760, %v3510_v46  ;;  %v9268_v57 = vld [vmem:[#allocation17_spill] sm:$0xff]  ;;  %v3517_v46 = vand.u32 4294901760, %v3516_v10 }
 0x3a3   : > { %9263 = vst [vmem:[#allocation40_spill] sm:$0xff] %v7806_v14  ;;  %3189 = vmatmul.f32.vlgmr.msra.gmra.mxu0 %v7452_v17  ;;  %3457 = vmatpush.msra.mxu2 %v7766_v12  ;;  %v2356_v56 = vpop.f32.mrf.mxu2  ;;  %v1192_v13 = vadd.f32 %v9268_v57, %v1155_v25 }
 0x3a4   : > { %3254 = vmatmul.f32.vlgmr.msra.gmra.mxu1 %v7413_v59  ;;  %3562 = vmatpush.msra.mxu0 %v7772_v61  ;;  %v2233_v50 = vpop.f32.mrf.mxu3 }
 0x3a5   : > { %3606 = vmatpush.msra.mxu1 %v7754_v38  ;;  %v2234_v52 = vadd.f32 %v2233_v50, %v2189_v48  ;;  %3459 = vmatpush.msra.mxu2 %v7775_v35  ;;  %v9269_v48 = vld [vmem:[#allocation25_spill] sm:$0xff]  ;;  %v2357_v41 = vadd.f32 %v2356_v56, %v1192_v13  ;;  %v3777_v56 = vsel %vm627_vm1, %v7778_v18, %v7787_v19  ;;  %v7870_v18 = vpop.permute.xlu2 %3737 }
 0x3a6   : > { %3565 = vmatpush.msra.mxu0 %v7782_v39  ;;  %v1110_v50 = vadd.f32 %v9269_v48, %v1067_v4  ;;  %v3773_v13 = vsel %vm627_vm1, %v3746_v53, %v7832_v43  ;;  %v7872_v53 = vand.u32 4294901760, %v3777_v56 }
 0x3a7   : > { %v2279_v16 = vadd.f32 %v2278_v23, %v2234_v52  ;;  %3608 = vmatpush.msra.mxu1 %v7766_v12  ;;  %3461 = vmatpush.msra.mxu2 %v7785_v55  ;;  %v3736_v23 = vpop.permute.xlu1 %3735  ;;  %v3528_v52 = vsub.f32 %v7810_v60, %v9167_v32 }
 0x3a8   : > { %3568 = vmatpush.msra.mxu0 %v7796_v44  ;;  %v2468_v45 = vpop.f32.mrf.mxu0  ;;  %3115 = vmatmul.f32.gmra.mxu2 %v7434_v5 }
 0x3a9   : > { %3610 = vmatpush.msra.mxu1 %v7775_v35  ;;  %3148 = vmatmul.f32.vlgmr.msra.gmra.mxu3 %v7413_v59  ;;  %v2511_v31 = vpop.f32.mrf.mxu1  ;;  %v7846_v11 = vadd.f32 %v7761_v3, %v2279_v16  ;;  %v3523_v3 = vand.u32 4294901760, %v3522_v0  ;;  %v9271_v16 = vld [vmem:[#allocation21_spill] sm:$0xff]  ;;  %v3529_v48 = vand.u32 4294901760, %v3528_v52  ;;  %v9273_v0 = vld [vmem:[#allocation15_spill] sm:$0xff] }
 0x3aa   : > { %3512 = vmatpush.msra.mxu3 %v3511_v34  ;;  %3571 = vmatpush.msra.mxu0 %v7810_v60  ;;  %v1159_v21 = vadd.f32 %v9271_v16, %v1110_v50  ;;  %v9272_v34 = vld [vmem:[#allocation26_spill] sm:$0xff]  ;;  %v9274_v50 = vld [vmem:[#allocation19_spill] sm:$0xff] }
 0x3ab   : > { %9270 = vst [vmem:[#allocation18_spill] sm:$0xff] %v7846_v11  ;;  %3612 = vmatpush.msra.mxu1 %v7785_v55  ;;  %3197 = vmatmul.f32.gmra.mxu0 %v7475_v29  ;;  %v2364_v25 = vpop.f32.mrf.mxu2  ;;  %v1072_v57 = vadd.f32 %v9272_v34, %v1028_v36  ;;  %v1032_v16 = vadd.f32 %v9274_v50, %v9273_v0  ;;  %v9275_v36 = vld [vmem:[#allocation20_spill] sm:$0xff]  ;;  %v3726_v34 = vpop.permute.xlu0 %3725  ;;  %v7877_v50 = vand.u32 4294901760, %v3773_v13 }
 0x3ac   : > { %3258 = vmatmul.f32.gmra.mxu1 %v7434_v5  ;;  %3518 = vmatpush.msra.mxu3 %v3517_v46  ;;  %v2421_v4 = vpop.f32.mrf.mxu3 }
 0x3ad   : > { %v2422_v10 = vadd.f32 %v2421_v4, %v2357_v41  ;;  %v1196_v41 = vadd.f32 %v9275_v36, %v1159_v21  ;;  %v9276_v4 = vld [vmem:[#allocation29_spill] sm:$0xff]  ;;  %v3769_v21 = vsel %vm627_vm1, %v3736_v23, %v7870_v18  ;;  %v9278_v36 = vld [vmem:[#allocation30_spill] sm:$0xff]  ;;  %v7892_v11 = vsub.f32 %v3773_v13, %v7877_v50 }
 0x3ae   : > { %3524 = vmatpush.msra.mxu3 %v3523_v3  ;;  %v1116_v52 = vadd.f32 %v9276_v4, %v1072_v57  ;;  %v1077_v4 = vadd.f32 %v9278_v36, %v1032_v16 }
 0x3af   : > { %v2464_v32 = vadd.f32 %v7791_v22, %v2422_v10  ;;  %v7874_v10 = vpop.permute.xlu1 %3727 }
 0x3b0   : > { %3530 = vmatpush.msra.mxu3 %v3529_v48  ;;  %v2473_v46 = vpop.f32.mrf.mxu0  ;;  %3119 = vmatmul.f32.gmra.mxu2 %v7457_v26  ;;  %v2365_v48 = vadd.f32 %v2364_v25, %v1196_v41  ;;  %v3765_v27 = vsel %vm627_vm1, %v3726_v34, %v7874_v10  ;;  %v7887_v25 = vsub.f32 %v3777_v56, %v7872_v53  ;;  %v7889_v41 = vand.u32 4294901760, %v3769_v21 }
 0x3b1   : > { %3152 = vmatmul.f32.gmra.mxu3 %v7434_v5  ;;  %v2517_v22 = vpop.f32.mrf.mxu1  ;;  %v2506_v3 = vadd.f32 %v7804_v7, %v2464_v32  ;;  %v9277_v7 = vld [vmem:[#allocation24_spill] sm:$0xff]  ;;  %v7895_v14 = vand.u32 4294901760, %v3765_v27 }
 0x3b2   : > { %v1163_v32 = vadd.f32 %v9277_v7, %v1116_v52  ;;  %v9279_v52 = vld [vmem:[#allocation23_spill] sm:$0xff]  ;;  %v3880_v7 = vand.u32 4294901760, %v7887_v25 }
 0x3b3   : > { %3205 = vmatmul.f32.gmra.mxu0 %v7509_v2  ;;  %v2372_v0 = vpop.f32.mrf.mxu2 }
 0x3b4   : > { %3262 = vmatmul.f32.gmra.mxu1 %v7457_v26  ;;  %v2425_v57 = vpop.f32.mrf.mxu3  ;;  %v1200_v16 = vadd.f32 %v9279_v52, %v1163_v32  ;;  %v7907_v32 = vsub.f32 %v3765_v27, %v7895_v14  ;;  %v9283_v27 = vand.u32 4294901760, %v7772_v61 }
 0x3b5   : > { %v2426_v63 = vadd.f32 %v2425_v57, %v2365_v48  ;;  %v9280_v48 = vld [vmem:[#allocation31_spill] sm:$0xff] }
 0x3b6   : > { %v1122_v57 = vadd.f32 %v9280_v48, %v1077_v4  ;;  %v9281_v4 = vld [vmem:[#allocation28_spill] sm:$0xff] }
 0x3b7   : > { %v2469_v58 = vadd.f32 %v2468_v45, %v2426_v63  ;;  %v7902_v63 = vsub.f32 %v3769_v21, %v7889_v41  ;;  %v2373_v45 = vadd.f32 %v2372_v0, %v1200_v16 }
 0x3b8   : > { %v2478_v23 = vpop.f32.mrf.mxu0  ;;  %3123 = vmatmul.f32.gmra.mxu2 %v7480_v24  ;;  %v1167_v52 = vadd.f32 %v9281_v4, %v1122_v57 }
 0x3b9   : > { %3156 = vmatmul.f32.gmra.mxu3 %v7457_v26  ;;  %v2523_v34 = vpop.f32.mrf.mxu1  ;;  %v2512_v56 = vadd.f32 %v2511_v31, %v2469_v58  ;;  %v9171_v58 = vand.u32 4294901760, %v7892_v11  ;;  %v3881_v31 = vsub.f32 %v7887_v25, %v3880_v7  ;;  %v3892_v0 = vand.u32 4294901760, %v7902_v63 }
 0x3ba   : > { %v1204_v42 = vadd.f32 %v9282_v28, %v1167_v52 }
 0x3bb   : > { %3213 = vmatmul.f32.gmra.mxu0 %v7526_v51  ;;  %v2380_v13 = vpop.f32.mrf.mxu2  ;;  %v3882_v28 = vand.u32 4294901760, %v3881_v31  ;;  %v3893_v61 = vsub.f32 %v7902_v63, %v3892_v0 }
 0x3bc   : > { %3266 = vmatmul.f32.gmra.mxu1 %v7480_v24  ;;  %v2429_v36 = vpop.f32.mrf.mxu3  ;;  %v2381_v4 = vadd.f32 %v2380_v13, %v1204_v42  ;;  %v9285_v42 = vand.u32 4294901760, %v7796_v44 }
 0x3bd   : > { %v2430_v48 = vadd.f32 %v2429_v36, %v2373_v45  ;;  %v3887_v45 = vsub.f32 %v7892_v11, %v9171_v58 }
 0x3bf   : > { %v2474_v21 = vadd.f32 %v2473_v46, %v2430_v48  ;;  %v3898_v46 = vand.u32 4294901760, %v7907_v32  ;;  %v9284_v48 = vand.u32 4294901760, %v7782_v39  ;;  %v3888_v13 = vand.u32 4294901760, %v3887_v45 }
 0x3c0   : > { %v7915_v16 = vpop.f32.mrf.mxu0  ;;  %3296 = vmatmul.f32.vlgmr.msrb.gmra.mxu2 %v7423_v37 }
 0x3c1   : > { %3160 = vmatmul.f32.gmra.mxu3 %v7480_v24  ;;  %3653 = vmatpush.msrb.mxu2 %v9283_v27  ;;  %v7922_v57 = vpop.f32.mrf.mxu1  ;;  %v2518_v36 = vadd.f32 %v2517_v22, %v2474_v21  ;;  %v3899_v39 = vsub.f32 %v7907_v32, %v3898_v46  ;;  %v9286_v21 = vand.u32 4294901760, %v7810_v60 }
 0x3c3   : > { %3389 = vmatmul.f32.vlgmr.msrb.gmra.mxu0 %v7413_v59  ;;  %3657 = vmatpush.msrb.mxu2 %v9284_v48  ;;  %v2556_v52 = vpop.f32.mrf.mxu2  ;;  %v3894_v48 = vand.u32 4294901760, %v3893_v61  ;;  %v3900_v44 = vand.u32 4294901760, %v3899_v39 }
 0x3c4   : > { %3426 = vmatmul.f32.vlgmr.msrb.gmra.mxu1 %v7413_v59  ;;  %3826 = vmatpush.msrb.mxu0 %v7872_v53  ;;  %v2433_v27 = vpop.f32.mrf.mxu3  ;;  %v2557_v58 = vadd.f32 %v2556_v52, %v2506_v3 }
 0x3c5   : > { %3883 = vmatpush.msrb.mxu1 %v3882_v28  ;;  %v2434_v22 = vadd.f32 %v2433_v27, %v2381_v4  ;;  %3661 = vmatpush.msrb.mxu2 %v9285_v42 }
 0x3c6   : > { %3828 = vmatpush.msrb.mxu0 %v7877_v50 }
 0x3c7   : > { %v2479_v31 = vadd.f32 %v2478_v23, %v2434_v22  ;;  %3889 = vmatpush.msrb.mxu1 %v3888_v13  ;;  %3665 = vmatpush.msrb.mxu2 %v9286_v21 }
 0x3c8   : > { %3830 = vmatpush.msrb.mxu0 %v7889_v41  ;;  %v2642_v3 = vpop.f32.mrf.mxu0  ;;  %3301 = vmatmul.f32.gmra.mxu2 %v7444_v54 }
 0x3c9   : > { %3895 = vmatpush.msrb.mxu1 %v3894_v48  ;;  %3338 = vmatmul.f32.vlgmr.msrb.gmra.mxu3 %v7432_v1  ;;  %v2703_v45 = vpop.f32.mrf.mxu1  ;;  %v2524_v4 = vadd.f32 %v2523_v34, %v2479_v31 }
 0x3ca   : > { %3696 = vmatpush.msrb.mxu3 %v7754_v38  ;;  %3832 = vmatpush.msrb.mxu0 %v7895_v14 }
 0x3cb   : > { %3901 = vmatpush.msrb.mxu1 %v3900_v44  ;;  %3393 = vmatmul.f32.gmra.mxu0 %v7434_v5  ;;  %v2560_v60 = vpop.f32.mrf.mxu2  ;;  %v9288_v44 = vld [vmem:[#allocation32_spill] sm:$0xff] }
 0x3cc   : > { %3430 = vmatmul.f32.gmra.mxu1 %v7434_v5  ;;  %3698 = vmatpush.msrb.mxu3 %v7766_v12  ;;  %v2561_v23 = vadd.f32 %v2560_v60, %v2512_v56  ;;  %v2593_v28 = vpop.f32.mrf.mxu3 }
 0x3cd   : > { %v7952_v52 = vadd.f32 %v2593_v28, %v2557_v58  ;;  %v8023_v28 = vpop.permute.xlu0 %3749 }
 0x3ce   : > { %3700 = vmatpush.msrb.mxu3 %v7775_v35 }
 0x3d0   : > { %3702 = vmatpush.msrb.mxu3 %v7785_v55  ;;  %v2650_v34 = vpop.f32.mrf.mxu0  ;;  %3306 = vmatmul.f32.gmra.mxu2 %v7465_v40 }
 0x3d1   : > { %3344 = vmatmul.f32.gmra.mxu3 %v7455_v33  ;;  %v7958_v38 = vpop.f32.mrf.mxu1 }
 0x3d3   : > { %3397 = vmatmul.f32.gmra.mxu0 %v7457_v26  ;;  %v2564_v61 = vpop.f32.mrf.mxu2 }
 0x3d4   : > { %3434 = vmatmul.f32.gmra.mxu1 %v7457_v26  ;;  %v2565_v12 = vadd.f32 %v2564_v61, %v2518_v36  ;;  %v2597_v56 = vpop.f32.mrf.mxu3  ;;  %v2635_v36 = vadd.f32 %v7915_v16, %v7415_v62 }
 0x3d5   : > { %v7962_v58 = vadd.f32 %v2597_v56, %v2561_v23 }
 0x3d6   : > { %v2700_v21 = vadd.f32 %v7922_v57, %v2635_v36  ;;  %v2643_v57 = vadd.f32 %v2642_v3, %v7436_v6 }
 0x3d8   : > { %v7964_v27 = vpop.f32.mrf.mxu0  ;;  %3311 = vmatmul.f32.gmra.mxu2 %v7496_v30  ;;  %v2704_v6 = vadd.f32 %v2703_v45, %v2643_v57  ;;  %v2651_v45 = vadd.f32 %v2650_v34, %v9288_v44 }
 0x3d9   : > { %3350 = vmatmul.f32.gmra.mxu3 %v7478_v8  ;;  %v7968_v35 = vpop.f32.mrf.mxu1 }
 0x3da   : > { %v2708_v60 = vadd.f32 %v7958_v38, %v2651_v45  ;;  %v8030_v38 = vpop.permute.xlu1 %3739 }
 0x3db   : > { %3401 = vmatmul.f32.gmra.mxu0 %v7480_v24  ;;  %v2568_v55 = vpop.f32.mrf.mxu2 }
 0x3dc   : > { %3438 = vmatmul.f32.gmra.mxu1 %v7480_v24  ;;  %v2569_v22 = vadd.f32 %v2568_v55, %v2524_v4  ;;  %v2601_v42 = vpop.f32.mrf.mxu3  ;;  %v3774_v55 = vsel %vm627_vm1, %v7832_v43, %v8023_v28  ;;  %v3723_v43 = vld [vmem:[#allocation3 + $0x50] sm:$0xff] }
 0x3dd   : > { %v7972_v13 = vadd.f32 %v2601_v42, %v2565_v12 }
 0x3e0   : > { %v2834_v39 = vpop.f32.mrf.mxu0  ;;  %3467 = vmatmul.f32.vlgmr.msra.gmra.mxu2 %v7452_v17 }
 0x3e1   : > { %3356 = vmatmul.f32.gmra.mxu3 %v7512_v47  ;;  %3933 = vmatpush.msra.mxu2 %v7887_v25  ;;  %v2871_v31 = vpop.f32.mrf.mxu1 }
 0x3e3   : > { %3574 = vmatmul.f32.vlgmr.msra.gmra.mxu0 %v7423_v37  ;;  %3936 = vmatpush.msra.mxu2 %v7892_v11  ;;  %v2741_v48 = vpop.f32.mrf.mxu2  ;;  %v9287_v37 = vand.u32 4294901760, %v7892_v11 }
 0x3e4   : > { %3616 = vmatmul.f32.vlgmr.msra.gmra.mxu1 %v7432_v1  ;;  %4024 = vmatpush.msra.mxu0 %v3880_v7  ;;  %v2605_v62 = vpop.f32.mrf.mxu3  ;;  %v2742_v16 = vadd.f32 %v2741_v48, %v2700_v21  ;;  %v3721_v7 = vld [vmem:[#allocation3 + $0x40] sm:$0xff]  ;;  %v8055_v48 = vand.u32 4294901760, %v3774_v55 }
 0x3e5   : > { %4067 = vmatpush.msra.mxu1 %v7872_v53  ;;  %v7986_v17 = vadd.f32 %v2605_v62, %v2569_v22  ;;  %3939 = vmatpush.msra.mxu2 %v7902_v63 }
 0x3e6   : > { %4028 = vmatpush.msra.mxu0 %v9287_v37 }
 0x3e7   : > { %4069 = vmatpush.msra.mxu1 %v7877_v50  ;;  %3942 = vmatpush.msra.mxu2 %v7907_v32 }
 0x3e8   : > { %4032 = vmatpush.msra.mxu0 %v3892_v0  ;;  %v2838_v1 = vpop.f32.mrf.mxu0  ;;  %3475 = vmatmul.f32.gmra.mxu2 %v7475_v29  ;;  %v3802_v0 = vsel %vm915_vm14, %v3721_v7, 0 }
 0x3e9   : > { %4071 = vmatpush.msra.mxu1 %v7889_v41  ;;  %3532 = vmatmul.f32.vlgmr.msra.gmra.mxu3 %v7413_v59  ;;  %v2875_v25 = vpop.f32.mrf.mxu1  ;;  %v8009_v32 = vand.u32 4294901760, %v3802_v0 }
 0x3ea   : > { %3977 = vmatpush.msra.mxu3 %v7872_v53  ;;  %4036 = vmatpush.msra.mxu0 %v3898_v46  ;;  %v8011_v46 = vpop.permute.xlu2 %3759 }
 0x3eb   : > { %4073 = vmatpush.msra.mxu1 %v7895_v14  ;;  %3579 = vmatmul.f32.gmra.mxu0 %v7444_v54  ;;  %v2746_v11 = vpop.f32.mrf.mxu2  ;;  %v8021_v23 = vsub.f32 %v3802_v0, %v8009_v32  ;;  %v3778_v61 = vsel %vm627_vm1, %v7787_v19, %v8011_v46  ;;  %v3770_v19 = vsel %vm627_vm1, %v7870_v18, %v8030_v38 }
 0x3ec   : > { %3622 = vmatmul.f32.gmra.mxu1 %v7455_v33  ;;  %3979 = vmatpush.msra.mxu3 %v7877_v50  ;;  %v2747_v29 = vadd.f32 %v2746_v11, %v2704_v6  ;;  %v2783_v63 = vpop.f32.mrf.mxu3  ;;  %v3722_v50 = vld [vmem:[#allocation3 + $0x48] sm:$0xff]  ;;  %v8042_v36 = vand.u32 4294901760, %v3778_v61  ;;  %v8077_v6 = vsub.f32 %v3774_v55, %v8055_v48 }
 0x3ed   : > { %v2784_v3 = vadd.f32 %v2783_v63, %v2742_v16  ;;  %v3805_v34 = vsel %vm915_vm14, %v3722_v50, 0 }
 0x3ee   : > { %3981 = vmatpush.msra.mxu3 %v7889_v41  ;;  %v8040_v42 = vand.u32 4294901760, %v3805_v34  ;;  %v8068_v37 = vsub.f32 %v3778_v61, %v8042_v36  ;;  %v9293_v61 = vld [vmem:[#allocation34_spill] sm:$0xff] }
 0x3ef   : > { %v2835_v53 = vadd.f32 %v2834_v39, %v2784_v3 }
 0x3f0   : > { %3983 = vmatpush.msra.mxu3 %v7895_v14  ;;  %v2842_v54 = vpop.f32.mrf.mxu0  ;;  %3483 = vmatmul.f32.gmra.mxu2 %v7509_v2  ;;  %v8065_v57 = vsub.f32 %v3805_v34, %v8040_v42 }
 0x3f1   : > { %3536 = vmatmul.f32.gmra.mxu3 %v7434_v5  ;;  %v2879_v33 = vpop.f32.mrf.mxu1  ;;  %v8016_v4 = vadd.f32 %v2871_v31, %v2835_v53  ;;  %v3724_v53 = vld [vmem:[#allocation3 + $0x58] sm:$0xff] }
 0x3f2   : > { %v8053_v21 = vpop.permute.xlu2 %3729  ;;  %v8082_v63 = vand.u32 4294901760, %v8065_v57 }
 0x3f3   : > { %9289 = vst [vmem:[#allocation22_spill] sm:$0xff] %v8016_v4  ;;  %3584 = vmatmul.f32.gmra.mxu0 %v7465_v40  ;;  %v2751_v41 = vpop.f32.mrf.mxu2  ;;  %v9290_v40 = vld [vmem:[#allocation33_spill] sm:$0xff] }
 0x3f4   : > { %3628 = vmatmul.f32.gmra.mxu1 %v7478_v8  ;;  %v2752_v14 = vadd.f32 %v2751_v41, %v2708_v60  ;;  %v2789_v2 = vpop.f32.mrf.mxu3  ;;  %v2659_v56 = vadd.f32 %v7964_v27, %v9290_v40  ;;  %v8038_v8 = vand.u32 4294901760, %v8021_v23  ;;  %v9174_v60 = vand.u32 4294901760, %v8077_v6 }
 0x3f5   : > { %v2790_v12 = vadd.f32 %v2789_v2, %v2747_v29 }
 0x3f6   : > { %v2712_v62 = vadd.f32 %v7968_v35, %v2659_v56  ;;  %v3836_v16 = vsub.f32 %v8021_v23, %v8038_v8  ;;  %v3811_v56 = vsel %vm915_vm14, %v3724_v53, 0 }
 0x3f7   : > { %v2839_v22 = vadd.f32 %v2838_v1, %v2790_v12  ;;  %v8070_v1 = vand.u32 4294901760, %v3770_v19 }
 0x3f8   : > { %v2846_v39 = vpop.f32.mrf.mxu0  ;;  %3491 = vmatmul.f32.gmra.mxu2 %v7526_v51  ;;  %v3766_v51 = vsel %vm627_vm1, %v7874_v10, %v8053_v21  ;;  %v3808_v10 = vsel %vm915_vm14, %v3723_v43, 0  ;;  %v8079_v29 = vand.u32 4294901760, %v3836_v16 }
 0x3f9   : > { %3540 = vmatmul.f32.gmra.mxu3 %v7457_v26  ;;  %v8049_v27 = vpop.f32.mrf.mxu1  ;;  %v8051_v31 = vadd.f32 %v2875_v25, %v2839_v22  ;;  %v8084_v0 = vand.u32 4294901760, %v3808_v10  ;;  %v8088_v3 = vsub.f32 %v3770_v19, %v8070_v1  ;;  %v4165_v22 = vsub.f32 %v8077_v6, %v9174_v60 }
 0x3fb   : > { %9291 = vst [vmem:[#allocation12_spill] sm:$0xff] %v8051_v31  ;;  %3589 = vmatmul.f32.gmra.mxu0 %v7496_v30  ;;  %v2756_v18 = vpop.f32.mrf.mxu2  ;;  %v8074_v30 = vand.u32 4294901760, %v3766_v51  ;;  %v8106_v2 = vsub.f32 %v3808_v10, %v8084_v0  ;;  %v9173_v40 = vand.u32 4294901760, %v8088_v3 }
 0x3fc   : > { %3634 = vmatmul.f32.gmra.mxu1 %v7512_v47  ;;  %v2757_v35 = vadd.f32 %v2756_v18, %v2712_v62  ;;  %v2795_v25 = vpop.f32.mrf.mxu3  ;;  %v9175_v47 = vand.u32 4294901760, %v8068_v37  ;;  %v8130_v18 = vand.u32 4294901760, %v3811_v56 }
 0x3fd   : > { %v2796_v7 = vadd.f32 %v2795_v25, %v2752_v14  ;;  %v8098_v50 = vsub.f32 %v3766_v51, %v8074_v30  ;;  %v3844_v14 = vsub.f32 %v8065_v57, %v8082_v63  ;;  %v8128_v51 = vand.u32 4294901760, %v8106_v2  ;;  %v8137_v25 = vpop.permute.xlu0 %3761 }
 0x3ff   : > { %v2843_v11 = vadd.f32 %v2842_v54, %v2796_v7  ;;  %v9172_v19 = vand.u32 4294901760, %v8098_v50  ;;  %v8125_v62 = vand.u32 4294901760, %v3844_v14  ;;  %v8153_v14 = vsub.f32 %v3811_v56, %v8130_v18 }
 0x400   : > { %v3019_v44 = vpop.f32.mrf.mxu0  ;;  %3667 = vmatmul.f32.vlgmr.msrb.gmra.mxu2 %v7413_v59  ;;  %v3779_v56 = vsel %vm627_vm1, %v8011_v46, %v8137_v25 }
 0x401   : > { %3544 = vmatmul.f32.gmra.mxu3 %v7480_v24  ;;  %4104 = vmatpush.msrb.mxu2 %v8042_v36  ;;  %v8093_v45 = vpop.f32.mrf.mxu1  ;;  %v8095_v54 = vadd.f32 %v2879_v33, %v2843_v11  ;;  %v4159_v33 = vsub.f32 %v8068_v37, %v9175_v47  ;;  %v4166_v11 = vand.u32 4294901760, %v4165_v22  ;;  %v4177_v53 = vsub.f32 %v8098_v50, %v9172_v19 }
 0x403   : > { %9292 = vst [vmem:[#allocation13_spill] sm:$0xff] %v8095_v54  ;;  %3838 = vmatmul.f32.vlgmr.msrb.gmra.mxu0 %v8079_v29  ;;  %4106 = vmatpush.msrb.mxu2 %v8055_v48  ;;  %v2912_v41 = vpop.f32.mrf.mxu2  ;;  %v4178_v22 = vand.u32 4294901760, %v4177_v53  ;;  %v8170_v53 = vpop.permute.xlu2 %3741 }
 0x404   : > { %3903 = vmatmul.f32.vlgmr.msrb.gmra.mxu1 %v8009_v32  ;;  %4211 = vmatpush.msrb.mxu0 %v8068_v37  ;;  %v2801_v34 = vpop.f32.mrf.mxu3  ;;  %v2913_v12 = vadd.f32 %v2912_v41, %v9293_v61 }
 0x405   : > { %4255 = vmatpush.msrb.mxu1 %v8042_v36  ;;  %v2802_v55 = vadd.f32 %v2801_v34, %v2757_v35  ;;  %4108 = vmatpush.msrb.mxu2 %v8070_v1  ;;  %v4160_v35 = vand.u32 4294901760, %v4159_v33 }
 0x406   : > { %4214 = vmatpush.msrb.mxu0 %v8077_v6 }
 0x407   : > { %v2847_v43 = vadd.f32 %v2846_v39, %v2802_v55  ;;  %4257 = vmatpush.msrb.mxu1 %v8055_v48  ;;  %4110 = vmatpush.msrb.mxu2 %v8074_v30  ;;  %v4171_v39 = vsub.f32 %v8088_v3, %v9173_v40  ;;  %v8162_v40 = vand.u32 4294901760, %v8153_v14 }
 0x408   : > { %4217 = vmatpush.msrb.mxu0 %v8088_v3  ;;  %v3024_v16 = vpop.f32.mrf.mxu0  ;;  %3671 = vmatmul.f32.gmra.mxu2 %v7434_v5 }
 0x409   : > { %4259 = vmatpush.msrb.mxu1 %v8070_v1  ;;  %3704 = vmatmul.f32.vlgmr.msrb.gmra.mxu3 %v7413_v59  ;;  %v3067_v10 = vpop.f32.mrf.mxu1  ;;  %v8142_v7 = vadd.f32 %v8049_v27, %v2847_v43  ;;  %v3852_v59 = vsub.f32 %v8106_v2, %v8128_v51  ;;  %v9295_v27 = vld [vmem:[#allocation35_spill] sm:$0xff]  ;;  %v4172_v61 = vand.u32 4294901760, %v4171_v39  ;;  %v8157_v43 = vpop.permute.xlu1 %3751 }
 0x40a   : > { %4161 = vmatpush.msrb.mxu3 %v4160_v35  ;;  %4220 = vmatpush.msrb.mxu0 %v8098_v50 }
 0x40b   : > { %9294 = vst [vmem:[#allocation17_spill] sm:$0xff] %v8142_v7  ;;  %4261 = vmatpush.msrb.mxu1 %v8074_v30  ;;  %3846 = vmatmul.f32.gmra.mxu0 %v8125_v62  ;;  %v2920_v41 = vpop.f32.mrf.mxu2  ;;  %v8159_v19 = vand.u32 4294901760, %v3852_v59  ;;  %v8177_v59 = vpop.permute.xlu0 %3731 }
 0x40c   : > { %3907 = vmatmul.f32.gmra.mxu1 %v8040_v42  ;;  %4167 = vmatpush.msrb.mxu3 %v4166_v11  ;;  %v2921_v33 = vadd.f32 %v2920_v41, %v9295_v27  ;;  %v2977_v34 = vpop.f32.mrf.mxu3  ;;  %v8175_v41 = vand.u32 4294901760, %v3779_v56  ;;  %v3860_v27 = vsub.f32 %v8153_v14, %v8162_v40 }
 0x40d   : > { %v2978_v55 = vadd.f32 %v2977_v34, %v2913_v12 }
 0x40e   : > { %4173 = vmatpush.msrb.mxu3 %v4172_v61  ;;  %v8195_v60 = vsub.f32 %v3779_v56, %v8175_v41  ;;  %v8197_v7 = vand.u32 4294901760, %v3860_v27  ;;  %v9297_v27 = vld [vmem:[#allocation37_spill] sm:$0xff] }
 0x40f   : > { %v3020_v35 = vadd.f32 %v3019_v44, %v2978_v55  ;;  %v3775_v44 = vsel %vm627_vm1, %v8023_v28, %v8157_v43 }
 0x410   : > { %4179 = vmatpush.msrb.mxu3 %v4178_v22  ;;  %v3029_v11 = vpop.f32.mrf.mxu0  ;;  %3675 = vmatmul.f32.gmra.mxu2 %v7457_v26  ;;  %v8187_v28 = vand.u32 4294901760, %v3775_v44  ;;  %v3767_v22 = vsel %vm627_vm1, %v8053_v21, %v8177_v59  ;;  %v9176_v56 = vand.u32 4294901760, %v8195_v60 }
 0x411   : > { %3708 = vmatmul.f32.gmra.mxu3 %v7434_v5  ;;  %v3073_v12 = vpop.f32.mrf.mxu1  ;;  %v3062_v39 = vadd.f32 %v8093_v45, %v3020_v35  ;;  %v3771_v5 = vsel %vm627_vm1, %v8030_v38, %v8170_v53  ;;  %v9296_v45 = vld [vmem:[#allocation36_spill] sm:$0xff] }
 0x412   : > { %v8192_v35 = vand.u32 4294901760, %v3771_v5 }
 0x413   : > { %3854 = vmatmul.f32.gmra.mxu0 %v8159_v19  ;;  %v2928_v46 = vpop.f32.mrf.mxu2 }
 0x414   : > { %3911 = vmatmul.f32.gmra.mxu1 %v8084_v0  ;;  %v2929_v34 = vadd.f32 %v2928_v46, %v9296_v45  ;;  %v2981_v61 = vpop.f32.mrf.mxu3  ;;  %v8201_v46 = vsub.f32 %v3775_v44, %v8187_v28  ;;  %v8203_v45 = vand.u32 4294901760, %v3767_v22 }
 0x415   : > { %v2982_v55 = vadd.f32 %v2981_v61, %v2921_v33  ;;  %v8207_v61 = vsub.f32 %v3771_v5, %v8192_v35 }
 0x416   : > { %v8214_v54 = vsub.f32 %v3767_v22, %v8203_v45 }
 0x417   : > { %v3025_v47 = vadd.f32 %v3024_v16, %v2982_v55  ;;  %v9178_v4 = vand.u32 4294901760, %v8207_v61 }
 0x418   : > { %v3034_v38 = vpop.f32.mrf.mxu0  ;;  %3679 = vmatmul.f32.gmra.mxu2 %v7480_v24 }
 0x419   : > { %3712 = vmatmul.f32.gmra.mxu3 %v7457_v26  ;;  %v3079_v33 = vpop.f32.mrf.mxu1  ;;  %v3068_v21 = vadd.f32 %v3067_v10, %v3025_v47  ;;  %v9177_v26 = vand.u32 4294901760, %v8201_v46  ;;  %v5224_v47 = vld [vmem:[%s9133_s4 + $0x8] sm:$0xff]  ;;  %v4437_v10 = vsub.f32 %v8195_v60, %v9176_v56 }
 0x41a   : > { %5234 = vperm.xlu0 %5955, %v5224_v47  }
 0x41b   : > { %3862 = vmatmul.f32.gmra.mxu0 %v8197_v7  ;;  %v2936_v16 = vpop.f32.mrf.mxu2  ;;  %v4438_v47 = vand.u32 4294901760, %v4437_v10 }
 0x41c   : > { %3915 = vmatmul.f32.gmra.mxu1 %v8130_v18  ;;  %v2937_v55 = vadd.f32 %v2936_v16, %v9297_v27  ;;  %v2985_v44 = vpop.f32.mrf.mxu3  ;;  %v4443_v27 = vsub.f32 %v8201_v46, %v9177_v26 }
 0x41d   : > { %v2986_v31 = vadd.f32 %v2985_v44, %v2929_v34  ;;  %v9298_v34 = vand.u32 4294901760, %v8068_v37  ;;  %v4454_v44 = vand.u32 4294901760, %v8214_v54 }
 0x41f   : > { %v3030_v5 = vadd.f32 %v3029_v11, %v2986_v31  ;;  %v9299_v11 = vand.u32 4294901760, %v8077_v6  ;;  %v4455_v6 = vsub.f32 %v8214_v54, %v4454_v44 }
 0x420   : > { %v8224_v16 = vpop.f32.mrf.mxu0  ;;  %3945 = vmatmul.f32.vlgmr.msra.gmra.mxu2 %v8021_v23 }
 0x421   : > { %3716 = vmatmul.f32.gmra.mxu3 %v7480_v24  ;;  %4302 = vmatpush.msra.mxu2 %v9298_v34  ;;  %v8230_v22 = vpop.f32.mrf.mxu1  ;;  %v3074_v31 = vadd.f32 %v3073_v12, %v3030_v5  ;;  %v4449_v24 = vsub.f32 %v8207_v61, %v9178_v4  ;;  %v9300_v12 = vand.u32 4294901760, %v8088_v3  ;;  %v4444_v5 = vand.u32 4294901760, %v4443_v27 }
 0x422   : > { %v4456_v3 = vand.u32 4294901760, %v4455_v6  ;;  %v9302_v6 = vmov 2  }
 0x423   : > { %4038 = vmatmul.f32.vlgmr.msra.gmra.mxu0 %v8009_v32  ;;  %4306 = vmatpush.msra.mxu2 %v9299_v11  ;;  %v3112_v56 = vpop.f32.mrf.mxu2  ;;  %v9301_v11 = vand.u32 4294901760, %v8098_v50  ;;  %v4450_v4 = vand.u32 4294901760, %v4449_v24  ;;  %v5337_v50 = vld [vmem:[%s9134_s5] sm:$0xff] }
 0x424   : > { %4075 = vmatmul.f32.vlgmr.msra.gmra.mxu1 %v8009_v32  ;;  %4382 = vmatpush.msra.mxu0 %v8175_v41  ;;  %v2989_v37 = vpop.f32.mrf.mxu3  ;;  %v3113_v34 = vadd.f32 %v3112_v56, %v3062_v39 }
 0x425   : > { %4439 = vmatpush.msra.mxu1 %v4438_v47  ;;  %v2990_v26 = vadd.f32 %v2989_v37, %v2937_v55  ;;  %4310 = vmatpush.msra.mxu2 %v9300_v12 }
 0x426   : > { %4384 = vmatpush.msra.mxu0 %v8187_v28  ;;  %5378 = vperm.xlu1 %5951, %v5337_v50  }
 0x427   : > { %v3035_v10 = vadd.f32 %v3034_v38, %v2990_v26  ;;  %4445 = vmatpush.msra.mxu1 %v4444_v5  ;;  %4314 = vmatpush.msra.mxu2 %v9301_v11  ;;  %v5957_v11 = vld [vmem:[%s9134_s5 + $0x10] sm:$0xff] }
 0x428   : > { %4386 = vmatpush.msra.mxu0 %v8192_v35  ;;  %v8253_v39 = vpop.f32.mrf.mxu0  ;;  %3950 = vmatmul.f32.gmra.mxu2 %v8065_v57 }
 0x429   : > { %4451 = vmatpush.msra.mxu1 %v4450_v4  ;;  %3987 = vmatmul.f32.vlgmr.msra.gmra.mxu3 %v8038_v8  ;;  %v8257_v56 = vpop.f32.mrf.mxu1  ;;  %v3080_v55 = vadd.f32 %v3079_v33, %v3035_v10  ;;  %v3191_v10 = vadd.f32 %v8224_v16, %v7688_v20  ;;  %v9303_v16 = vand.u32 4294901760, %v8195_v60 }
 0x42a   : > { %4345 = vmatpush.msra.mxu3 %v8042_v36  ;;  %4388 = vmatpush.msra.mxu0 %v8203_v45 }
 0x42b   : > { %4457 = vmatpush.msra.mxu1 %v4456_v3  ;;  %4042 = vmatmul.f32.gmra.mxu0 %v8040_v42  ;;  %v3116_v38 = vpop.f32.mrf.mxu2 }
 0x42c   : > { %4079 = vmatmul.f32.gmra.mxu1 %v8040_v42  ;;  %4347 = vmatpush.msra.mxu3 %v8055_v48  ;;  %v3117_v4 = vadd.f32 %v3116_v38, %v3068_v21  ;;  %v3149_v26 = vpop.f32.mrf.mxu3  ;;  %v5340_v48 = vld [vmem:[%s9134_s5 + $0x18] sm:$0xff] }
 0x42d   : > { %v8267_v27 = vadd.f32 %v3149_v26, %v3113_v34  ;;  %5343 = vperm.xlu0 %5955, %v5337_v50   ;;  %5522 = vperm.xlu2 %5953, %v5337_v50   ;;  %v3256_v50 = vadd.f32 %v8230_v22, %v3191_v10  ;;  %v3199_v22 = vadd.f32 %v8253_v39, %v7700_v49  ;;  %v8350_v10 = vpop.permute.xlu0 %3743 }
 0x42e   : > { %4349 = vmatpush.msra.mxu3 %v8070_v1  ;;  %5390 = vperm.xlu1 %5951, %v5340_v48  }
 0x42f   : > { %v3260_v49 = vadd.f32 %v8257_v56, %v3199_v22 }
 0x430   : > { %4351 = vmatpush.msra.mxu3 %v8074_v30  ;;  %v8271_v36 = vpop.f32.mrf.mxu0  ;;  %3955 = vmatmul.f32.gmra.mxu2 %v8106_v2 }
 0x431   : > { %3993 = vmatmul.f32.gmra.mxu3 %v8082_v63  ;;  %v8275_v33 = vpop.f32.mrf.mxu1 }
 0x433   : > { %4046 = vmatmul.f32.gmra.mxu0 %v8084_v0  ;;  %v3120_v21 = vpop.f32.mrf.mxu2 }
 0x434   : > { %4083 = vmatmul.f32.gmra.mxu1 %v8084_v0  ;;  %v3121_v1 = vadd.f32 %v3120_v21, %v3074_v31  ;;  %v3153_v47 = vpop.f32.mrf.mxu3 }
 0x435   : > { %v8282_v30 = vadd.f32 %v3153_v47, %v3117_v4  ;;  %5358 = vperm.xlu0 %5955, %v5340_v48   ;;  %5534 = vperm.xlu2 %5953, %v5340_v48   ;;  %v9304_v48 = vand.u32 4294901760, %v8201_v46 }
 0x436   : > { %5956 = vset.pattern.permute.xlu1 %v9302_v6  ;;  %v8348_v6 = vpop.permute.xlu2 %3753 }
 0x437   : > { %5530 = vperm.xlu1 %5956, %v5957_v11  }
 0x438   : > { %v8284_v24 = vpop.f32.mrf.mxu0  ;;  %3960 = vmatmul.f32.gmra.mxu2 %v8153_v14 }
 0x439   : > { %3999 = vmatmul.f32.gmra.mxu3 %v8128_v51  ;;  %v8288_v37 = vpop.f32.mrf.mxu1  ;;  %v3215_v11 = vadd.f32 %v8284_v24, %v7721_v15 }
 0x43b   : > { %4050 = vmatmul.f32.gmra.mxu0 %v8130_v18  ;;  %v3124_v34 = vpop.f32.mrf.mxu2 }
 0x43c   : > { %4087 = vmatmul.f32.gmra.mxu1 %v8130_v18  ;;  %v3125_v31 = vadd.f32 %v3124_v34, %v3080_v55  ;;  %v3157_v12 = vpop.f32.mrf.mxu3  ;;  %v8332_v34 = vpop.permute.xlu1 %3763 }
 0x43d   : > { %v8292_v5 = vadd.f32 %v3157_v12, %v3121_v1 }
 0x440   : > { %4116 = vmatmul.f32.vlgmr.msrb.gmra.mxu2 %v8079_v29  ;;  %v3390_v3 = vpop.f32.mrf.mxu0 }
 0x441   : > { %4005 = vmatmul.f32.gmra.mxu3 %v8162_v40  ;;  %4489 = vmatpush.msrb.mxu2 %v8195_v60  ;;  %v3427_v55 = vpop.f32.mrf.mxu1  ;;  %v9305_v60 = vand.u32 4294901760, %v8207_v61 }
 0x443   : > { %4223 = vmatmul.f32.vlgmr.msrb.gmra.mxu0 %v8021_v23  ;;  %4492 = vmatpush.msrb.mxu2 %v8201_v46  ;;  %v3297_v20 = vpop.f32.mrf.mxu2 }
 0x444   : > { %4265 = vmatmul.f32.vlgmr.msrb.gmra.mxu1 %v8038_v8  ;;  %4580 = vmatpush.msrb.mxu0 %v9303_v16  ;;  %v3161_v38 = vpop.f32.mrf.mxu3  ;;  %v3298_v4 = vadd.f32 %v3297_v20, %v3256_v50  ;;  %v8359_v50 = vpop.permute.xlu1 %3733  ;;  %v3772_v20 = vsel %vm627_vm1, %v8170_v53, %v8350_v10 }
 0x445   : > { %4623 = vmatpush.msrb.mxu1 %v8175_v41  ;;  %v8310_v26 = vadd.f32 %v3161_v38, %v3125_v31  ;;  %4495 = vmatpush.msrb.mxu2 %v8207_v61  ;;  %v3768_v38 = vsel %vm627_vm1, %v8177_v59, %v8359_v50  ;;  %v8378_v53 = vand.u32 4294901760, %v3772_v20 }
 0x446   : > { %4584 = vmatpush.msrb.mxu0 %v9304_v48 }
 0x447   : > { %4625 = vmatpush.msrb.mxu1 %v8187_v28  ;;  %4498 = vmatpush.msrb.mxu2 %v8214_v54 }
 0x448   : > { %4588 = vmatpush.msrb.mxu0 %v9305_v60  ;;  %4124 = vmatmul.f32.gmra.mxu2 %v8125_v62  ;;  %v3394_v21 = vpop.f32.mrf.mxu0 }
 0x449   : > { %4627 = vmatpush.msrb.mxu1 %v8192_v35  ;;  %4181 = vmatmul.f32.vlgmr.msrb.gmra.mxu3 %v8009_v32  ;;  %v3431_v1 = vpop.f32.mrf.mxu1 }
 0x44a   : > { %4533 = vmatpush.msrb.mxu3 %v8175_v41  ;;  %4592 = vmatpush.msrb.mxu0 %v4454_v44  ;;  %v3207_v41 = vadd.f32 %v8271_v36, %v7710_v9 }
 0x44b   : > { %4629 = vmatpush.msrb.mxu1 %v8203_v45  ;;  %4228 = vmatmul.f32.gmra.mxu0 %v8065_v57  ;;  %v3302_v46 = vpop.f32.mrf.mxu2 }
 0x44c   : > { %4271 = vmatmul.f32.gmra.mxu1 %v8082_v63  ;;  %4535 = vmatpush.msrb.mxu3 %v8187_v28  ;;  %v3303_v61 = vadd.f32 %v3302_v46, %v3260_v49  ;;  %v3339_v39 = vpop.f32.mrf.mxu3  ;;  %v3264_v31 = vadd.f32 %v8275_v33, %v3207_v41  ;;  %v3776_v33 = vsel %vm627_vm1, %v8157_v43, %v8348_v6 }
 0x44d   : > { %v3340_v47 = vadd.f32 %v3339_v39, %v3298_v4  ;;  %v8368_v24 = vand.u32 4294901760, %v3776_v33  ;;  %v3268_v43 = vadd.f32 %v8288_v37, %v3215_v11  ;;  %v8384_v37 = vand.u32 4294901760, %v3768_v38 }
 0x44e   : > { %4537 = vmatpush.msrb.mxu3 %v8192_v35  ;;  %v8389_v46 = vsub.f32 %v3772_v20, %v8378_v53 }
 0x44f   : > { %v3391_v54 = vadd.f32 %v3390_v3, %v3340_v47  ;;  %v8396_v41 = vsub.f32 %v3768_v38, %v8384_v37 }
 0x450   : > { %4539 = vmatpush.msrb.mxu3 %v8203_v45  ;;  %4132 = vmatmul.f32.gmra.mxu2 %v8159_v19  ;;  %v3398_v44 = vpop.f32.mrf.mxu0  ;;  %v3780_v45 = vsel %vm627_vm1, %v8137_v25, %v8332_v34 }
 0x451   : > { %v8339_v56 = vadd.f32 %v3427_v55, %v3391_v54  ;;  %4185 = vmatmul.f32.gmra.mxu3 %v8040_v42  ;;  %v3435_v28 = vpop.f32.mrf.mxu1  ;;  %v8357_v55 = vand.u32 4294901760, %v3780_v45  ;;  %v9179_v11 = vand.u32 4294901760, %v8396_v41 }
 0x453   : > { %4233 = vmatmul.f32.gmra.mxu0 %v8106_v2  ;;  %v3307_v12 = vpop.f32.mrf.mxu2  ;;  %v8376_v22 = vsub.f32 %v3780_v45, %v8357_v55 }
 0x454   : > { %4277 = vmatmul.f32.gmra.mxu1 %v8128_v51  ;;  %v3308_v9 = vadd.f32 %v3307_v12, %v3264_v31  ;;  %v3345_v35 = vpop.f32.mrf.mxu3  ;;  %v9306_v31 = vld [vmem:[#allocation38_spill] sm:$0xff] }
 0x455   : > { %v3346_v36 = vadd.f32 %v3345_v35, %v3303_v61  ;;  %v4714_v59 = vand.u32 4294901760, %v8376_v22  ;;  %v9180_v35 = vand.u32 4294901760, %v8389_v46 }
 0x457   : > { %v3395_v3 = vadd.f32 %v3394_v21, %v3346_v36  ;;  %v4727_v20 = vsub.f32 %v8389_v46, %v9180_v35 }
 0x458   : > { %4140 = vmatmul.f32.gmra.mxu2 %v8197_v7  ;;  %v3402_v25 = vpop.f32.mrf.mxu0 }
 0x459   : > { %v8365_v16 = vadd.f32 %v3431_v1, %v3395_v3  ;;  %4189 = vmatmul.f32.gmra.mxu3 %v8084_v0  ;;  %v3439_v15 = vpop.f32.mrf.mxu1  ;;  %v8382_v1 = vsub.f32 %v3776_v33, %v8368_v24 }
 0x45b   : > { %4238 = vmatmul.f32.gmra.mxu0 %v8153_v14  ;;  %v3312_v4 = vpop.f32.mrf.mxu2  ;;  %v9181_v54 = vand.u32 4294901760, %v8382_v1 }
 0x45c   : > { %4283 = vmatmul.f32.gmra.mxu1 %v8162_v40  ;;  %v3313_v48 = vadd.f32 %v3312_v4, %v3268_v43  ;;  %v3351_v60 = vpop.f32.mrf.mxu3 }
 0x45d   : > { %v3352_v21 = vadd.f32 %v3351_v60, %v3308_v9  ;;  %v4715_v9 = vsub.f32 %v8376_v22, %v4714_v59  ;;  %v4721_v36 = vsub.f32 %v8382_v1, %v9181_v54 }
 0x45f   : > { %v3399_v49 = vadd.f32 %v3398_v44, %v3352_v21  ;;  %v4716_v3 = vand.u32 4294901760, %v4715_v9 }
 0x460   : > { %4316 = vmatmul.f32.vlgmr.msra.gmra.mxu2 %v8009_v32  ;;  %v3575_v61 = vpop.f32.mrf.mxu0 }
 0x461   : > { %v8391_v39 = vadd.f32 %v3435_v28, %v3399_v49  ;;  %4193 = vmatmul.f32.gmra.mxu3 %v8130_v18  ;;  %4660 = vmatpush.msra.mxu2 %v8357_v55  ;;  %v3617_v47 = vpop.f32.mrf.mxu1 }
 0x463   : > { %4394 = vmatmul.f32.vlgmr.msra.gmra.mxu0 %v8079_v29  ;;  %4662 = vmatpush.msra.mxu2 %v8368_v24  ;;  %v3468_v44 = vpop.f32.mrf.mxu2 }
 0x464   : > { %4459 = vmatmul.f32.vlgmr.msra.gmra.mxu1 %v8009_v32  ;;  %4767 = vmatpush.msra.mxu0 %v8376_v22  ;;  %v3357_v28 = vpop.f32.mrf.mxu3  ;;  %v3469_v12 = vadd.f32 %v3468_v44, %v9306_v31  ;;  %v4728_v44 = vand.u32 4294901760, %v4727_v20 }
 0x465   : > { %4811 = vmatpush.msra.mxu1 %v8357_v55  ;;  %v3358_v45 = vadd.f32 %v3357_v28, %v3313_v48  ;;  %4664 = vmatpush.msra.mxu2 %v8378_v53  ;;  %v4733_v48 = vsub.f32 %v8396_v41, %v9179_v11 }
 0x466   : > { %4770 = vmatpush.msra.mxu0 %v8382_v1 }
 0x467   : > { %4813 = vmatpush.msra.mxu1 %v8368_v24  ;;  %v3403_v33 = vadd.f32 %v3402_v25, %v3358_v45  ;;  %4666 = vmatpush.msra.mxu2 %v8384_v37  ;;  %v4722_v25 = vand.u32 4294901760, %v4721_v36  ;;  %v4734_v31 = vand.u32 4294901760, %v4733_v48 }
 0x468   : > { %4773 = vmatpush.msra.mxu0 %v8389_v46  ;;  %4320 = vmatmul.f32.gmra.mxu2 %v8040_v42  ;;  %v3580_v43 = vpop.f32.mrf.mxu0 }
 0x469   : > { %4815 = vmatpush.msra.mxu1 %v8378_v53  ;;  %v8423_v38 = vadd.f32 %v3439_v15, %v3403_v33  ;;  %4353 = vmatmul.f32.vlgmr.msra.gmra.mxu3 %v8009_v32  ;;  %v3623_v4 = vpop.f32.mrf.mxu1  ;;  %v9307_v15 = vld [vmem:[#allocation39_spill] sm:$0xff] }
 0x46a   : > { %4717 = vmatpush.msra.mxu3 %v4716_v3  ;;  %4776 = vmatpush.msra.mxu0 %v8396_v41  ;;  %v8437_v3 = vand.u32 4294901760, %v8332_v34 }
 0x46b   : > { %4817 = vmatpush.msra.mxu1 %v8384_v37  ;;  %4402 = vmatmul.f32.gmra.mxu0 %v8125_v62  ;;  %v3476_v60 = vpop.f32.mrf.mxu2 }
 0x46c   : > { %4463 = vmatmul.f32.gmra.mxu1 %v8040_v42  ;;  %4723 = vmatpush.msra.mxu3 %v4722_v25  ;;  %v3477_v21 = vadd.f32 %v3476_v60, %v9307_v15  ;;  %v3533_v49 = vpop.f32.mrf.mxu3  ;;  %v8450_v15 = vand.u32 4294901760, %v8350_v10 }
 0x46d   : > { %v3534_v28 = vadd.f32 %v3533_v49, %v3469_v12  ;;  %v9308_v12 = vld [vmem:[#allocation40_spill] sm:$0xff] }
 0x46e   : > { %4729 = vmatpush.msra.mxu3 %v4728_v44 }
 0x46f   : > { %v3576_v9 = vadd.f32 %v3575_v61, %v3534_v28  ;;  %v8443_v61 = vand.u32 4294901760, %v8348_v6 }
 0x470   : > { %4735 = vmatpush.msra.mxu3 %v4734_v31  ;;  %4324 = vmatmul.f32.gmra.mxu2 %v8084_v0  ;;  %v3585_v45 = vpop.f32.mrf.mxu0  ;;  %v8458_v31 = vand.u32 4294901760, %v8359_v50 }
 0x471   : > { %v3618_v36 = vadd.f32 %v3617_v47, %v3576_v9  ;;  %4357 = vmatmul.f32.gmra.mxu3 %v8040_v42  ;;  %v3629_v33 = vpop.f32.mrf.mxu1  ;;  %v8447_v47 = vsub.f32 %v8332_v34, %v8437_v3  ;;  %v8455_v28 = vsub.f32 %v8348_v6, %v8443_v61  ;;  %v9309_v6 = vld [vmem:[#allocation18_spill] sm:$0xff] }
 0x473   : > { %4410 = vmatmul.f32.gmra.mxu0 %v8159_v19  ;;  %v3484_v25 = vpop.f32.mrf.mxu2  ;;  %v9183_v34 = vand.u32 4294901760, %v8447_v47 }
 0x474   : > { %4467 = vmatmul.f32.gmra.mxu1 %v8084_v0  ;;  %v3485_v20 = vadd.f32 %v3484_v25, %v9308_v12  ;;  %v3537_v48 = vpop.f32.mrf.mxu3  ;;  %v8464_v25 = vsub.f32 %v8350_v10, %v8450_v15 }
 0x475   : > { %v3538_v60 = vadd.f32 %v3537_v48, %v3477_v21  ;;  %v4993_v10 = vsub.f32 %v8447_v47, %v9183_v34 }
 0x476   : > { %v9184_v35 = vand.u32 4294901760, %v8464_v25 }
 0x477   : > { %v3581_v49 = vadd.f32 %v3580_v43, %v3538_v60 }
 0x478   : > { %4328 = vmatmul.f32.gmra.mxu2 %v8130_v18  ;;  %v3590_v44 = vpop.f32.mrf.mxu0  ;;  %v5005_v22 = vsub.f32 %v8464_v25, %v9184_v35 }
 0x479   : > { %v3624_v9 = vadd.f32 %v3623_v4, %v3581_v49  ;;  %4361 = vmatmul.f32.gmra.mxu3 %v8084_v0  ;;  %v3635_v21 = vpop.f32.mrf.mxu1  ;;  %v8471_v4 = vsub.f32 %v8359_v50, %v8458_v31  ;;  %v9182_v49 = vand.u32 4294901760, %v8455_v28 }
 0x47a   : > { %v5006_v35 = vand.u32 4294901760, %v5005_v22 }
 0x47b   : > { %4418 = vmatmul.f32.gmra.mxu0 %v8197_v7  ;;  %v3492_v43 = vpop.f32.mrf.mxu2  ;;  %v4999_v50 = vsub.f32 %v8455_v28, %v9182_v49  ;;  %v9311_v49 = vand.u32 4294901760, %v8389_v46 }
 0x47c   : > { %4471 = vmatmul.f32.gmra.mxu1 %v8130_v18  ;;  %v3493_v12 = vadd.f32 %v3492_v43, %v9309_v6  ;;  %v3541_v48 = vpop.f32.mrf.mxu3  ;;  %v9310_v6 = vand.u32 4294901760, %v8382_v1 }
 0x47d   : > { %v3542_v60 = vadd.f32 %v3541_v48, %v3485_v20  ;;  %v4994_v48 = vand.u32 4294901760, %v4993_v10  ;;  %v5000_v34 = vand.u32 4294901760, %v4999_v50 }
 0x47f   : > { %v3586_v11 = vadd.f32 %v3585_v45, %v3542_v60  ;;  %v5010_v45 = vand.u32 4294901760, %v8471_v4 }
 0x480   : > { %4501 = vmatmul.f32.vlgmr.msrb.gmra.mxu2 %v8021_v23  ;;  %v8479_v54 = vpop.f32.mrf.mxu0 }
 0x481   : > { %v3630_v43 = vadd.f32 %v3629_v33, %v3586_v11  ;;  %4365 = vmatmul.f32.gmra.mxu3 %v8130_v18  ;;  %4858 = vmatpush.msrb.mxu2 %v4714_v59  ;;  %v8488_v20 = vpop.f32.mrf.mxu1  ;;  %v5011_v1 = vsub.f32 %v8471_v4, %v5010_v45 }
 0x483   : > { %4594 = vmatmul.f32.vlgmr.msrb.gmra.mxu0 %v8009_v32  ;;  %4862 = vmatpush.msrb.mxu2 %v9310_v6  ;;  %v3668_v11 = vpop.f32.mrf.mxu2  ;;  %v9312_v6 = vand.u32 4294901760, %v8396_v41 }
 0x484   : > { %4631 = vmatmul.f32.vlgmr.msrb.gmra.mxu1 %v8009_v32  ;;  %4938 = vmatpush.msrb.mxu0 %v8437_v3  ;;  %v3545_v59 = vpop.f32.mrf.mxu3  ;;  %v3669_v33 = vadd.f32 %v3668_v11, %v3618_v36 }
 0x485   : > { %4995 = vmatpush.msrb.mxu1 %v4994_v48  ;;  %v3546_v60 = vadd.f32 %v3545_v59, %v3493_v12  ;;  %4866 = vmatpush.msrb.mxu2 %v9311_v49  ;;  %v5012_v12 = vand.u32 4294901760, %v5011_v1 }
 0x486   : > { %4940 = vmatpush.msrb.mxu0 %v8443_v61 }
 0x487   : > { %5001 = vmatpush.msrb.mxu1 %v5000_v34  ;;  %v3591_v10 = vadd.f32 %v3590_v44, %v3546_v60  ;;  %4870 = vmatpush.msrb.mxu2 %v9312_v6  ;;  %v8525_v34 = vpop.permute.xlu2 %5229 }
 0x488   : > { %4942 = vmatpush.msrb.mxu0 %v8450_v15  ;;  %4506 = vmatmul.f32.gmra.mxu2 %v8065_v57  ;;  %v8508_v36 = vpop.f32.mrf.mxu0 }
 0x489   : > { %5007 = vmatpush.msrb.mxu1 %v5006_v35  ;;  %v3636_v46 = vadd.f32 %v3635_v21, %v3591_v10  ;;  %4543 = vmatmul.f32.vlgmr.msrb.gmra.mxu3 %v8038_v8  ;;  %v8511_v49 = vpop.f32.mrf.mxu1  ;;  %v8547_v10 = vpop.permute.xlu1 %5239 }
 0x48a   : > { %4901 = vmatpush.msrb.mxu3 %v8357_v55  ;;  %4944 = vmatpush.msrb.mxu0 %v8458_v31 }
 0x48b   : > { %5013 = vmatpush.msrb.mxu1 %v5012_v12  ;;  %4598 = vmatmul.f32.gmra.mxu0 %v8040_v42  ;;  %v3672_v41 = vpop.f32.mrf.mxu2 }
 0x48c   : > { %4635 = vmatmul.f32.gmra.mxu1 %v8040_v42  ;;  %4903 = vmatpush.msrb.mxu3 %v8368_v24  ;;  %v3673_v44 = vadd.f32 %v3672_v41, %v3624_v9  ;;  %v3705_v35 = vpop.f32.mrf.mxu3 }
 0x48d   : > { %v8518_v21 = vadd.f32 %v3705_v35, %v3669_v33 }
 0x48e   : > { %4905 = vmatpush.msrb.mxu3 %v8378_v53 }
 0x48f   : > { %v8540_v22 = vpop.permute.xlu2 %5244 }
 0x490   : > { %4907 = vmatpush.msrb.mxu3 %v8384_v37  ;;  %4511 = vmatmul.f32.gmra.mxu2 %v8106_v2  ;;  %v8523_v55 = vpop.f32.mrf.mxu0 }
 0x491   : > { %4549 = vmatmul.f32.gmra.mxu3 %v8082_v63  ;;  %v8528_v50 = vpop.f32.mrf.mxu1 }
 0x493   : > { %4602 = vmatmul.f32.gmra.mxu0 %v8084_v0  ;;  %v3676_v24 = vpop.f32.mrf.mxu2 }
 0x494   : > { %4639 = vmatmul.f32.gmra.mxu1 %v8084_v0  ;;  %v3677_v9 = vadd.f32 %v3676_v24, %v3630_v43  ;;  %v3709_v48 = vpop.f32.mrf.mxu3  ;;  %v9317_v24 = vand.u32 4294901760, %v8455_v28 }
 0x495   : > { %v8532_v53 = vadd.f32 %v3709_v48, %v3673_v44  ;;  %v3905_v48 = vadd.f32 %v8488_v20, %v8479_v54 }
 0x497   : > { %9313 = vst [vmem:[#allocation25_spill] sm:$0xff] %v8532_v53  ;;  %v8556_v44 = vpop.permute.xlu2 %5353 }
 0x498   : > { %4516 = vmatmul.f32.gmra.mxu2 %v8153_v14  ;;  %v8535_v37 = vpop.f32.mrf.mxu0 }
 0x499   : > { %4555 = vmatmul.f32.gmra.mxu3 %v8128_v51  ;;  %v8538_v11 = vpop.f32.mrf.mxu1 }
 0x49b   : > { %4606 = vmatmul.f32.gmra.mxu0 %v8130_v18  ;;  %v3680_v59 = vpop.f32.mrf.mxu2 }
 0x49c   : > { %4643 = vmatmul.f32.gmra.mxu1 %v8130_v18  ;;  %v3681_v33 = vadd.f32 %v3680_v59, %v3636_v46  ;;  %v3713_v43 = vpop.f32.mrf.mxu3  ;;  %v9315_v46 = vand.u32 4294901760, %v8447_v47 }
 0x49d   : > { %v8544_v60 = vadd.f32 %v3713_v43, %v3677_v9  ;;  %v9318_v9 = vand.u32 4294901760, %v8464_v25 }
 0x49f   : > { %9314 = vst [vmem:[#allocation21_spill] sm:$0xff] %v8544_v60  ;;  %v9323_v60 = vld [vmem:[#allocation10_spill] sm:$0xff] }
 0x4a0   : > { %4672 = vmatmul.f32.vlgmr.msra.gmra.mxu2 %v8079_v29  ;;  %v4039_v1 = vpop.f32.mrf.mxu0 }
 0x4a1   : > { %4561 = vmatmul.f32.gmra.mxu3 %v8162_v40  ;;  %5045 = vmatpush.msra.mxu2 %v8447_v47  ;;  %v4076_v6 = vpop.f32.mrf.mxu1 }
 0x4a3   : > { %4779 = vmatmul.f32.vlgmr.msra.gmra.mxu0 %v8021_v23  ;;  %5048 = vmatpush.msra.mxu2 %v8455_v28  ;;  %v3946_v12 = vpop.f32.mrf.mxu2  ;;  %v8573_v28 = vpop.permute.xlu0 %5386 }
 0x4a4   : > { %4821 = vmatmul.f32.vlgmr.msra.gmra.mxu1 %v8038_v8  ;;  %5136 = vmatpush.msra.mxu0 %v9315_v46  ;;  %v3717_v41 = vpop.f32.mrf.mxu3  ;;  %v8584_v46 = vpop.permute.xlu2 %5382 }
 0x4a5   : > { %5179 = vmatpush.msra.mxu1 %v8437_v3  ;;  %v8559_v35 = vadd.f32 %v3717_v41, %v3681_v33  ;;  %5051 = vmatpush.msra.mxu2 %v8464_v25  ;;  %v8578_v25 = vpop.permute.xlu1 %5348  ;;  %v3947_v33 = vadd.f32 %v3946_v12, %v3905_v48  ;;  %v3909_v41 = vadd.f32 %v8511_v49, %v8508_v36 }
 0x4a6   : > { %5140 = vmatpush.msra.mxu0 %v9317_v24 }
 0x4a7   : > { %9316 = vst [vmem:[#allocation26_spill] sm:$0xff] %v8559_v35  ;;  %5181 = vmatpush.msra.mxu1 %v8443_v61  ;;  %5054 = vmatpush.msra.mxu2 %v8471_v4  ;;  %v9319_v4 = vld [vmem:[#allocation9_spill] sm:$0xff] }
 0x4a8   : > { %5144 = vmatpush.msra.mxu0 %v9318_v9  ;;  %4680 = vmatmul.f32.gmra.mxu2 %v8125_v62  ;;  %v4043_v47 = vpop.f32.mrf.mxu0 }
 0x4a9   : > { %5183 = vmatpush.msra.mxu1 %v8450_v15  ;;  %4737 = vmatmul.f32.vlgmr.msra.gmra.mxu3 %v8009_v32  ;;  %v4080_v59 = vpop.f32.mrf.mxu1 }
 0x4aa   : > { %5089 = vmatpush.msra.mxu3 %v8437_v3  ;;  %5148 = vmatpush.msra.mxu0 %v5010_v45  ;;  %v5850_v45 = vadd.s32 4294967295, %v9319_v4 }
 0x4ab   : > { %5185 = vmatpush.msra.mxu1 %v8458_v31  ;;  %v3951_v43 = vpop.f32.mrf.mxu2  ;;  %4784 = vmatmul.f32.gmra.mxu0 %v8065_v57  ;;  %v8593_v9 = vpop.permute.xlu0 %5526 }
 0x4ac   : > { %5091 = vmatpush.msra.mxu3 %v8443_v61  ;;  %v3988_v54 = vpop.f32.mrf.mxu3  ;;  %4827 = vmatmul.f32.gmra.mxu1 %v8082_v63  ;;  %v3952_v48 = vadd.f32 %v3951_v43, %v3909_v41  ;;  %vm5292_vm4 = vcmp.ge.s32.totalorder %v5850_v45, 0  ;;  %vm5297_vm5 = vcmp.lt.s32.totalorder %v5850_v45, 1024 }
 0x4ad   : > { %v3989_v20 = vadd.f32 %v3988_v54, %v3947_v33  ;;  %v8596_v33 = vpop.permute.xlu1 %5378  ;;  %vm8601_vm6 = vmand %vm5292_vm4, %vm5297_vm5  ;;  %vm5723_vm5 = vcmask 1041408  }
 0x4ae   : > { %5093 = vmatpush.msra.mxu3 %v8450_v15 }
 0x4af   : > { %v4040_v3 = vadd.f32 %v4039_v1, %v3989_v20 }
 0x4b0   : > { %5095 = vmatpush.msra.mxu3 %v8458_v31  ;;  %4688 = vmatmul.f32.gmra.mxu2 %v8159_v19  ;;  %v4047_v12 = vpop.f32.mrf.mxu0 }
 0x4b1   : > { %v4077_v61 = vadd.f32 %v4076_v6, %v4040_v3  ;;  %4741 = vmatmul.f32.gmra.mxu3 %v8040_v42  ;;  %v4084_v24 = vpop.f32.mrf.mxu1  ;;  %v3913_v3 = vadd.f32 %v8528_v50, %v8523_v55 }
 0x4b3   : > { %v5203_v15 = vadd.f32 %v4077_v61, %v7952_v52  ;;  %v3956_v1 = vpop.f32.mrf.mxu2  ;;  %4789 = vmatmul.f32.gmra.mxu0 %v8106_v2  ;;  %v8605_v52 = vpop.permute.xlu2 %5522 }
 0x4b4   : > { %v3994_v31 = vpop.f32.mrf.mxu3  ;;  %4833 = vmatmul.f32.gmra.mxu1 %v8128_v51  ;;  %v8621_v55 = vpop.permute.xlu0 %5234 }
 0x4b5   : > { %v5247_v36 = vadd.f32 %v8525_v34, %v5203_v15  ;;  %v3995_v49 = vadd.f32 %v3994_v31, %v3952_v48  ;;  %v3957_v48 = vadd.f32 %v3956_v1, %v3913_v3 }
 0x4b7   : > { %v5267_v43 = vmax.f32 %v5247_v36, 0.0  ;;  %v4044_v54 = vadd.f32 %v4043_v47, %v3995_v49  ;;  %v8626_v49 = vpop.permute.xlu1 %5390 }
 0x4b8   : > { %4696 = vmatmul.f32.gmra.mxu2 %v8197_v7  ;;  %v4051_v20 = vpop.f32.mrf.mxu0 }
 0x4b9   : > { %v4081_v4 = vadd.f32 %v4080_v59, %v4044_v54  ;;  %4745 = vmatmul.f32.gmra.mxu3 %v8084_v0  ;;  %v8613_v45 = vsel %vm8601_vm6, %v5267_v43, 0.0  ;;  %v4088_v41 = vpop.f32.mrf.mxu1  ;;  %v3917_v54 = vadd.f32 %v8538_v11, %v8535_v37 }
 0x4ba   : > { %v5537_v61 = vmul.f32 %v8605_v52, %v8613_v45  ;;  %v5393_v47 = vmul.f32 %v8596_v33, %v8613_v45 }
 0x4bb   : > { %v5208_v15 = vadd.f32 %v4081_v4, %v7962_v58  ;;  %v3961_v31 = vpop.f32.mrf.mxu2  ;;  %4794 = vmatmul.f32.gmra.mxu0 %v8153_v14 }
 0x4bc   : > { %v4000_v50 = vpop.f32.mrf.mxu3  ;;  %5577 = vrot.lane.b32.xlu0 %v5537_v61, %s6079_s9  ;;  %5433 = vrot.lane.b32.xlu2 %v5393_v47, %s6078_s6 }
 0x4bd   : > { %v5252_v59 = vadd.f32 %v8621_v55, %v5208_v15  ;;  %v4001_v36 = vadd.f32 %v4000_v50, %v3957_v48  ;;  %4839 = vmatmul.f32.gmra.mxu1 %v8162_v40  ;;  %v3962_v48 = vadd.f32 %v3961_v31, %v3917_v54 }
 0x4bf   : > { %v5272_v1 = vmax.f32 %v5252_v59, 0.0  ;;  %v4048_v43 = vadd.f32 %v4047_v12, %v4001_v36 }
 0x4c0   : > { %4872 = vmatmul.f32.vlgmr.msrb.gmra.mxu2 %v8009_v32  ;;  %v8630_v58 = vpop.f32.mrf.mxu0 }
 0x4c1   : > { %v4085_v3 = vadd.f32 %v4084_v24, %v4048_v43  ;;  %4749 = vmatmul.f32.gmra.mxu3 %v8130_v18  ;;  %v8637_v4 = vsel %vm8601_vm6, %v5272_v1, 0.0  ;;  %v8639_v61 = vpop.f32.mrf.mxu1  ;;  %v8651_v1 = vpop.permute.xlu1 %5530 }
 0x4c2   : > { %v5542_v47 = vmul.f32 %v8593_v9, %v8637_v4  ;;  %v5398_v12 = vmul.f32 %v8584_v46, %v8637_v4 }
 0x4c3   : > { %v5213_v15 = vadd.f32 %v4085_v3, %v7972_v13  ;;  %v4117_v50 = vpop.f32.mrf.mxu2  ;;  %4950 = vmatmul.f32.vlgmr.msrb.gmra.mxu0 %v8079_v29 }
 0x4c4   : > { %v4006_v37 = vpop.f32.mrf.mxu3  ;;  %5587 = vrot.lane.b32.xlu1 %v5542_v47, %s6079_s9  ;;  %5443 = vrot.lane.b32.xlu2 %v5398_v12, %s6078_s6 }
 0x4c5   : > { %v5257_v11 = vadd.f32 %v8547_v10, %v5213_v15  ;;  %v4007_v24 = vadd.f32 %v4006_v37, %v3962_v48  ;;  %5015 = vmatmul.f32.vlgmr.msrb.gmra.mxu1 %v8009_v32 }
 0x4c7   : > { %v5277_v59 = vmax.f32 %v5257_v11, 0.0  ;;  %v4052_v36 = vadd.f32 %v4051_v20, %v4007_v24 }
 0x4c8   : > { %4876 = vmatmul.f32.gmra.mxu2 %v8040_v42  ;;  %v4229_v13 = vpop.f32.mrf.mxu0 }
 0x4c9   : > { %v4089_v31 = vadd.f32 %v4088_v41, %v4052_v36  ;;  %4909 = vmatmul.f32.vlgmr.msrb.gmra.mxu3 %v8009_v32  ;;  %v8657_v29 = vsel %vm8601_vm6, %v5277_v59, 0.0  ;;  %v4272_v43 = vpop.f32.mrf.mxu1 }
 0x4ca   : > { %v5403_v54 = vmul.f32 %v8573_v28, %v8657_v29  ;;  %v5547_v3 = vmul.f32 %v8651_v1, %v8657_v29 }
 0x4cb   : > { %v5218_v20 = vadd.f32 %v4089_v31, %v7986_v17  ;;  %v4125_v47 = vpop.f32.mrf.mxu2  ;;  %4958 = vmatmul.f32.gmra.mxu0 %v8125_v62 }
 0x4cc   : > { %v4182_v12 = vpop.f32.mrf.mxu3  ;;  %5453 = vrot.lane.b32.xlu1 %v5403_v54, %s6078_s6  ;;  %5597 = vrot.lane.b32.xlu0 %v5547_v3, %s6079_s9 }
 0x4cd   : > { %v5262_v41 = vadd.f32 %v8540_v22, %v5218_v20  ;;  %5019 = vmatmul.f32.gmra.mxu1 %v8040_v42  ;;  %v4183_v54 = vadd.f32 %v4182_v12, %v4117_v50 }
 0x4cf   : > { %v5282_v48 = vmax.f32 %v5262_v41, 0.0 }
 0x4d0   : > { %4880 = vmatmul.f32.gmra.mxu2 %v8084_v0  ;;  %v4234_v15 = vpop.f32.mrf.mxu0 }
 0x4d1   : > { %4913 = vmatmul.f32.gmra.mxu3 %v8040_v42  ;;  %v8673_v17 = vsel %vm8601_vm6, %v5282_v48, 0.0  ;;  %v8675_v62 = vpop.f32.mrf.mxu1  ;;  %v4225_v48 = vadd.f32 %v8630_v58, %v4183_v54 }
 0x4d2   : > { %9322 = vst [vmem:[#allocation15_spill] sm:$0xff] %v8673_v17  ;;  %v5408_v37 = vmul.f32 %v8626_v49, %v8673_v17  ;;  %v5851_v17 = vadd.s32 4294967295, %v9323_v60 }
 0x4d3   : > { %v4133_v11 = vpop.f32.mrf.mxu2  ;;  %4966 = vmatmul.f32.gmra.mxu0 %v8159_v19 }
 0x4d4   : > { %v4186_v24 = vpop.f32.mrf.mxu3  ;;  %5463 = vrot.lane.b32.xlu2 %v5408_v37, %s6078_s6  ;;  %vm5293_vm7 = vcmp.ge.s32.totalorder %v5851_v17, 0  ;;  %vm5298_vm8 = vcmp.lt.s32.totalorder %v5851_v17, 1024 }
 0x4d5   : > { %5023 = vmatmul.f32.gmra.mxu1 %v8084_v0  ;;  %v4187_v37 = vadd.f32 %v4186_v24, %v4125_v47  ;;  %vm8717_vm9 = vmand %vm5293_vm7, %vm5298_vm8 }
 0x4d7   : > { %v4230_v54 = vadd.f32 %v4229_v13, %v4187_v37 }
 0x4d8   : > { %4884 = vmatmul.f32.gmra.mxu2 %v8130_v18  ;;  %v8683_v59 = vpop.f32.mrf.mxu0 }
 0x4d9   : > { %4917 = vmatmul.f32.gmra.mxu3 %v8084_v0  ;;  %v8686_v6 = vpop.f32.mrf.mxu1 }
 0x4db   : > { %v4141_v36 = vpop.f32.mrf.mxu2  ;;  %4974 = vmatmul.f32.gmra.mxu0 %v8197_v7 }
 0x4dc   : > { %v4190_v31 = vpop.f32.mrf.mxu3 }
 0x4dd   : > { %5027 = vmatmul.f32.gmra.mxu1 %v8130_v18  ;;  %v4191_v47 = vadd.f32 %v4190_v31, %v4133_v11 }
 0x4df   : > { %v4235_v17 = vadd.f32 %v4234_v15, %v4191_v47 }
 0x4e0   : > { %5057 = vmatmul.f32.vlgmr.msra.gmra.mxu2 %v8021_v23  ;;  %v8691_v19 = vpop.f32.mrf.mxu0  ;;  %v4267_v23 = vadd.f32 %v8639_v61, %v4225_v48  ;;  %v4273_v61 = vadd.f32 %v4272_v43, %v4230_v54 }
 0x4e1   : > { %4921 = vmatmul.f32.gmra.mxu3 %v8130_v18  ;;  %v8694_v3 = vpop.f32.mrf.mxu1  ;;  %v4279_v15 = vadd.f32 %v8675_v62, %v4235_v17 }
 0x4e3   : > { %v4317_v20 = vpop.f32.mrf.mxu2  ;;  %5150 = vmatmul.f32.vlgmr.msra.gmra.mxu0 %v8009_v32 }
 0x4e4   : > { %v4194_v41 = vpop.f32.mrf.mxu3  ;;  %v4318_v12 = vadd.f32 %v4317_v20, %v4267_v23 }
 0x4e5   : > { %5187 = vmatmul.f32.vlgmr.msra.gmra.mxu1 %v8009_v32  ;;  %v4195_v31 = vadd.f32 %v4194_v41, %v4141_v36  ;;  %v9328_v41 = vld [vmem:[#allocation13_spill] sm:$0xff] }
 0x4e8   : > { %5062 = vmatmul.f32.gmra.mxu2 %v8065_v57  ;;  %v8700_v7 = vpop.f32.mrf.mxu0  ;;  %v9324_v57 = vld [vmem:[#allocation22_spill] sm:$0xff] }
 0x4e9   : > { %5099 = vmatmul.f32.vlgmr.msra.gmra.mxu3 %v8038_v8  ;;  %v8704_v50 = vpop.f32.mrf.mxu1 }
 0x4ea   : > { %v4465_v13 = vadd.f32 %v8704_v50, %v8700_v7 }
 0x4eb   : > { %v4321_v35 = vpop.f32.mrf.mxu2  ;;  %5154 = vmatmul.f32.gmra.mxu0 %v8040_v42 }
 0x4ec   : > { %v4354_v58 = vpop.f32.mrf.mxu3 }
 0x4ed   : > { %v4355_v32 = vadd.f32 %v4354_v58, %v4318_v12  ;;  %5191 = vmatmul.f32.gmra.mxu1 %v8040_v42  ;;  %v4322_v42 = vadd.f32 %v4321_v35, %v4273_v61 }
 0x4ef   : > { %v5204_v53 = vadd.f32 %v4355_v32, %v9324_v57  ;;  %v4240_v57 = vadd.f32 %v8683_v59, %v4195_v31  ;;  %v4461_v31 = vadd.f32 %v8694_v3, %v8691_v19 }
 0x4f0   : > { %5067 = vmatmul.f32.gmra.mxu2 %v8106_v2  ;;  %v8711_v8 = vpop.f32.mrf.mxu0 }
 0x4f1   : > { %v5248_v24 = vadd.f32 %v8525_v34, %v5204_v53  ;;  %5105 = vmatmul.f32.gmra.mxu3 %v8082_v63  ;;  %v8715_v60 = vpop.f32.mrf.mxu1  ;;  %v9327_v53 = vld [vmem:[#allocation12_spill] sm:$0xff] }
 0x4f3   : > { %v5268_v20 = vmax.f32 %v5248_v24, 0.0  ;;  %v4325_v48 = vpop.f32.mrf.mxu2  ;;  %5158 = vmatmul.f32.gmra.mxu0 %v8084_v0  ;;  %v4285_v24 = vadd.f32 %v8686_v6, %v4240_v57  ;;  %v9329_v6 = vld [vmem:[#allocation17_spill] sm:$0xff]  ;;  %v8770_v57 = vpop.permute.xlu2 %5534 }
 0x4f4   : > { %v4358_v2 = vpop.f32.mrf.mxu3 }
 0x4f5   : > { %v4359_v23 = vadd.f32 %v4358_v2, %v4322_v42  ;;  %v8724_v43 = vsel %vm8717_vm9, %v5268_v20, 0.0  ;;  %5195 = vmatmul.f32.gmra.mxu1 %v8084_v0  ;;  %v4326_v0 = vadd.f32 %v4325_v48, %v4279_v15 }
 0x4f6   : > { %v5394_v63 = vmul.f32 %v8596_v33, %v8724_v43 }
 0x4f7   : > { %v5209_v11 = vadd.f32 %v4359_v23, %v9327_v53 }
 0x4f8   : > { %5435 = vrot.lane.b32.xlu1 %v5394_v63, %s6078_s6  ;;  %5072 = vmatmul.f32.gmra.mxu2 %v8153_v14  ;;  %v8732_v35 = vpop.f32.mrf.mxu0 }
 0x4f9   : > { %v5253_v37 = vadd.f32 %v8621_v55, %v5209_v11  ;;  %5111 = vmatmul.f32.gmra.mxu3 %v8128_v51  ;;  %v8737_v12 = vpop.f32.mrf.mxu1  ;;  %v5538_v51 = vmul.f32 %v8605_v52, %v8724_v43 }
 0x4fb   : > { %v5273_v58 = vmax.f32 %v5253_v37, 0.0  ;;  %v4329_v54 = vpop.f32.mrf.mxu2  ;;  %5162 = vmatmul.f32.gmra.mxu0 %v8130_v18 }
 0x4fc   : > { %v4362_v32 = vpop.f32.mrf.mxu3  ;;  %v4330_v20 = vadd.f32 %v4329_v54, %v4285_v24 }
 0x4fd   : > { %v4363_v14 = vadd.f32 %v4362_v32, %v4326_v0  ;;  %v8743_v61 = vsel %vm8717_vm9, %v5273_v58, 0.0  ;;  %5199 = vmatmul.f32.gmra.mxu1 %v8130_v18 }
 0x4fe   : > { %v5399_v62 = vmul.f32 %v8584_v46, %v8743_v61  ;;  %v5543_v36 = vmul.f32 %v8593_v9, %v8743_v61 }
 0x4ff   : > { %v5214_v47 = vadd.f32 %v4363_v14, %v9328_v41  ;;  %v9330_v41 = vld [vmem:[#allocation11_spill] sm:$0xff] }
 0x500   : > { %5579 = vrot.lane.b32.xlu1 %v5538_v51, %s6079_s9  ;;  %5445 = vrot.lane.b32.xlu0 %v5399_v62, %s6078_s6  ;;  %v4595_v59 = vpop.f32.mrf.mxu0 }
 0x501   : > { %v5258_v18 = vadd.f32 %v8547_v10, %v5214_v47  ;;  %5589 = vrot.lane.b32.xlu2 %v5543_v36, %s6079_s9  ;;  %5117 = vmatmul.f32.gmra.mxu3 %v8162_v40  ;;  %v4632_v42 = vpop.f32.mrf.mxu1  ;;  %v5852_v47 = vadd.s32 4294967295, %v9330_v41 }
 0x503   : > { %v5278_v48 = vmax.f32 %v5258_v18, 0.0  ;;  %v4502_v2 = vpop.f32.mrf.mxu2  ;;  %vm5294_vm10 = vcmp.ge.s32.totalorder %v5852_v47, 0  ;;  %vm5299_vm11 = vcmp.lt.s32.totalorder %v5852_v47, 1024 }
 0x504   : > { %v4366_v17 = vpop.f32.mrf.mxu3  ;;  %v4503_v58 = vadd.f32 %v4502_v2, %v4461_v31  ;;  %vm8790_vm12 = vmand %vm5294_vm10, %vm5299_vm11 }
 0x505   : > { %v4367_v23 = vadd.f32 %v4366_v17, %v4330_v20  ;;  %v8761_v63 = vsel %vm8717_vm9, %v5278_v48, 0.0 }
 0x506   : > { %v5404_v53 = vmul.f32 %v8573_v28, %v8761_v63  ;;  %v5548_v36 = vmul.f32 %v8651_v1, %v8761_v63 }
 0x507   : > { %v5219_v11 = vadd.f32 %v4367_v23, %v9329_v6 }
 0x508   : > { %v4599_v15 = vpop.f32.mrf.mxu0 }
 0x509   : > { %v5263_v40 = vadd.f32 %v8540_v22, %v5219_v11  ;;  %5455 = vrot.lane.b32.xlu2 %v5404_v53, %s6078_s6  ;;  %v4636_v37 = vpop.f32.mrf.mxu1 }
 0x50b   : > { %v5283_v0 = vmax.f32 %v5263_v40, 0.0  ;;  %v4507_v54 = vpop.f32.mrf.mxu2 }
 0x50c   : > { %v4544_v32 = vpop.f32.mrf.mxu3  ;;  %v4508_v48 = vadd.f32 %v4507_v54, %v4465_v13 }
 0x50d   : > { %v4545_v14 = vadd.f32 %v4544_v32, %v4503_v58  ;;  %v8774_v51 = vsel %vm8717_vm9, %v5283_v0, 0.0 }
 0x50e   : > { %v5553_v62 = vmul.f32 %v8770_v57, %v8774_v51  ;;  %v5409_v19 = vmul.f32 %v8626_v49, %v8774_v51 }
 0x50f   : > { %v4596_v3 = vadd.f32 %v4595_v59, %v4545_v14 }
 0x510   : > { %5609 = vrot.lane.b32.xlu1 %v5553_v62, %s6079_s9  ;;  %5465 = vrot.lane.b32.xlu0 %v5409_v19, %s6078_s6  ;;  %v4603_v24 = vpop.f32.mrf.mxu0  ;;  %v4473_v19 = vadd.f32 %v8737_v12, %v8732_v35 }
 0x511   : > { %v4633_v18 = vadd.f32 %v4632_v42, %v4596_v3  ;;  %5599 = vrot.lane.b32.xlu2 %v5548_v36, %s6079_s9  ;;  %v4640_v20 = vpop.f32.mrf.mxu1  ;;  %v4469_v42 = vadd.f32 %v8715_v60, %v8711_v8 }
 0x513   : > { %v5205_v59 = vadd.f32 %v4633_v18, %v8267_v27  ;;  %v4512_v2 = vpop.f32.mrf.mxu2 }
 0x514   : > { %v4550_v17 = vpop.f32.mrf.mxu3  ;;  %v4513_v58 = vadd.f32 %v4512_v2, %v4469_v42 }
 0x515   : > { %v5249_v23 = vadd.f32 %v8525_v34, %v5205_v59  ;;  %v4551_v53 = vadd.f32 %v4550_v17, %v4508_v48 }
 0x517   : > { %v5269_v11 = vmax.f32 %v5249_v23, 0.0  ;;  %v4600_v7 = vadd.f32 %v4599_v15, %v4551_v53 }
 0x518   : > { %v4607_v50 = vpop.f32.mrf.mxu0 }
 0x519   : > { %v4637_v31 = vadd.f32 %v4636_v37, %v4600_v7  ;;  %v8798_v27 = vsel %vm8790_vm12, %v5269_v11, 0.0  ;;  %v4644_v40 = vpop.f32.mrf.mxu1 }
 0x51a   : > { %v5395_v0 = vmul.f32 %v8596_v33, %v8798_v27  ;;  %v5539_v48 = vmul.f32 %v8605_v52, %v8798_v27 }
 0x51b   : > { %v5210_v54 = vadd.f32 %v4637_v31, %v8282_v30  ;;  %v4517_v32 = vpop.f32.mrf.mxu2 }
 0x51c   : > { %v4556_v14 = vpop.f32.mrf.mxu3  ;;  %5437 = vrot.lane.b32.xlu2 %v5395_v0, %s6078_s6  ;;  %v4518_v13 = vadd.f32 %v4517_v32, %v4473_v19 }
 0x51d   : > { %v5254_v15 = vadd.f32 %v8621_v55, %v5210_v54  ;;  %v4557_v62 = vadd.f32 %v4556_v14, %v4513_v58 }
 0x51f   : > { %v5274_v8 = vmax.f32 %v5254_v15, 0.0  ;;  %v4604_v60 = vadd.f32 %v4603_v24, %v4557_v62 }
 0x520   : > { %v4780_v37 = vpop.f32.mrf.mxu0 }
 0x521   : > { %v4641_v3 = vadd.f32 %v4640_v20, %v4604_v60  ;;  %v8809_v36 = vsel %vm8790_vm12, %v5274_v8, 0.0  ;;  %v4822_v41 = vpop.f32.mrf.mxu1 }
 0x522   : > { %v5400_v30 = vmul.f32 %v8584_v46, %v8809_v36  ;;  %v5544_v47 = vmul.f32 %v8593_v9, %v8809_v36 }
 0x523   : > { %v5215_v18 = vadd.f32 %v4641_v3, %v8292_v5  ;;  %v4673_v24 = vpop.f32.mrf.mxu2  ;;  %v8846_v3 = vpop.permute.xlu2 %5433 }
 0x524   : > { %v4562_v35 = vpop.f32.mrf.mxu3  ;;  %5447 = vrot.lane.b32.xlu1 %v5400_v30, %s6078_s6  ;;  %5591 = vrot.lane.b32.xlu0 %v5544_v47, %s6079_s9 }
 0x525   : > { %v5259_v12 = vadd.f32 %v8547_v10, %v5215_v18  ;;  %v4563_v20 = vadd.f32 %v4562_v35, %v4518_v13  ;;  %5581 = vrot.lane.b32.xlu2 %v5539_v48, %s6079_s9 }
 0x527   : > { %v5279_v59 = vmax.f32 %v5259_v12, 0.0  ;;  %v4608_v2 = vadd.f32 %v4607_v50, %v4563_v20 }
 0x528   : > { %v4785_v17 = vpop.f32.mrf.mxu0 }
 0x529   : > { %v4645_v23 = vadd.f32 %v4644_v40, %v4608_v2  ;;  %v8824_v5 = vsel %vm8790_vm12, %v5279_v59, 0.0  ;;  %v4828_v53 = vpop.f32.mrf.mxu1 }
 0x52a   : > { %v5405_v11 = vmul.f32 %v8573_v28, %v8824_v5  ;;  %v5549_v14 = vmul.f32 %v8651_v1, %v8824_v5 }
 0x52b   : > { %v5220_v7 = vadd.f32 %v4645_v23, %v8310_v26  ;;  %v4681_v42 = vpop.f32.mrf.mxu2  ;;  %v8854_v2 = vpop.permute.xlu2 %5443 }
 0x52c   : > { %v4738_v31 = vpop.f32.mrf.mxu3  ;;  %5457 = vrot.lane.b32.xlu0 %v5405_v11, %s6078_s6 }
 0x52d   : > { %v5264_v0 = vadd.f32 %v8540_v22, %v5220_v7  ;;  %v4739_v47 = vadd.f32 %v4738_v31, %v4673_v24 }
 0x52f   : > { %v5284_v58 = vmax.f32 %v5264_v0, 0.0  ;;  %v4781_v35 = vadd.f32 %v4780_v37, %v4739_v47  ;;  %v9333_v0 = vld [vmem:[#allocation14_spill] sm:$0xff] }
 0x530   : > { %v4790_v50 = vpop.f32.mrf.mxu0 }
 0x531   : > { %v8833_v40 = vsel %vm8790_vm12, %v5284_v58, 0.0  ;;  %v4834_v54 = vpop.f32.mrf.mxu1  ;;  %v4823_v20 = vadd.f32 %v4822_v41, %v4781_v35  ;;  %v5853_v58 = vadd.s32 4294967295, %v9333_v0 }
 0x532   : > { %v5410_v32 = vmul.f32 %v8626_v49, %v8833_v40  ;;  %v5554_v26 = vmul.f32 %v8770_v57, %v8833_v40 }
 0x533   : > { %v4689_v15 = vpop.f32.mrf.mxu2  ;;  %vm5295_vm13 = vcmp.ge.s32.totalorder %v5853_v58, 0  ;;  %vm5300_vm14 = vcmp.lt.s32.totalorder %v5853_v58, 1024 }
 0x534   : > { %v4742_v62 = vpop.f32.mrf.mxu3  ;;  %5467 = vrot.lane.b32.xlu1 %v5410_v32, %s6078_s6  ;;  %5601 = vrot.lane.b32.xlu0 %v5549_v14, %s6079_s9  ;;  %vm8863_vm15 = vmand %vm5295_vm13, %vm5300_vm14 }
 0x535   : > { %5611 = vrot.lane.b32.xlu2 %v5554_v26, %s6079_s9  ;;  %v4743_v59 = vadd.f32 %v4742_v62, %v4681_v42  ;;  %v8861_v42 = vpop.permute.xlu0 %5343 }
 0x536   : > { %v5588_v58 = vpop.permute.xlu1 %5587 }
 0x537   : > { %v4786_v14 = vadd.f32 %v4785_v17, %v4743_v59 }
 0x538   : > { %v4795_v6 = vpop.f32.mrf.mxu0 }
 0x539   : > { %v4829_v37 = vadd.f32 %v4828_v53, %v4786_v14 }
 0x53a   : > { %v8844_v8 = vpop.f32.mrf.mxu1 }
 0x53b   : > { %v4697_v60 = vpop.f32.mrf.mxu2 }
 0x53c   : > { %v4746_v19 = vpop.f32.mrf.mxu3 }
 0x53d   : > { %v4747_v26 = vadd.f32 %v4746_v19, %v4689_v15 }
 0x53f   : > { %v4791_v59 = vadd.f32 %v4790_v50, %v4747_v26  ;;  %v8882_v50 = vpop.permute.xlu0 %5358 }
 0x540   : > { %v8848_v30 = vpop.f32.mrf.mxu0 }
 0x542   : > { %v8850_v13 = vpop.f32.mrf.mxu1 }
 0x543   : > { %v4873_v18 = vpop.f32.mrf.mxu2 }
 0x544   : > { %v4750_v48 = vpop.f32.mrf.mxu3  ;;  %v4874_v23 = vadd.f32 %v4873_v18, %v4823_v20  ;;  %v8869_v18 = vpop.permute.xlu2 %5463 }
 0x548   : > { %v8852_v12 = vpop.f32.mrf.mxu0 }
 0x54a   : > { %v8856_v7 = vpop.f32.mrf.mxu1 }
 0x54b   : > { %v4877_v11 = vpop.f32.mrf.mxu2 }
 0x54c   : > { %v4910_v32 = vpop.f32.mrf.mxu3  ;;  %v4878_v17 = vadd.f32 %v4877_v11, %v4829_v37  ;;  %v4835_v11 = vadd.f32 %v4834_v54, %v4791_v59 }
 0x54d   : > { %v4911_v24 = vadd.f32 %v4910_v32, %v4874_v23  ;;  %v4751_v32 = vadd.f32 %v4750_v48, %v4697_v60 }
 0x54f   : > { %v5206_v31 = vadd.f32 %v4911_v24, %v8339_v56 }
 0x550   : > { %v8867_v47 = vpop.f32.mrf.mxu0 }
 0x551   : > { %v5250_v41 = vadd.f32 %v8525_v34, %v5206_v31 }
 0x552   : > { %v8875_v15 = vpop.f32.mrf.mxu1 }
 0x553   : > { %v5270_v35 = vmax.f32 %v5250_v41, 0.0  ;;  %v4881_v20 = vpop.f32.mrf.mxu2 }
 0x554   : > { %v4914_v56 = vpop.f32.mrf.mxu3  ;;  %v4882_v24 = vadd.f32 %v4881_v20, %v4835_v11 }
 0x555   : > { %v4915_v23 = vadd.f32 %v4914_v56, %v4878_v17  ;;  %v8873_v53 = vsel %vm8863_vm15, %v5270_v35, 0.0  ;;  %v4796_v35 = vadd.f32 %v4795_v6, %v4751_v32 }
 0x556   : > { %v5396_v19 = vmul.f32 %v8596_v33, %v8873_v53  ;;  %v5540_v48 = vmul.f32 %v8605_v52, %v8873_v53 }
 0x557   : > { %v5211_v0 = vadd.f32 %v4915_v23, %v8365_v16  ;;  %v4841_v6 = vadd.f32 %v8844_v8, %v4796_v35 }
 0x558   : > { %5439 = vrot.lane.b32.xlu0 %v5396_v19, %s6078_s6  ;;  %v8890_v16 = vpop.f32.mrf.mxu0 }
 0x559   : > { %v5255_v14 = vadd.f32 %v8621_v55, %v5211_v0  ;;  %v5578_v0 = vpop.permute.xlu0 %5577 }
 0x55a   : > { %v8903_v23 = vpop.f32.mrf.mxu1 }
 0x55b   : > { %v5275_v31 = vmax.f32 %v5255_v14, 0.0  ;;  %v8884_v37 = vpop.permute.xlu2 %5589  ;;  %v4885_v26 = vpop.f32.mrf.mxu2  ;;  %v5369_v14 = vmul.f32 %v8556_v44, %v8657_v29 }
 0x55c   : > { %v8888_v41 = vsel %vm627_vm1, %v5588_v58, %v8884_v37  ;;  %v4918_v17 = vpop.f32.mrf.mxu3  ;;  %v5454_v58 = vpop.permute.xlu1 %5453  ;;  %v4886_v11 = vadd.f32 %v4885_v26, %v4841_v6 }
 0x55d   : > { %v4919_v56 = vadd.f32 %v4918_v17, %v4882_v24  ;;  %v8894_v54 = vsel %vm8863_vm15, %v5275_v31, 0.0 }
 0x55e   : > { %v5545_v60 = vmul.f32 %v8593_v9, %v8894_v54  ;;  %v5401_v20 = vmul.f32 %v8584_v46, %v8894_v54 }
 0x55f   : > { %v5216_v59 = vadd.f32 %v4919_v56, %v8391_v39 }
 0x560   : > { %5593 = vrot.lane.b32.xlu1 %v5545_v60, %s6079_s9  ;;  %5583 = vrot.lane.b32.xlu0 %v5540_v48, %s6079_s9  ;;  %v5151_v60 = vpop.f32.mrf.mxu0 }
 0x561   : > { %v5260_v19 = vadd.f32 %v8547_v10, %v5216_v59  ;;  %5449 = vrot.lane.b32.xlu2 %v5401_v20, %s6078_s6  ;;  %v5017_v20 = vadd.f32 %v8850_v13, %v8848_v30  ;;  %v5598_v6 = vpop.permute.xlu0 %5597 }
 0x562   : > { %v5188_v29 = vpop.f32.mrf.mxu1 }
 0x563   : > { %v5280_v32 = vmax.f32 %v5260_v19, 0.0  ;;  %v8912_v39 = vpop.permute.xlu2 %5455  ;;  %v5058_v24 = vpop.f32.mrf.mxu2 }
 0x564   : > { %v5481_v31 = vsel %vm474_vm0, %v5454_v58, %v8912_v39  ;;  %v4922_v17 = vpop.f32.mrf.mxu3  ;;  %v5361_v58 = vmul.f32 %v8861_v42, %v8613_v45 }
 0x565   : > { %v5513_v56 = vadd.f32 %v5481_v31, %v5369_v14  ;;  %v4923_v8 = vadd.f32 %v4922_v17, %v4886_v11  ;;  %v8918_v35 = vsel %vm8863_vm15, %v5280_v32, 0.0  ;;  %v5059_v32 = vadd.f32 %v5058_v24, %v5017_v20  ;;  %v9336_v24 = vld [vmem:[#allocation16_spill] sm:$0xff] }
 0x566   : > { %v5406_v26 = vmul.f32 %v8573_v28, %v8918_v35  ;;  %v5550_v45 = vmul.f32 %v8651_v1, %v8918_v35  ;;  %v5854_v20 = vadd.s32 4294967295, %v9336_v24 }
 0x567   : > { %v5221_v48 = vadd.f32 %v4923_v8, %v8423_v38 }
 0x568   : > { %5459 = vrot.lane.b32.xlu1 %v5406_v26, %s6078_s6  ;;  %vm5296_vm2 = vcmp.ge.s32.totalorder %v5854_v20, 0  ;;  %vm5301_vm3 = vcmp.lt.s32.totalorder %v5854_v20, 1024 }
 0x569   : > { %v5265_v59 = vadd.f32 %v8540_v22, %v5221_v48  ;;  %vm8964_vm4 = vmand %vm5296_vm2, %vm5301_vm3 }
 0x56a   : > { %v5436_v19 = vpop.permute.xlu1 %5435 }
 0x56b   : > { %v5285_v11 = vmax.f32 %v5265_v59, 0.0  ;;  %v5473_v14 = vsel %vm474_vm0, %v8846_v3, %v5436_v19  ;;  %v8931_v31 = vpop.permute.xlu2 %5599  ;;  %v5063_v8 = vpop.f32.mrf.mxu2 }
 0x56c   : > { %v5505_v38 = vadd.f32 %v5473_v14, %v5361_v58  ;;  %v5625_v17 = vsel %vm627_vm1, %v5598_v6, %v8931_v31  ;;  %v5100_v30 = vpop.f32.mrf.mxu3  ;;  %v5155_v6 = vpop.f32.mrf.mxu0 }
 0x56d   : > { %v5657_v13 = vadd.f32 %v5625_v17, %v5513_v56  ;;  %v5101_v26 = vadd.f32 %v5100_v30, %v5059_v32  ;;  %v8937_v48 = vsel %vm8863_vm15, %v5285_v11, 0.0  ;;  %v5021_v56 = vadd.f32 %v8856_v7, %v8852_v12  ;;  %v5192_v58 = vpop.f32.mrf.mxu1 }
 0x56e   : > { %v5411_v3 = vmul.f32 %v8626_v49, %v8937_v48  ;;  %v5365_v32 = vmul.f32 %v8578_v25, %v8637_v4 }
 0x56f   : > { %v5152_v59 = vadd.f32 %v5151_v60, %v5101_v26  ;;  %v5064_v17 = vadd.f32 %v5063_v8, %v5021_v56  ;;  %v5362_v8 = vmul.f32 %v8861_v42, %v8724_v43 }
 0x570   : > { %5603 = vrot.lane.b32.xlu1 %v5550_v45, %s6079_s9  ;;  %5469 = vrot.lane.b32.xlu2 %v5411_v3, %s6078_s6 }
 0x571   : > { %v5189_v62 = vadd.f32 %v5188_v29, %v5152_v59 }
 0x572   : > { %v5580_v11 = vpop.permute.xlu1 %5579  ;;  %v8950_v14 = vpop.permute.xlu0 %5445 }
 0x573   : > { %v5207_v60 = vadd.f32 %v5189_v62, %v8518_v21  ;;  %v5617_v30 = vsel %vm627_vm1, %v5578_v0, %v5580_v11  ;;  %v5477_v26 = vsel %vm474_vm0, %v8854_v2, %v8950_v14  ;;  %v5068_v24 = vpop.f32.mrf.mxu2 }
 0x574   : > { %v5649_v12 = vadd.f32 %v5617_v30, %v5505_v38  ;;  %v5509_v7 = vadd.f32 %v5477_v26, %v5365_v32  ;;  %v5106_v29 = vpop.f32.mrf.mxu3  ;;  %v5159_v32 = vpop.f32.mrf.mxu0  ;;  %v9339_v30 = vld [vmem:[#allocation25_spill] sm:$0xff] }
 0x575   : > { %v5251_v45 = vadd.f32 %v8525_v34, %v5207_v60  ;;  %v5107_v3 = vadd.f32 %v5106_v29, %v5064_v17 }
 0x576   : > { %v5653_v4 = vadd.f32 %v8888_v41, %v5509_v7  ;;  %v8961_v59 = vpop.permute.xlu2 %5437  ;;  %v5025_v41 = vadd.f32 %v8875_v15, %v8867_v47 }
 0x577   : > { %v5271_v2 = vmax.f32 %v5251_v45, 0.0  ;;  %v5156_v0 = vadd.f32 %v5155_v6, %v5107_v3  ;;  %v5474_v38 = vsel %vm474_vm0, %v5436_v19, %v8961_v59  ;;  %v5196_v19 = vpop.f32.mrf.mxu1 }
 0x578   : > { %v5665_v34 = vadd.f32 %v5653_v4, %v5649_v12  ;;  %v5506_v56 = vadd.f32 %v5474_v38, %v5362_v8  ;;  %v5069_v60 = vadd.f32 %v5068_v24, %v5025_v41 }
 0x579   : > { %v5193_v62 = vadd.f32 %v5192_v58, %v5156_v0  ;;  %v5321_v43 = vsel %vm8964_vm4, %v5271_v2, 0.0 }
 0x57a   : > { %v5397_v20 = vmul.f32 %v8596_v33, %v5321_v43  ;;  %v8975_v17 = vadd.f32 %v5665_v34, %v5657_v13  ;;  %v5029_v13 = vadd.f32 %v8903_v23, %v8890_v16  ;;  %v5541_v24 = vmul.f32 %v8605_v52, %v5321_v43 }
 0x57b   : > { %v5212_v6 = vadd.f32 %v5193_v62, %v9339_v30  ;;  %v5073_v29 = vpop.f32.mrf.mxu2 }
 0x57c   : > { %v5112_v26 = vpop.f32.mrf.mxu3  ;;  %5441 = vrot.lane.b32.xlu1 %v5397_v20, %s6078_s6  ;;  %v5074_v34 = vadd.f32 %v5073_v29, %v5029_v13  ;;  %v5163_v52 = vpop.f32.mrf.mxu0 }
 0x57d   : > { %v5256_v12 = vadd.f32 %v8621_v55, %v5212_v6  ;;  %v5113_v7 = vadd.f32 %v5112_v26, %v5069_v60  ;;  %v9340_v55 = vld [vmem:[#allocation15_spill] sm:$0xff]  ;;  %v9342_v6 = vld [vmem:[#allocation26_spill] sm:$0xff] }
 0x57e   : > { %v5373_v8 = vmul.f32 %v8882_v50, %v9340_v55 }
 0x57f   : > { %v5276_v47 = vmax.f32 %v5256_v12, 0.0  ;;  %v5160_v15 = vadd.f32 %v5159_v32, %v5113_v7  ;;  %v8980_v58 = vpop.permute.xlu2 %5581 }
 0x580   : > { %v5618_v33 = vsel %vm627_vm1, %v5580_v11, %v8980_v58  ;;  %v9341_v11 = vld [vmem:[#allocation21_spill] sm:$0xff] }
 0x581   : > { %v5650_v45 = vadd.f32 %v5618_v33, %v5506_v56  ;;  %v5197_v3 = vadd.f32 %v5196_v19, %v5160_v15  ;;  %v5326_v4 = vsel %vm8964_vm4, %v5276_v47, 0.0 }
 0x582   : > { %v5466_v2 = vpop.permute.xlu0 %5465  ;;  %v5402_v0 = vmul.f32 %v8584_v46, %v5326_v4  ;;  %v5546_v38 = vmul.f32 %v8593_v9, %v5326_v4  ;;  %v5200_v46 = vpop.f32.mrf.mxu1 }
 0x583   : > { %v5217_v41 = vadd.f32 %v5197_v3, %v9341_v11  ;;  %v5485_v16 = vsel %vm474_vm0, %v8869_v18, %v5466_v2  ;;  %v9010_v19 = vpop.permute.xlu1 %5609  ;;  %v5555_v3 = vmul.f32 %v8770_v57, %v8937_v48 }
 0x584   : > { %v8996_v23 = vadd.f32 %v5485_v16, %v5373_v8  ;;  %v5118_v56 = vpop.f32.mrf.mxu3  ;;  %5585 = vrot.lane.b32.xlu1 %v5541_v24, %s6079_s9  ;;  %5451 = vrot.lane.b32.xlu0 %v5402_v0, %s6078_s6  ;;  %v5370_v24 = vmul.f32 %v8556_v44, %v8761_v63 }
 0x585   : > { %v5261_v62 = vadd.f32 %v8547_v10, %v5217_v41  ;;  %v5119_v43 = vadd.f32 %v5118_v56, %v5074_v34  ;;  %5595 = vrot.lane.b32.xlu2 %v5546_v38, %s6079_s9 }
 0x587   : > { %v5281_v9 = vmax.f32 %v5261_v62, 0.0  ;;  %v5164_v20 = vadd.f32 %v5163_v52, %v5119_v43 }
 0x589   : > { %v5331_v32 = vsel %vm8964_vm4, %v5281_v9, 0.0  ;;  %v5201_v18 = vadd.f32 %v5200_v46, %v5164_v20 }
 0x58a   : > { %v5407_v60 = vmul.f32 %v8573_v28, %v5331_v32  ;;  %v5551_v30 = vmul.f32 %v8651_v1, %v5331_v32  ;;  %v5552_v1 = vmul.f32 %v8770_v57, %v9340_v55 }
 0x58b   : > { %v5222_v26 = vadd.f32 %v5201_v18, %v9342_v6 }
 0x58c   : > { %5461 = vrot.lane.b32.xlu1 %v5407_v60, %s6078_s6 }
 0x58d   : > { %v5266_v10 = vadd.f32 %v8540_v22, %v5222_v26  ;;  %5605 = vrot.lane.b32.xlu2 %v5551_v30, %s6079_s9  ;;  %v5366_v22 = vmul.f32 %v8578_v25, %v8743_v61 }
 0x58f   : > { %v5286_v12 = vmax.f32 %v5266_v10, 0.0  ;;  %v9034_v0 = vpop.permute.xlu2 %5611 }
 0x591   : > { %v5336_v7 = vsel %vm8964_vm4, %v5286_v12, 0.0 }
 0x592   : > { %v5556_v47 = vmul.f32 %v8770_v57, %v5336_v7  ;;  %v5412_v28 = vmul.f32 %v8626_v49, %v5336_v7 }
 0x594   : > { %5615 = vrot.lane.b32.xlu1 %v5556_v47, %s6079_s9  ;;  %5471 = vrot.lane.b32.xlu0 %v5412_v28, %s6078_s6  ;;  %s310_s6 = sand.u32 1, %s6054_s27  }
 0x595   : > { %5607 = vrot.lane.b32.xlu2 %v5552_v1, %s6079_s9  ;;  %s5732_s29 = scalar_lea.sflag [#allocation5], %s310_s6 }
 0x596   : > { %v5448_v15 = vpop.permute.xlu1 %5447  ;;  %v5592_v29 = vpop.permute.xlu0 %5591 }
 0x597   : > { %v5478_v21 = vsel %vm474_vm0, %v8950_v14, %v5448_v15  ;;  %v5622_v49 = vsel %vm627_vm1, %v8884_v37, %v5592_v29  ;;  %v5701_v14 = vld [vmem:[#allocation2] sm:$0x1]  ;;  %v5374_v37 = vmul.f32 %v8882_v50, %v8774_v51 }
 0x598   : > { %v5510_v33 = vadd.f32 %v5478_v21, %v5366_v22 }
 0x59a   : > { %v5654_v13 = vadd.f32 %v5622_v49, %v5510_v33 }
 0x59c   : > { %v5674_v4 = vadd.f32 %v5654_v13, %v5650_v45  ;;  %5613 = vrot.lane.b32.xlu0 %v5555_v3, %s6079_s9  ;;  %s5843_s9 = sshll.u32 %s310_s6, 2 }
 0x59d   : > { %s312_s17 = scalar_lea.vmem [#allocation6], %s5843_s9 }
 0x59e   : > { %v5458_v61 = vpop.permute.xlu0 %5457  ;;  %s5746_s18 = sshll.u32 %s312_s17, 4  ;;  %s5747_s18 = int_to_ptr.vmem [resolvable:$true] %s5746_s18 }
 0x59f   : > { %v5482_v55 = vsel %vm474_vm0, %v8912_v39, %v5458_v61  ;;  %v5630_v39 = vsel %vm627_vm1, %v9010_v19, %v9034_v0 }
 0x5a0   : > { %v5514_v8 = vadd.f32 %v5482_v55, %v5370_v24 }
 0x5a4   : > { %5704 = vperm.xlu0 %5955, %v5701_v14  }
 0x5a6   : > { %v9038_v38 = vpop.permute.xlu1 %5467  ;;  %v5602_v57 = vpop.permute.xlu0 %5601 }
 0x5a7   : > { %v5486_v45 = vsel %vm474_vm0, %v5466_v2, %v9038_v38  ;;  %v5626_v63 = vsel %vm627_vm1, %v8931_v31, %v5602_v57  ;;  %v5367_v2 = vmul.f32 %v8578_v25, %v8809_v36  ;;  %v5363_v31 = vmul.f32 %v8861_v42, %v8798_v27 }
 0x5a8   : > { %v5518_v34 = vadd.f32 %v5486_v45, %v5374_v37  ;;  %v5658_v11 = vadd.f32 %v5626_v63, %v5514_v8  ;;  %v5371_v27 = vmul.f32 %v8556_v44, %v8824_v5  ;;  %v5364_v5 = vmul.f32 %v8861_v42, %v8873_v53 }
 0x5aa   : > { %v5662_v41 = vadd.f32 %v5630_v39, %v5518_v34  ;;  %v5675_v16 = vadd.f32 %v5674_v4, %v5658_v11  ;;  %v5368_v4 = vmul.f32 %v8578_v25, %v8894_v54 }
 0x5ac   : > { %v5676_v56 = vadd.f32 %v5675_v16, %v5662_v41 }
 0x5ae   : > { %v5677_v63 = vrot.slane %v5676_v56, 4 }
 0x5b0   : > { %v5678_v41 = vadd.f32 %v5677_v63, %v5676_v56 }
 0x5bb   : > { %v5450_v51 = vpop.permute.xlu2 %5449 }
 0x5bc   : > { %v5479_v62 = vsel %vm474_vm0, %v5448_v15, %v5450_v51 }
 0x5bd   : > { %v5511_v46 = vadd.f32 %v5479_v62, %v5367_v2 }
 0x5ca   : > { %v5440_v52 = vpop.permute.xlu0 %5439  ;;  %v5470_v10 = vpop.permute.xlu2 %5469 }
 0x5cb   : > { %v5475_v43 = vsel %vm474_vm0, %v8961_v59, %v5440_v52 }
 0x5cc   : > { %v5507_v9 = vadd.f32 %v5475_v43, %v5363_v31 }
 0x5d2   : > { %v5594_v20 = vpop.permute.xlu1 %5593  ;;  %v5584_v32 = vpop.permute.xlu0 %5583 }
 0x5d3   : > { %v5623_v18 = vsel %vm627_vm1, %v5592_v29, %v5594_v20  ;;  %v5619_v60 = vsel %vm627_vm1, %v8980_v58, %v5584_v32 }
 0x5d4   : > { %v5655_v30 = vadd.f32 %v5623_v18, %v5511_v46  ;;  %v5651_v6 = vadd.f32 %v5619_v60, %v5507_v9 }
 0x5d6   : > { %v5683_v26 = vadd.f32 %v5655_v30, %v5651_v6 }
 0x5da   : > { %v5460_v59 = vpop.permute.xlu1 %5459 }
 0x5db   : > { %v5483_v12 = vsel %vm474_vm0, %v5458_v61, %v5460_v59 }
 0x5dc   : > { %v5515_v7 = vadd.f32 %v5483_v12, %v5371_v27 }
 0x5df   : > { %v5596_v36 = vpop.permute.xlu2 %5595 }
 0x5e2   : > { %v5604_v47 = vpop.permute.xlu1 %5603 }
 0x5e3   : > { %v5627_v28 = vsel %vm627_vm1, %v5602_v57, %v5604_v47  ;;  %v5372_v57 = vmul.f32 %v8556_v44, %v8918_v35  ;;  %v5375_v44 = vmul.f32 %v8882_v50, %v8833_v40  ;;  %v5376_v35 = vmul.f32 %v8882_v50, %v8937_v48 }
 0x5e4   : > { %v5659_v1 = vadd.f32 %v5627_v28, %v5515_v7 }
 0x5e6   : > { %v5684_v22 = vadd.f32 %v5683_v26, %v5659_v1 }
 0x5e7   : > { %v5606_v15 = vpop.permute.xlu2 %5605 }
 0x5e8   : > { %v5628_v25 = vsel %vm627_vm1, %v5604_v47, %v5606_v15 }
 0x5ee   : > { %v5442_v29 = vpop.permute.xlu1 %5441 }
 0x5ef   : > { %v5608_v58 = vpop.permute.xlu2 %5607  ;;  %v5476_v13 = vsel %vm474_vm0, %v5440_v52, %v5442_v29  ;;  %v5679_v52 = vrot.slane %v5678_v41, 2 }
 0x5f0   : > { %v5629_v21 = vsel %vm627_vm1, %v5608_v58, %v9010_v19  ;;  %v5508_v8 = vadd.f32 %v5476_v13, %v5364_v5 }
 0x5f1   : > { %v5661_v33 = vadd.f32 %v5629_v21, %v8996_v23  ;;  %v5624_v23 = vsel %vm627_vm1, %v5594_v20, %v5596_v36  ;;  %v5680_v20 = vadd.f32 %v5679_v52, %v5678_v41 }
 0x5f3   : > { %v5667_v49 = vadd.f32 %v8975_v17, %v5661_v33  ;;  %v5681_v6 = vrot.slane %v5680_v20, 1 }
 0x5f5   : > { %v5668_v11 = vrot.slane %v5667_v49, 4  ;;  %v5682_v36 = vadd.f32 %v5681_v6, %v5680_v20 }
 0x5f6   : > { %v5586_v3 = vpop.permute.xlu1 %5585  ;;  %v5452_v24 = vpop.permute.xlu0 %5451 }
 0x5f7   : > { %v5620_v61 = vsel %vm627_vm1, %v5584_v32, %v5586_v3  ;;  %v5480_v55 = vsel %vm474_vm0, %v5450_v51, %v5452_v24  ;;  %v5669_v16 = vadd.f32 %v5668_v11, %v5667_v49  ;;  %v5487_v51 = vsel %vm474_vm0, %v9038_v38, %v5470_v10 }
 0x5f8   : > { %v5512_v19 = vadd.f32 %v5480_v55, %v5368_v4  ;;  %v5652_v14 = vadd.f32 %v5620_v61, %v5508_v8  ;;  %v5519_v2 = vadd.f32 %v5487_v51, %v5375_v44  ;;  %v9343_v61 = vlaneseq }
 0x5f9   : > { %v5670_v43 = vrot.slane %v5669_v16, 2 }
 0x5fa   : > { %v5656_v17 = vadd.f32 %v5624_v23, %v5512_v19  ;;  %vm5728_vm6 = vcmp.lt.s32.totalorder %v9343_v61, 512 }
 0x5fb   : > { %v5671_v60 = vadd.f32 %v5670_v43, %v5669_v16 }
 0x5fc   : > { %v5692_v37 = vadd.f32 %v5656_v17, %v5652_v14 }
 0x5fd   : > { %v5672_v48 = vrot.slane %v5671_v60, 1 }
 0x5fe   : > { %v5462_v42 = vpop.permute.xlu1 %5461 }
 0x5ff   : > { %v5484_v53 = vsel %vm474_vm0, %v5460_v59, %v5462_v42  ;;  %v5673_v47 = vadd.f32 %v5672_v48, %v5671_v60 }
 0x600   : > { %v5516_v45 = vadd.f32 %v5484_v53, %v5372_v57 }
 0x602   : > { %v5660_v54 = vadd.f32 %v5628_v25, %v5516_v45 }
 0x604   : > { %v5693_v34 = vadd.f32 %v5692_v37, %v5660_v54 }
 0x606   : > { %v5472_v39 = vpop.permute.xlu0 %5471  ;;  %v5616_v31 = vpop.permute.xlu1 %5615 }
 0x607   : > { %v5488_v62 = vsel %vm474_vm0, %v5470_v10, %v5472_v39  ;;  %vm5719_vm0 = vcmask 1040384  }
 0x608   : > { %v5520_v46 = vadd.f32 %v5488_v62, %v5376_v35 }
 0x60e   : > { %v5614_v9 = vpop.permute.xlu0 %5613 }
 0x60f   : > { %v5631_v56 = vsel %vm627_vm1, %v9034_v0, %v5614_v9  ;;  %v5632_v32 = vsel %vm627_vm1, %v5614_v9, %v5616_v31  ;;  %vm5721_vm1 = vcmask 1042434  }
 0x610   : > { %v5663_v38 = vadd.f32 %v5631_v56, %v5519_v2  ;;  %v5664_v18 = vadd.f32 %v5632_v32, %v5520_v46 }
 0x612   : > { %v5685_v30 = vadd.f32 %v5684_v22, %v5663_v38  ;;  %v5694_v40 = vadd.f32 %v5693_v34, %v5664_v18 }
 0x614   : > { %v5686_v26 = vrot.slane %v5685_v30, 4  ;;  %v5695_v50 = vrot.slane %v5694_v40, 4 }
 0x616   : > { %v5687_v10 = vadd.f32 %v5686_v26, %v5685_v30  ;;  %v5696_v59 = vadd.f32 %v5695_v50, %v5694_v40  ;;  %v5705_v12 = vpop.permute.xlu0 %5704 }
 0x617   : > { %v5707_v27 = vperm.slane %v5705_v12, 0 }
 0x618   : > { %v5688_v0 = vrot.slane %v5687_v10, 2  ;;  %v5697_v7 = vrot.slane %v5696_v59, 2 }
 0x619   : > { %v5709_v28 = vadd.f32 %v5707_v27, %v5682_v36  ;;  %v5708_v22 = vadd.f32 %v5707_v27, %v5673_v47 }
 0x61a   : > { %v5689_v1 = vadd.f32 %v5688_v0, %v5687_v10  ;;  %v5698_v15 = vadd.f32 %v5697_v7, %v5696_v59 }
 0x61b   : > { %v5716_v29 = vrot.slane %v5709_v28, 7 }
 0x61c   : > { %v5690_v58 = vrot.slane %v5689_v1, 1  ;;  %v5699_v21 = vrot.slane %v5698_v15, 1 }
 0x61d   : > { %v5720_v33 = vsel %vm5719_vm0, %v5708_v22, %v5716_v29 }
 0x61e   : > { %v5691_v49 = vadd.f32 %v5690_v58, %v5689_v1  ;;  %v5700_v13 = vadd.f32 %v5699_v21, %v5698_v15 }
 0x620   : > { %v5710_v5 = vadd.f32 %v5707_v27, %v5691_v49  ;;  %v5711_v3 = vadd.f32 %v5707_v27, %v5700_v13 }
 0x622   : > { %v5717_v4 = vrot.slane %v5710_v5, 6  ;;  %v5718_v24 = vrot.slane %v5711_v3, 5 }
 0x624   : > { %v5722_v55 = vsel %vm5721_vm1, %v5717_v4, %v5718_v24 }
 0x625   : > { %v5724_v8 = vsel %vm5723_vm5, %v5720_v33, %v5722_v55 }
 0x626   : > { %5730 = vst.msk [vmem:[%s312_s17] sm:$0xf] %vm5728_vm6, %v5724_v8 }
 0x627   : > { %6015 = shalt.err (!%p6012_p9)
}
 0x628   : > { %5872 = dma.vmem_to_hbm [thread:$0]  (%p6163_p4), %s5747_s18, 64, %s5749_s19, %s5732_s29  }
 0x629 PF: > { %p5884_p10 = scmp.ge.s32.totalorder %s6070_s8, 2  ;;  %s5760_s6 = sand.u32 1, %s6050_s26  }
 0x62a   : > { %s5761_s11 = scalar_lea.sflag [#allocation5], %s5760_s6 }
 0x62b   : > { %p5879_p11 = pnand %p5884_p10, %p6170_p8 }
 0x62d   : > { %p5880_p12 = pneg %p5879_p11 }
 0x62f   : > { %6045 = dma.done.wait (%p5880_p12), %s5761_s11, 64  }
 0x630   : > { %6047 = vsyncadd (%p5880_p12), %s5761_s11, 4294967232  ;;  %s23_s8 = sadd.s32 1, %s6070_s8   ;;  %s9344_s26 = smov %s6054_s27 }
 0x631   : > { %p20_p13 = scmp.ge.s32.totalorder %s23_s8, 4   ;;  %s9345_s27 = smov %s6058_s28 }
 0x632   : > { %s9346_s28 = smov %s6176_s15  ;;  %s9347_s29 = smov %s6066_s30 }
 0x633   : > { %s9348_s30 = smov %s9350_s10  ;;  %22 = sbr.rel (!%p20_p13) target bundleno = 8 (0x8), region = 90 }
 0x638   :  { %5767 = vsyncpa [#allocation4], 1 }
 0x639   :  { %5769 = vsyncpa [#allocation4 + $0x1], 1 }
 0x63a   :  { %5770 = vsyncpa [#allocation5], 1 }
 0x63b   :  { %5772 = vsyncpa [#allocation5 + $0x1], 1 }

</bundles_post_ra>
